<compile_context>
chip_gen: v7x
topology: tpu7x:2x2x1
jax: 0.10.0
libtpu: 0.0.40
codegen_flags: <defaults>
</compile_context>

<pallas_src>
import math
import functools

import jax
import jax.numpy as jnp
from jax import lax
from jax.experimental import pallas as pl
from jax.experimental.pallas import tpu as pltpu

NEG_INF = -1e30


# ----------------------------------------------------------------- small helpers

def _pick_tile(dim: int, pref: int, align: int) -> int:
    """Largest aligned tile <= pref that evenly divides dim (else the full dim)."""
    if dim <= pref:
        return dim
    t = (pref // align) * align
    while t >= align:
        if dim % t == 0:
            return t
        t -= align
    return dim


def _round_up(x: int, m: int) -> int:
    return ((x + m - 1) // m) * m


def _vmem_bytes(*tiles) -> int:
    """tiles = (num_elements, itemsize). Assume double-buffering everywhere + slack."""
    total = sum(2 * int(n) * int(isz) for n, isz in tiles)
    return int(total * 1.25) + (4 << 20)


def _cparams(grid_rank, vmem_est=None):
    # All emitted grid axes are data-parallel (no cross-step accumulators).
    kwargs = dict(dimension_semantics=("parallel",) * grid_rank)
    if vmem_est is not None:
        # Never below the 32 MiB default (no new failure modes for small shapes),
        # never above v7x's 64 MiB physical VMEM.
        kwargs["vmem_limit_bytes"] = int(min(64 << 20, max(32 << 20, int(vmem_est))))
    return pltpu.CompilerParams(**kwargs)


# ----------------------------------------------------------------- fused LN + Q/KV projection

def _ln_qkv_kernel(x_ref, g_ref, bln_ref, wq_ref, bq_ref, wkv_ref, bkv_ref,
                   q_ref, kv_ref):
    x = x_ref[...]
    mu = jnp.mean(x, axis=-1, keepdims=True)
    var = jnp.mean(jnp.square(x - mu), axis=-1, keepdims=True)
    xn = (x - mu) * lax.rsqrt(var + 1e-6) * g_ref[...] + bln_ref[...]
    xb = xn.astype(jnp.bfloat16)
    q_ref[...] = (jnp.dot(xb, wq_ref[...], preferred_element_type=jnp.float32)
                  + bq_ref[...]).astype(q_ref.dtype)
    kv_ref[...] = (jnp.dot(xb, wkv_ref[...], preferred_element_type=jnp.float32)
                   + bkv_ref[...]).astype(kv_ref.dtype)


def ln_qkv(x, g, bln, wq, bq, wkv, bkv, *, tm_pref=256):
    """LayerNorm(x) -> (Q, K|V) projections; Q/KV emitted in bf16 for the MXU."""
    M, D = x.shape
    N2 = wkv.shape[1]
    tm = _pick_tile(M, tm_pref, 16)
    vmem = _vmem_bytes((tm * D, 4), (tm * D, 2), (tm * N2, 2),
                       (D * D, 2), (D * N2, 2), (4 * D + N2, 4))
    return pl.pallas_call(
        _ln_qkv_kernel,
        out_shape=(jax.ShapeDtypeStruct((M, D), jnp.bfloat16),
                   jax.ShapeDtypeStruct((M, N2), jnp.bfloat16)),
        grid=(M // tm,),
        in_specs=[
            pl.BlockSpec((tm, D), lambda i: (i, 0)),
            pl.BlockSpec((1, D), lambda i: (0, 0)),
            pl.BlockSpec((1, D), lambda i: (0, 0)),
            pl.BlockSpec((D, D), lambda i: (0, 0)),     # Wq (bf16, resident)
            pl.BlockSpec((1, D), lambda i: (0, 0)),
            pl.BlockSpec((D, N2), lambda i: (0, 0)),    # Wkv (bf16, resident)
            pl.BlockSpec((1, N2), lambda i: (0, 0)),
        ],
        out_specs=(pl.BlockSpec((tm, D), lambda i: (i, 0)),
                   pl.BlockSpec((tm, N2), lambda i: (i, 0))),
        compiler_params=_cparams(1, vmem),
    )(x, g.reshape(1, D), bln.reshape(1, D), wq, bq.reshape(1, D), wkv, bkv.reshape(1, N2))


# ----------------------------------------------------------------- fused LN + linear (single out)

def _ln_linear_kernel(x_ref, g_ref, bln_ref, w_ref, b_ref, o_ref):
    x = x_ref[...]
    mu = jnp.mean(x, axis=-1, keepdims=True)
    var = jnp.mean(jnp.square(x - mu), axis=-1, keepdims=True)
    xn = (x - mu) * lax.rsqrt(var + 1e-6) * g_ref[...] + bln_ref[...]
    o_ref[...] = (jnp.dot(xn.astype(jnp.bfloat16), w_ref[...],
                          preferred_element_type=jnp.float32)
                  + b_ref[...]).astype(o_ref.dtype)


def ln_linear(x, g, bln, w, b, *, out_dtype=jnp.bfloat16, tm_pref=256):
    M, D = x.shape
    N = w.shape[1]
    tm = _pick_tile(M, tm_pref, 16)
    vmem = _vmem_bytes((tm * D, 4), (tm * N, 4), (D * N, 2), (2 * D + N, 4))
    return pl.pallas_call(
        _ln_linear_kernel,
        out_shape=jax.ShapeDtypeStruct((M, N), out_dtype),
        grid=(M // tm,),
        in_specs=[
            pl.BlockSpec((tm, D), lambda i: (i, 0)),
            pl.BlockSpec((1, D), lambda i: (0, 0)),
            pl.BlockSpec((1, D), lambda i: (0, 0)),
            pl.BlockSpec((D, N), lambda i: (0, 0)),
            pl.BlockSpec((1, N), lambda i: (0, 0)),
        ],
        out_specs=pl.BlockSpec((tm, N), lambda i: (i, 0)),
        compiler_params=_cparams(1, vmem),
    )(x, g.reshape(1, D), bln.reshape(1, D), w, b.reshape(1, N))


# ----------------------------------------------------------------- plain linear (memory K|V proj)

def _linear_kernel(x_ref, w_ref, b_ref, o_ref):
    o_ref[...] = (jnp.dot(x_ref[...].astype(jnp.bfloat16), w_ref[...],
                          preferred_element_type=jnp.float32)
                  + b_ref[...]).astype(o_ref.dtype)


def linear(x, w, b, *, out_dtype=jnp.bfloat16, tm_pref=256):
    M, K = x.shape
    N = w.shape[1]
    tm = _pick_tile(M, tm_pref, 16)
    vmem = _vmem_bytes((tm * K, 4), (tm * N, 4), (K * N, 2), (N, 4))
    return pl.pallas_call(
        _linear_kernel,
        out_shape=jax.ShapeDtypeStruct((M, N), out_dtype),
        grid=(M // tm,),
        in_specs=[
            pl.BlockSpec((tm, K), lambda i: (i, 0)),
            pl.BlockSpec((K, N), lambda i: (0, 0)),
            pl.BlockSpec((1, N), lambda i: (0, 0)),
        ],
        out_specs=pl.BlockSpec((tm, N), lambda i: (i, 0)),
        compiler_params=_cparams(1, vmem),
    )(x, w, b.reshape(1, N))


# ----------------------------------------------------------------- final LayerNorm

def _ln_kernel(x_ref, g_ref, b_ref, o_ref):
    x = x_ref[...]
    mu = jnp.mean(x, axis=-1, keepdims=True)
    var = jnp.mean(jnp.square(x - mu), axis=-1, keepdims=True)
    o_ref[...] = (x - mu) * lax.rsqrt(var + 1e-6) * g_ref[...] + b_ref[...]


def layernorm(x, g, b, *, tm_pref=512):
    M, D = x.shape
    tm = _pick_tile(M, tm_pref, 8)
    vmem = _vmem_bytes((tm * D, 4), (tm * D, 4), (2 * D, 4))
    return pl.pallas_call(
        _ln_kernel,
        out_shape=jax.ShapeDtypeStruct((M, D), jnp.float32),
        grid=(M // tm,),
        in_specs=[
            pl.BlockSpec((tm, D), lambda i: (i, 0)),
            pl.BlockSpec((1, D), lambda i: (0, 0)),
            pl.BlockSpec((1, D), lambda i: (0, 0)),
        ],
        out_specs=pl.BlockSpec((tm, D), lambda i: (i, 0)),
        compiler_params=_cparams(1, vmem),
    )(x, g.reshape(1, D), b.reshape(1, D))


# ----------------------------------------------------------------- attention (+ out-proj + residual)

def _mha_kernel(q_ref, kv_ref, bias_ref, wo_ref, bo_ref, r_ref, o_ref, *,
                num_heads, d, causal):
    # q_ref: [tq, D] bf16 (query scale already folded into Wq)
    # kv_ref: [Tk, 2D] bf16   bias_ref: [1, Tk] f32 additive key-padding bias
    # wo_ref: [D, D] f32      bo_ref: [1, D] f32     r_ref/o_ref: [tq, D] f32
    tq = q_ref.shape[0]
    tk = kv_ref.shape[0]
    dh = d // num_heads

    bias = bias_ref[...]                                        # computed once (not per head)
    if causal:
        row = lax.broadcasted_iota(jnp.int32, (tq, tk), 0) + pl.program_id(1) * tq
        col = lax.broadcasted_iota(jnp.int32, (tq, tk), 1)
        bias = bias + jnp.where(row >= col, 0.0, NEG_INF)       # causal mask generated in-kernel

    acc = r_ref[...] + bo_ref[...]                              # residual + out-proj bias (f32)
    for h in range(num_heads):
        lo = h * dh
        qh = q_ref[:, lo:lo + dh]
        kh = kv_ref[:, lo:lo + dh]
        vh = kv_ref[:, d + lo:d + lo + dh]
        s = lax.dot_general(qh, kh, (((1,), (1,)), ((), ())),
                            preferred_element_type=jnp.float32) + bias
        e = jnp.exp(s - jnp.max(s, axis=-1, keepdims=True))
        p = e * pl.reciprocal(jnp.sum(e, axis=-1, keepdims=True), approx=False)
        ctx = jnp.dot(p.astype(jnp.bfloat16), vh, preferred_element_type=jnp.float32)
        # fused output projection: accumulate ctx_h @ Wo[h] into the dense f32 tile
        acc = acc + jnp.dot(ctx.astype(jnp.bfloat16),
                            wo_ref[lo:lo + dh, :].astype(jnp.bfloat16),
                            preferred_element_type=jnp.float32)
    o_ref[...] = acc                                            # single lane-dense [tq, D] store


def mha(q, kv, key_bias, wo, bo, resid, *, num_heads, causal, tq_pref=128):
    # q: [B,T,D] bf16   kv: [B,Tk,2D] bf16   key_bias: [B,1,Tk] f32   resid: [B,T,D] f32
    B, T, D = q.shape
    Tk = kv.shape[1]
    tq = _pick_tile(T, tq_pref, 16)
    kern = functools.partial(_mha_kernel, num_heads=num_heads, d=D, causal=causal)
    vmem = _vmem_bytes((tq * D, 2), (Tk * 2 * D, 2), (Tk, 4), (D * D, 4), (D, 4),
                       (tq * D, 4), (tq * D, 4), (2 * tq * Tk, 4))
    return pl.pallas_call(
        kern,
        out_shape=jax.ShapeDtypeStruct((B, T, D), jnp.float32),
        grid=(B, T // tq),
        in_specs=[
            pl.BlockSpec((None, tq, D), lambda b, i: (b, i, 0)),      # q tile (streams)
            pl.BlockSpec((None, Tk, 2 * D), lambda b, i: (b, 0, 0)),  # K|V resident per batch
            pl.BlockSpec((None, 1, Tk), lambda b, i: (b, 0, 0)),      # key-padding bias (tiny)
            pl.BlockSpec((D, D), lambda b, i: (0, 0)),                # Wo resident
            pl.BlockSpec((1, D), lambda b, i: (0, 0)),                # bo
            pl.BlockSpec((None, tq, D), lambda b, i: (b, i, 0)),      # residual tile
        ],
        out_specs=pl.BlockSpec((None, tq, D), lambda b, i: (b, i, 0)),
        compiler_params=_cparams(2, vmem),
    )(q, kv, key_bias, wo, bo.reshape(1, D), resid)


# ----------------------------------------------------------------- FFN + residual + policy mix

def _ffn_policy_kernel(pol_ref, h2_ref, x_ref, g_ref, bln_ref, w1_ref, b1_ref,
                       w2_ref, b2_ref, o_ref):
    b = pl.program_id(0)
    c_h = pol_ref[b, 0]                      # per-batch scalar (SMEM) weight on layer output
    c_x = pol_ref[b, 1]                      # per-batch scalar (SMEM) weight on layer input
    h2 = h2_ref[...]
    mu = jnp.mean(h2, axis=-1, keepdims=True)
    var = jnp.mean(jnp.square(h2 - mu), axis=-1, keepdims=True)
    xn = (h2 - mu) * lax.rsqrt(var + 1e-6) * g_ref[...] + bln_ref[...]
    hid = jnp.maximum(
        jnp.dot(xn.astype(jnp.bfloat16), w1_ref[...],
                preferred_element_type=jnp.float32) + b1_ref[...], 0.0)
    h = (jnp.dot(hid.astype(jnp.bfloat16), w2_ref[...],
                 preferred_element_type=jnp.float32) + b2_ref[...] + h2)
    o_ref[...] = c_x * x_ref[...] + c_h * h


def ffn_policy(h2, x_in, pol, g, bln, w1, b1, w2, b2, *, tt_pref=256):
    B, T, D = h2.shape
    FF = w1.shape[1]
    tt = _pick_tile(T, tt_pref, 8)
    # TODO(synk): for very large D/FF also tile the FF axis (or use pl.Buffered(1) on the
    # resident weights); bf16 weights already halve the residency vs the previous version.
    vmem = _vmem_bytes((tt * D, 4), (tt * D, 4), (tt * D, 4), (tt * FF, 4),
                       (D * FF, 2), (FF * D, 2), (FF + 3 * D, 4))
    return pl.pallas_call(
        _ffn_policy_kernel,
        out_shape=jax.ShapeDtypeStruct((B, T, D), jnp.float32),
        grid=(B, T // tt),
        in_specs=[
            pl.BlockSpec(memory_space=pltpu.MemorySpace.SMEM),      # policy [B, 2] scalars
            pl.BlockSpec((None, tt, D), lambda b, t: (b, t, 0)),    # h2 (streamed)
            pl.BlockSpec((None, tt, D), lambda b, t: (b, t, 0)),    # layer input x (skip branch)
            pl.BlockSpec((1, D), lambda b, t: (0, 0)),
            pl.BlockSpec((1, D), lambda b, t: (0, 0)),
            pl.BlockSpec((D, FF), lambda b, t: (0, 0)),             # w1 (bf16, resident)
            pl.BlockSpec((1, FF), lambda b, t: (0, 0)),
            pl.BlockSpec((FF, D), lambda b, t: (0, 0)),             # w2 (bf16, resident)
            pl.BlockSpec((1, D), lambda b, t: (0, 0)),
        ],
        out_specs=pl.BlockSpec((None, tt, D), lambda b, t: (b, t, 0)),
        compiler_params=_cparams(2, vmem),
    )(pol, h2, x_in, g.reshape(1, D), bln.reshape(1, D),
      w1, b1.reshape(1, FF), w2, b2.reshape(1, D))


# ----------------------------------------------------------------- vocab projection

def _out_proj_kernel(x_ref, w_ref, o_ref):
    o_ref[...] = jnp.dot(x_ref[...].astype(jnp.bfloat16), w_ref[...],
                         preferred_element_type=jnp.float32)


def out_projection(x, w, *, tm_pref=256, tn_pref=512):
    M, K = x.shape
    N = w.shape[1]
    tm = _pick_tile(M, tm_pref, 8)
    Np = N
    if N > tn_pref and N % 128 != 0:
        Np = _round_up(N, 128)                 # pad vocab to a lane multiple (never a full
        w = jnp.pad(w, ((0, 0), (0, Np - N)))  # resident [D, V] fallback)
    tn = _pick_tile(Np, tn_pref, 128)
    vmem = _vmem_bytes((tm * K, 4), (K * tn, 2), (tm * tn, 4))
    out = pl.pallas_call(
        _out_proj_kernel,
        out_shape=jax.ShapeDtypeStruct((M, Np), jnp.float32),
        # vocab tile on the OUTER axis: each [K, tn] weight tile is streamed once from HBM,
        # only the small [tm, K] activation tile is re-read on the inner row axis.
        grid=(Np // tn, M // tm),
        in_specs=[
            pl.BlockSpec((tm, K), lambda j, i: (i, 0)),
            pl.BlockSpec((K, tn), lambda j, i: (0, j)),
        ],
        out_specs=pl.BlockSpec((tm, tn), lambda j, i: (i, j)),
        compiler_params=_cparams(2, vmem),
    )(x, w)
    return out[:, :N] if Np != N else out


# ----------------------------------------------------------------- model glue

def positional_encoding(T, D):
    position = jnp.arange(T, dtype=jnp.float32)[:, None]
    div_term = jnp.exp(jnp.arange(0, D, 2, dtype=jnp.float32) * -(math.log(10000.0) / D))
    pe = jnp.zeros((T, D), jnp.float32)
    pe = pe.at[:, 0::2].set(jnp.sin(position * div_term))
    pe = pe.at[:, 1::2].set(jnp.cos(position * div_term))
    return pe


def decoder_layer(p, x, memory, src_bias, trg_bias, pol, num_heads):
    B, T, D = x.shape
    S = memory.shape[1]
    M = B * T
    x2 = x.reshape(M, D)

    # --- masked self-attention: fused pre-LN + Q/KV proj, then attention fused with
    #     out-projection + bias + residual (single lane-dense write)
    q, kv = ln_qkv(x2, p["xln_g"], p["xln_b"], p["sa_wq"], p["sa_bq"],
                   p["sa_wkv"], p["sa_bkv"])
    h1 = mha(q.reshape(B, T, D), kv.reshape(B, T, 2 * D), trg_bias,
             p["sa_wo"], p["sa_bo"], x, num_heads=num_heads, causal=True)

    # --- source attention
    q2 = ln_linear(h1.reshape(M, D), p["dln_g"], p["dln_b"], p["ca_wq"], p["ca_bq"])
    kv2 = linear(memory.reshape(B * S, D), p["ca_wkv"], p["ca_bkv"])
    h2 = mha(q2.reshape(B, T, D), kv2.reshape(B, S, 2 * D), src_bias,
             p["ca_wo"], p["ca_bo"], h1, num_heads=num_heads, causal=False)

    # --- feed-forward (+ residual) fused with the per-language policy mixing
    return ffn_policy(h2, x, pol, p["ffln_g"], p["ffln_b"],
                      p["w1"], p["b1"], p["w2"], p["b2"])


def transformer_decoder_forward(params, lang, trg_embed, encoder_output,
                                src_mask, trg_mask, *, num_heads):
    """
    lang: [B] int32, trg_embed: [B,T,D] f32, encoder_output: [B,S,D] f32,
    src_mask: [B,1,S] bool, trg_mask: [B,1,T] bool
    returns (logits [B,T,V], x [B,T,D], None, None)
    """
    B, T, D = trg_embed.shape
    M = B * T

    # positional encoding + (identity at eval) emb_dropout
    x = trg_embed + positional_encoding(T, D)[None]

    # only tiny additive key-padding biases leave the wrapper; causal term is in-kernel
    trg_bias = jnp.where(trg_mask, 0.0, NEG_INF).astype(jnp.float32)    # [B,1,T]
    src_bias = jnp.where(src_mask, 0.0, NEG_INF).astype(jnp.float32)    # [B,1,S]

    # per-language policy: softmax over the last dim of [lang_num, L, 2], gathered per batch
    policy = jax.nn.softmax(params["logits"], axis=-1)[lang]            # [B, L, 2]

    for li, layer_p in enumerate(params["layers"]):
        pol = policy[:, li, :]                                          # [B, 2]
        x = decoder_layer(layer_p, x, encoder_output, src_bias, trg_bias, pol, num_heads)

    x2 = layernorm(x.reshape(M, D), params["ln_g"], params["ln_b"])
    logits = out_projection(x2, params["w_out"])                        # bias-free output layer
    V = params["w_out"].shape[1]
    return logits.reshape(B, T, V), x2.reshape(B, T, D), None, None


# ----------------------------------------------------------------- params

def _init_linear(key, din, dout, scale=0.05):
    kw, kb = jax.random.split(key)
    return (jax.random.normal(kw, (din, dout), jnp.float32) * scale,
            jax.random.normal(kb, (dout,), jnp.float32) * scale)


def init_raw_params(key, *, num_layers, hidden_size, ff_size, vocab_size, lang_num):
    """Torch-layout parameters (separate f32 Q/K/V projections etc.)."""
    D, FF = hidden_size, ff_size
    layers = []
    for _ in range(num_layers):
        keys = jax.random.split(key, 12)
        key = keys[0]
        sa_wq, sa_bq = _init_linear(keys[1], D, D)
        sa_wk, sa_bk = _init_linear(keys[2], D, D)
        sa_wv, sa_bv = _init_linear(keys[3], D, D)
        sa_wo, sa_bo = _init_linear(keys[4], D, D)
        ca_wq, ca_bq = _init_linear(keys[5], D, D)
        ca_wk, ca_bk = _init_linear(keys[6], D, D)
        ca_wv, ca_bv = _init_linear(keys[7], D, D)
        ca_wo, ca_bo = _init_linear(keys[8], D, D)
        w1, b1 = _init_linear(keys[9], D, FF)
        w2, b2 = _init_linear(keys[10], FF, D)
        layers.append(dict(
            sa_wq=sa_wq, sa_bq=sa_bq, sa_wk=sa_wk, sa_bk=sa_bk,
            sa_wv=sa_wv, sa_bv=sa_bv, sa_wo=sa_wo, sa_bo=sa_bo,
            ca_wq=ca_wq, ca_bq=ca_bq, ca_wk=ca_wk, ca_bk=ca_bk,
            ca_wv=ca_wv, ca_bv=ca_bv, ca_wo=ca_wo, ca_bo=ca_bo,
            xln_g=jnp.ones((D,), jnp.float32), xln_b=jnp.zeros((D,), jnp.float32),
            dln_g=jnp.ones((D,), jnp.float32), dln_b=jnp.zeros((D,), jnp.float32),
            ffln_g=jnp.ones((D,), jnp.float32), ffln_b=jnp.zeros((D,), jnp.float32),
            w1=w1, b1=b1, w2=w2, b2=b2,
        ))
    w_out, _ = _init_linear(key, D, vocab_size)
    return dict(
        layers=layers,
        ln_g=jnp.ones((D,), jnp.float32), ln_b=jnp.zeros((D,), jnp.float32),
        w_out=w_out,
        logits=0.5 * jnp.ones((lang_num, num_layers, 2), jnp.float32),  # ParameterList equiv.
    )


def prepare_params(raw, *, num_heads):
    """Repack for the kernels: concat K|V projections, fold 1/sqrt(Dh) into Wq/bq,
    cast matmul weights to bf16 (Wo kept f32: it is sublane-sliced per head in-kernel
    and cast at the dot). Biases and LayerNorm params stay f32."""
    D = raw["layers"][0]["sa_wq"].shape[0]
    scale = 1.0 / math.sqrt(D // num_heads)
    bf = lambda a: a.astype(jnp.bfloat16)
    layers = []
    for p in raw["layers"]:
        layers.append(dict(
            xln_g=p["xln_g"], xln_b=p["xln_b"],
            dln_g=p["dln_g"], dln_b=p["dln_b"],
            ffln_g=p["ffln_g"], ffln_b=p["ffln_b"],
            sa_wq=bf(p["sa_wq"] * scale), sa_bq=p["sa_bq"] * scale,
            sa_wkv=bf(jnp.concatenate([p["sa_wk"], p["sa_wv"]], axis=1)),
            sa_bkv=jnp.concatenate([p["sa_bk"], p["sa_bv"]], axis=0),
            sa_wo=p["sa_wo"], sa_bo=p["sa_bo"],
            ca_wq=bf(p["ca_wq"] * scale), ca_bq=p["ca_bq"] * scale,
            ca_wkv=bf(jnp.concatenate([p["ca_wk"], p["ca_wv"]], axis=1)),
            ca_bkv=jnp.concatenate([p["ca_bk"], p["ca_bv"]], axis=0),
            ca_wo=p["ca_wo"], ca_bo=p["ca_bo"],
            w1=bf(p["w1"]), b1=p["b1"], w2=bf(p["w2"]), b2=p["b2"],
        ))
    return dict(layers=layers, ln_g=raw["ln_g"], ln_b=raw["ln_b"],
                w_out=bf(raw["w_out"]), logits=raw["logits"])


# ----------------------------------------------------------------- pure-JAX reference
# Mirrors the kernels' precision choices (bf16 MXU inputs, f32 accumulation/elementwise),
# implementing the torch module's math on the prepared parameters.

def _ref_forward(params, lang, trg_embed, encoder_output, src_mask, trg_mask, *, num_heads):
    bf = lambda a: a.astype(jnp.bfloat16)
    f32 = jnp.float32
    B, T, D = trg_embed.shape
    S = encoder_output.shape[1]
    H, Dh = num_heads, D // num_heads

    def ln(x, g, b):
        mu = x.mean(-1, keepdims=True)
        var = jnp.square(x - mu).mean(-1, keepdims=True)
        return (x - mu) * lax.rsqrt(var + 1e-6) * g + b

    def mha_ref(q, kv, bias, wo, bo, resid):
        Tq, Tk = q.shape[1], kv.shape[1]
        qh = q.reshape(B, Tq, H, Dh).transpose(0, 2, 1, 3)
        kh = kv[..., :D].reshape(B, Tk, H, Dh).transpose(0, 2, 1, 3)
        vh = kv[..., D:].reshape(B, Tk, H, Dh).transpose(0, 2, 1, 3)
        s = jnp.einsum("bhqd,bhkd->bhqk", qh, kh, preferred_element_type=f32) + bias
        e = jnp.exp(s - s.max(-1, keepdims=True))
        p = e / e.sum(-1, keepdims=True)
        ctx = jnp.einsum("bhqk,bhkd->bhqd", bf(p), vh, preferred_element_type=f32)
        ctx = ctx.transpose(0, 2, 1, 3).reshape(B, Tq, D)
        return jnp.dot(bf(ctx), bf(wo), preferred_element_type=f32) + bo + resid

    x = trg_embed + positional_encoding(T, D)[None]
    trg_bias = jnp.where(trg_mask, 0.0, NEG_INF).astype(f32)             # [B,1,T]
    src_bias = jnp.where(src_mask, 0.0, NEG_INF).astype(f32)             # [B,1,S]
    causal = jnp.where(jnp.tril(jnp.ones((T, T), dtype=bool)), 0.0, NEG_INF)
    self_bias = trg_bias[:, None] + causal[None, None]                   # [B,1,T,T]
    cross_bias = src_bias[:, None]                                       # [B,1,1,S]
    policy = jax.nn.softmax(params["logits"], axis=-1)[lang]             # [B,L,2]

    for li, p in enumerate(params["layers"]):
        xn = ln(x, p["xln_g"], p["xln_b"])
        q = bf(jnp.dot(bf(xn), p["sa_wq"], preferred_element_type=f32) + p["sa_bq"])
        kv = bf(jnp.dot(bf(xn), p["sa_wkv"], preferred_element_type=f32) + p["sa_bkv"])
        h1 = mha_ref(q, kv, self_bias, p["sa_wo"], p["sa_bo"], x)
        hn = ln(h1, p["dln_g"], p["dln_b"])
        q2 = bf(jnp.dot(bf(hn), p["ca_wq"], preferred_element_type=f32) + p["ca_bq"])
        kv2 = bf(jnp.dot(bf(encoder_output), p["ca_wkv"], preferred_element_type=f32)
                 + p["ca_bkv"])
        h2 = mha_ref(q2, kv2, cross_bias, p["ca_wo"], p["ca_bo"], h1)
        fn = ln(h2, p["ffln_g"], p["ffln_b"])
        hid = jnp.maximum(jnp.dot(bf(fn), p["w1"], preferred_element_type=f32) + p["b1"], 0.0)
        h = jnp.dot(bf(hid), p["w2"], preferred_element_type=f32) + p["b2"] + h2
        lp = policy[:, li, :]
        x = x * lp[:, 1][:, None, None] + h * lp[:, 0][:, None, None]

    x = ln(x, params["ln_g"], params["ln_b"])
    logits = jnp.dot(bf(x), params["w_out"], preferred_element_type=f32)
    return logits, x


# ----------------------------------------------------------------- main

if __name__ == "__main__":
    B, T, S = 2, 8, 12
    hidden_size, num_heads, ff_size = 32, 4, 64
    num_layers, vocab_size, lang_num = 2, 16, 3

    key = jax.random.PRNGKey(0)
    kp, ke, kt, kl = jax.random.split(key, 4)

    raw = init_raw_params(kp, num_layers=num_layers, hidden_size=hidden_size,
                          ff_size=ff_size, vocab_size=vocab_size, lang_num=lang_num)
    params = prepare_params(raw, num_heads=num_heads)

    trg_embed = jax.random.normal(kt, (B, T, hidden_size), jnp.float32)
    encoder_output = jax.random.normal(ke, (B, S, hidden_size), jnp.float32)
    src_mask = jnp.ones((B, 1, S), dtype=bool)
    trg_mask = jnp.ones((B, 1, T), dtype=bool)
    lang = jax.random.randint(kl, (B,), 0, lang_num)

    fwd = jax.jit(functools.partial(transformer_decoder_forward, num_heads=num_heads))
    out, x, _, _ = fwd(params, lang, trg_embed, encoder_output, src_mask, trg_mask)
    jax.block_until_ready((out, x))

    assert out.shape == (B, T, vocab_size) and x.shape == (B, T, hidden_size)
    assert bool(jnp.all(jnp.isfinite(out))) and bool(jnp.all(jnp.isfinite(x)))

    # precision-matched pure-JAX reference (same bf16-in / f32-accumulate choices)
    out_ref, x_ref = _ref_forward(params, lang, trg_embed, encoder_output,
                                  src_mask, trg_mask, num_heads=num_heads)
    err_o = float(jnp.max(jnp.abs(out - out_ref)))
    err_x = float(jnp.max(jnp.abs(x - x_ref)))
    assert err_o < 5e-3, err_o
    assert err_x < 5e-3, err_x

    print("KERNEL_OK")
</pallas_src>

<mosaic_0001>
module attributes {stable_mosaic.version = 11 : i64} {
  func.func @_ln_qkv_kernel(%arg0: i32, %arg1: memref<16x32xf32, #tpu.memory_space<vmem>>, %arg2: memref<1x32xf32, #tpu.memory_space<vmem>>, %arg3: memref<1x32xf32, #tpu.memory_space<vmem>>, %arg4: memref<32x32xbf16, #tpu.memory_space<vmem>>, %arg5: memref<1x32xf32, #tpu.memory_space<vmem>>, %arg6: memref<32x64xbf16, #tpu.memory_space<vmem>>, %arg7: memref<1x64xf32, #tpu.memory_space<vmem>>, %arg8: memref<16x32xbf16, #tpu.memory_space<vmem>>, %arg9: memref<16x64xbf16, #tpu.memory_space<vmem>>) attributes {dimension_semantics = [#tpu.dimension_semantics<parallel>], iteration_bounds = array<i64: 1>, scalar_prefetch = 0 : i64, scratch_operands = 0 : i64, tpu.core_type = #tpu.core_type<tc>, window_params = [{transform_indices = @transform_0, window_bounds = array<i64: 16, 32>}, {pipeline_mode = #tpu.pipeline_mode<synchronous>, transform_indices = @transform_1, window_bounds = array<i64: 1, 32>}, {pipeline_mode = #tpu.pipeline_mode<synchronous>, transform_indices = @transform_2, window_bounds = array<i64: 1, 32>}, {pipeline_mode = #tpu.pipeline_mode<synchronous>, transform_indices = @transform_3, window_bounds = array<i64: 32, 32>}, {pipeline_mode = #tpu.pipeline_mode<synchronous>, transform_indices = @transform_4, window_bounds = array<i64: 1, 32>}, {pipeline_mode = #tpu.pipeline_mode<synchronous>, transform_indices = @transform_5, window_bounds = array<i64: 32, 64>}, {pipeline_mode = #tpu.pipeline_mode<synchronous>, transform_indices = @transform_6, window_bounds = array<i64: 1, 64>}, {transform_indices = @transform_7, window_bounds = array<i64: 16, 32>}, {transform_indices = @transform_8, window_bounds = array<i64: 16, 64>}]} {
    %c0 = arith.constant 0 : index
    %c0_0 = arith.constant 0 : index
    %0 = vector.load %arg1[%c0, %c0_0] : memref<16x32xf32, #tpu.memory_space<vmem>>, vector<16x32xf32>
    %cst = arith.constant dense<0.000000e+00> : vector<16xf32>
    %1 = vector.multi_reduction <add>, %0, %cst [1] : vector<16x32xf32> to vector<16xf32>
    %2 = vector.shape_cast %1 : vector<16xf32> to vector<16x1xf32>
    %cst_1 = arith.constant 3.200000e+01 : f32
    %3 = vector.broadcast %cst_1 : f32 to vector<16x1xf32>
    %4 = arith.divf %2, %3 : vector<16x1xf32>
    %5 = vector.broadcast %4 : vector<16x1xf32> to vector<16x32xf32>
    %6 = arith.subf %0, %5 : vector<16x32xf32>
    %7 = arith.mulf %6, %6 : vector<16x32xf32>
    %cst_2 = arith.constant dense<0.000000e+00> : vector<16xf32>
    %8 = vector.multi_reduction <add>, %7, %cst_2 [1] : vector<16x32xf32> to vector<16xf32>
    %9 = vector.shape_cast %8 : vector<16xf32> to vector<16x1xf32>
    %cst_3 = arith.constant 3.200000e+01 : f32
    %10 = vector.broadcast %cst_3 : f32 to vector<16x1xf32>
    %11 = arith.divf %9, %10 : vector<16x1xf32>
    %12 = vector.broadcast %4 : vector<16x1xf32> to vector<16x32xf32>
    %13 = arith.subf %0, %12 : vector<16x32xf32>
    %cst_4 = arith.constant 9.99999997E-7 : f32
    %14 = vector.broadcast %cst_4 : f32 to vector<16x1xf32>
    %15 = arith.addf %11, %14 : vector<16x1xf32>
    %16 = math.rsqrt %15 : vector<16x1xf32>
    %17 = vector.broadcast %16 : vector<16x1xf32> to vector<16x32xf32>
    %18 = arith.mulf %13, %17 : vector<16x32xf32>
    %c0_5 = arith.constant 0 : index
    %c0_6 = arith.constant 0 : index
    %19 = vector.load %arg2[%c0_5, %c0_6] : memref<1x32xf32, #tpu.memory_space<vmem>>, vector<1x32xf32>
    %20 = vector.broadcast %19 : vector<1x32xf32> to vector<16x32xf32>
    %21 = arith.mulf %18, %20 : vector<16x32xf32>
    %c0_7 = arith.constant 0 : index
    %c0_8 = arith.constant 0 : index
    %22 = vector.load %arg3[%c0_7, %c0_8] : memref<1x32xf32, #tpu.memory_space<vmem>>, vector<1x32xf32>
    %23 = vector.broadcast %22 : vector<1x32xf32> to vector<16x32xf32>
    %24 = arith.addf %21, %23 : vector<16x32xf32>
    %25 = arith.truncf %24 : vector<16x32xf32> to vector<16x32xbf16>
    %c0_9 = arith.constant 0 : index
    %c0_10 = arith.constant 0 : index
    %26 = vector.load %arg4[%c0_9, %c0_10] : memref<32x32xbf16, #tpu.memory_space<vmem>>, vector<32x32xbf16>
    %cst_11 = arith.constant dense<0.000000e+00> : vector<16x32xf32>
    %27 = tpu.matmul %25, %26, %cst_11 {dimension_numbers = #tpu.dot_dimension_numbers<[1], [0], [0], [1], [0, 0, 1, 1], [], []>} : vector<16x32xbf16>, vector<32x32xbf16>, vector<16x32xf32> -> vector<16x32xf32>
    %c0_12 = arith.constant 0 : index
    %c0_13 = arith.constant 0 : index
    %28 = vector.load %arg5[%c0_12, %c0_13] : memref<1x32xf32, #tpu.memory_space<vmem>>, vector<1x32xf32>
    %29 = vector.broadcast %28 : vector<1x32xf32> to vector<16x32xf32>
    %30 = arith.addf %27, %29 : vector<16x32xf32>
    %31 = arith.truncf %30 : vector<16x32xf32> to vector<16x32xbf16>
    %c0_14 = arith.constant 0 : index
    %c0_15 = arith.constant 0 : index
    %32 = vector.load %arg8[%c0_14, %c0_15] : memref<16x32xbf16, #tpu.memory_space<vmem>>, vector<16x32xbf16>
    tpu.vector_store %arg8[%c0_14, %c0_15], %31 {strides = array<i32>} : memref<16x32xbf16, #tpu.memory_space<vmem>>, vector<16x32xbf16>,
    %c0_16 = arith.constant 0 : index
    %c0_17 = arith.constant 0 : index
    %33 = vector.load %arg6[%c0_16, %c0_17] : memref<32x64xbf16, #tpu.memory_space<vmem>>, vector<32x64xbf16>
    %cst_18 = arith.constant dense<0.000000e+00> : vector<16x64xf32>
    %34 = tpu.matmul %25, %33, %cst_18 {dimension_numbers = #tpu.dot_dimension_numbers<[1], [0], [0], [1], [0, 0, 1, 1], [], []>} : vector<16x32xbf16>, vector<32x64xbf16>, vector<16x64xf32> -> vector<16x64xf32>
    %c0_19 = arith.constant 0 : index
    %c0_20 = arith.constant 0 : index
    %35 = vector.load %arg7[%c0_19, %c0_20] : memref<1x64xf32, #tpu.memory_space<vmem>>, vector<1x64xf32>
    %36 = vector.broadcast %35 : vector<1x64xf32> to vector<16x64xf32>
    %37 = arith.addf %34, %36 : vector<16x64xf32>
    %38 = arith.truncf %37 : vector<16x64xf32> to vector<16x64xbf16>
    %c0_21 = arith.constant 0 : index
    %c0_22 = arith.constant 0 : index
    %39 = vector.load %arg9[%c0_21, %c0_22] : memref<16x64xbf16, #tpu.memory_space<vmem>>, vector<16x64xbf16>
    tpu.vector_store %arg9[%c0_21, %c0_22], %38 {strides = array<i32>} : memref<16x64xbf16, #tpu.memory_space<vmem>>, vector<16x64xbf16>,
    return
  }
  func.func @transform_0(%arg0: i32) -> (i32, i32) {
    %c0_i32 = arith.constant 0 : i32
    %c0_i32_0 = arith.constant 0 : i32
    return %arg0, %c0_i32 : i32, i32
  }
  func.func @transform_1(%arg0: i32) -> (i32, i32) {
    %c0_i32 = arith.constant 0 : i32
    %c0_i32_0 = arith.constant 0 : i32
    %c0_i32_1 = arith.constant 0 : i32
    return %c0_i32, %c0_i32_0 : i32, i32
  }
  func.func @transform_2(%arg0: i32) -> (i32, i32) {
    %c0_i32 = arith.constant 0 : i32
    %c0_i32_0 = arith.constant 0 : i32
    %c0_i32_1 = arith.constant 0 : i32
    return %c0_i32, %c0_i32_0 : i32, i32
  }
  func.func @transform_3(%arg0: i32) -> (i32, i32) {
    %c0_i32 = arith.constant 0 : i32
    %c0_i32_0 = arith.constant 0 : i32
    %c0_i32_1 = arith.constant 0 : i32
    return %c0_i32, %c0_i32_0 : i32, i32
  }
  func.func @transform_4(%arg0: i32) -> (i32, i32) {
    %c0_i32 = arith.constant 0 : i32
    %c0_i32_0 = arith.constant 0 : i32
    %c0_i32_1 = arith.constant 0 : i32
    return %c0_i32, %c0_i32_0 : i32, i32
  }
  func.func @transform_5(%arg0: i32) -> (i32, i32) {
    %c0_i32 = arith.constant 0 : i32
    %c0_i32_0 = arith.constant 0 : i32
    %c0_i32_1 = arith.constant 0 : i32
    return %c0_i32, %c0_i32_0 : i32, i32
  }
  func.func @transform_6(%arg0: i32) -> (i32, i32) {
    %c0_i32 = arith.constant 0 : i32
    %c0_i32_0 = arith.constant 0 : i32
    %c0_i32_1 = arith.constant 0 : i32
    return %c0_i32, %c0_i32_0 : i32, i32
  }
  func.func @transform_7(%arg0: i32) -> (i32, i32) {
    %c0_i32 = arith.constant 0 : i32
    %c0_i32_0 = arith.constant 0 : i32
    return %arg0, %c0_i32 : i32, i32
  }
  func.func @transform_8(%arg0: i32) -> (i32, i32) {
    %c0_i32 = arith.constant 0 : i32
    %c0_i32_0 = arith.constant 0 : i32
    return %arg0, %c0_i32 : i32, i32
  }
}

module attributes {stable_mosaic.version = 11 : i64} {
  func.func @_mha_kernel(%arg0: i32, %arg1: i32, %arg2: memref<1x8x32xbf16, #tpu.memory_space<vmem>>, %arg3: memref<1x8x64xbf16, #tpu.memory_space<vmem>>, %arg4: memref<1x1x8xf32, #tpu.memory_space<vmem>>, %arg5: memref<32x32xf32, #tpu.memory_space<vmem>>, %arg6: memref<1x32xf32, #tpu.memory_space<vmem>>, %arg7: memref<1x8x32xf32, #tpu.memory_space<vmem>>, %arg8: memref<1x8x32xf32, #tpu.memory_space<vmem>>) attributes {dimension_semantics = [#tpu.dimension_semantics<parallel>, #tpu.dimension_semantics<parallel>], iteration_bounds = array<i64: 2, 1>, scalar_prefetch = 0 : i64, scratch_operands = 0 : i64, tpu.core_type = #tpu.core_type<tc>, window_params = [{transform_indices = @transform_0, window_bounds = array<i64: 1, 8, 32>}, {transform_indices = @transform_1, window_bounds = array<i64: 1, 8, 64>}, {transform_indices = @transform_2, window_bounds = array<i64: 1, 1, 8>}, {pipeline_mode = #tpu.pipeline_mode<synchronous>, transform_indices = @transform_3, window_bounds = array<i64: 32, 32>}, {pipeline_mode = #tpu.pipeline_mode<synchronous>, transform_indices = @transform_4, window_bounds = array<i64: 1, 32>}, {transform_indices = @transform_5, window_bounds = array<i64: 1, 8, 32>}, {transform_indices = @transform_6, window_bounds = array<i64: 1, 8, 32>}]} {
    %c0 = arith.constant 0 : index
    %c0_0 = arith.constant 0 : index
    %c0_1 = arith.constant 0 : index
    %0 = vector.load %arg4[%c0, %c0_0, %c0_1] : memref<1x1x8xf32, #tpu.memory_space<vmem>>, vector<1x1x8xf32>
    %1 = vector.shape_cast %0 : vector<1x1x8xf32> to vector<1x8xf32>
    %2 = tpu.iota {dimensions = array<i32: 0>} : vector<8x8xi32>
    %c8_i32 = arith.constant 8 : i32
    %3 = arith.muli %arg1, %c8_i32 : i32
    %4 = vector.broadcast %3 : i32 to vector<8x8xi32>
    %5 = arith.addi %2, %4 : vector<8x8xi32>
    %6 = tpu.iota {dimensions = array<i32: 1>} : vector<8x8xi32>
    %7 = arith.cmpi sge, %5, %6 : vector<8x8xi32>
    %cst = arith.constant 0.000000e+00 : f32
    %cst_2 = arith.constant -1.000000e+30 : f32
    %8 = vector.broadcast %cst : f32 to vector<8x8xf32>
    %9 = vector.broadcast %cst_2 : f32 to vector<8x8xf32>
    %10 = arith.select %7, %8, %9 : vector<8x8xi1>, vector<8x8xf32>
    %11 = vector.broadcast %1 : vector<1x8xf32> to vector<8x8xf32>
    %12 = arith.addf %11, %10 : vector<8x8xf32>
    %c0_3 = arith.constant 0 : index
    %c0_4 = arith.constant 0 : index
    %c0_5 = arith.constant 0 : index
    %13 = vector.load %arg7[%c0_3, %c0_4, %c0_5] : memref<1x8x32xf32, #tpu.memory_space<vmem>>, vector<1x8x32xf32>
    %14 = vector.shape_cast %13 : vector<1x8x32xf32> to vector<8x32xf32>
    %c0_6 = arith.constant 0 : index
    %c0_7 = arith.constant 0 : index
    %15 = vector.load %arg6[%c0_6, %c0_7] : memref<1x32xf32, #tpu.memory_space<vmem>>, vector<1x32xf32>
    %16 = vector.broadcast %15 : vector<1x32xf32> to vector<8x32xf32>
    %17 = arith.addf %14, %16 : vector<8x32xf32>
    %c0_8 = arith.constant 0 : index
    %c0_9 = arith.constant 0 : index
    %c0_10 = arith.constant 0 : index
    %18 = vector.load %arg2[%c0_8, %c0_9, %c0_10] : memref<1x8x32xbf16, #tpu.memory_space<vmem>>, vector<1x8x8xbf16>
    %19 = vector.shape_cast %18 : vector<1x8x8xbf16> to vector<8x8xbf16>
    %c0_11 = arith.constant 0 : index
    %c0_12 = arith.constant 0 : index
    %c0_13 = arith.constant 0 : index
    %20 = vector.load %arg3[%c0_11, %c0_12, %c0_13] : memref<1x8x64xbf16, #tpu.memory_space<vmem>>, vector<1x8x8xbf16>
    %21 = vector.shape_cast %20 : vector<1x8x8xbf16> to vector<8x8xbf16>
    %c0_14 = arith.constant 0 : index
    %c0_15 = arith.constant 0 : index
    %c32 = arith.constant 32 : index
    %22 = vector.load %arg3[%c0_14, %c0_15, %c32] : memref<1x8x64xbf16, #tpu.memory_space<vmem>>, vector<1x8x8xbf16>
    %23 = vector.shape_cast %22 : vector<1x8x8xbf16> to vector<8x8xbf16>
    %cst_16 = arith.constant dense<0.000000e+00> : vector<8x8xf32>
    %24 = tpu.matmul %19, %21, %cst_16 {dimension_numbers = #tpu.dot_dimension_numbers<[1], [1], [0], [0], [0, 0, 1, 0], [], []>} : vector<8x8xbf16>, vector<8x8xbf16>, vector<8x8xf32> -> vector<8x8xf32>
    %25 = arith.addf %24, %12 : vector<8x8xf32>
    %cst_17 = arith.constant dense<0xFF800000> : vector<8xf32>
    %26 = vector.multi_reduction <maximumf>, %25, %cst_17 [1] : vector<8x8xf32> to vector<8xf32>
    %27 = vector.shape_cast %26 : vector<8xf32> to vector<8x1xf32>
    %28 = vector.broadcast %27 : vector<8x1xf32> to vector<8x8xf32>
    %29 = arith.subf %25, %28 : vector<8x8xf32>
    %30 = math.exp %29 : vector<8x8xf32>
    %cst_18 = arith.constant dense<0.000000e+00> : vector<8xf32>
    %31 = vector.multi_reduction <add>, %30, %cst_18 [1] : vector<8x8xf32> to vector<8xf32>
    %32 = vector.shape_cast %31 : vector<8xf32> to vector<8x1xf32>
    %33 = tpu.reciprocal %32 : vector<8x1xf32> -> vector<8x1xf32>
    %34 = vector.broadcast %33 : vector<8x1xf32> to vector<8x8xf32>
    %35 = arith.mulf %30, %34 : vector<8x8xf32>
    %36 = arith.truncf %35 : vector<8x8xf32> to vector<8x8xbf16>
    %cst_19 = arith.constant dense<0.000000e+00> : vector<8x8xf32>
    %37 = tpu.matmul %36, %23, %cst_19 {dimension_numbers = #tpu.dot_dimension_numbers<[1], [0], [0], [1], [0, 0, 1, 1], [], []>} : vector<8x8xbf16>, vector<8x8xbf16>, vector<8x8xf32> -> vector<8x8xf32>
    %38 = arith.truncf %37 : vector<8x8xf32> to vector<8x8xbf16>
    %c0_20 = arith.constant 0 : index
    %c0_21 = arith.constant 0 : index
    %39 = vector.load %arg5[%c0_20, %c0_21] : memref<32x32xf32, #tpu.memory_space<vmem>>, vector<8x32xf32>
    %40 = arith.truncf %39 : vector<8x32xf32> to vector<8x32xbf16>
    %cst_22 = arith.constant dense<0.000000e+00> : vector<8x32xf32>
    %41 = tpu.matmul %38, %40, %cst_22 {dimension_numbers = #tpu.dot_dimension_numbers<[1], [0], [0], [1], [0, 0, 1, 1], [], []>} : vector<8x8xbf16>, vector<8x32xbf16>, vector<8x32xf32> -> vector<8x32xf32>
    %42 = arith.addf %17, %41 : vector<8x32xf32>
    %c0_23 = arith.constant 0 : index
    %c0_24 = arith.constant 0 : index
    %c8 = arith.constant 8 : index
    %43 = vector.load %arg2[%c0_23, %c0_24, %c8] : memref<1x8x32xbf16, #tpu.memory_space<vmem>>, vector<1x8x8xbf16>
    %44 = vector.shape_cast %43 : vector<1x8x8xbf16> to vector<8x8xbf16>
    %c0_25 = arith.constant 0 : index
    %c0_26 = arith.constant 0 : index
    %c8_27 = arith.constant 8 : index
    %45 = vector.load %arg3[%c0_25, %c0_26, %c8_27] : memref<1x8x64xbf16, #tpu.memory_space<vmem>>, vector<1x8x8xbf16>
    %46 = vector.shape_cast %45 : vector<1x8x8xbf16> to vector<8x8xbf16>
    %c0_28 = arith.constant 0 : index
    %c0_29 = arith.constant 0 : index
    %c40 = arith.constant 40 : index
    %47 = vector.load %arg3[%c0_28, %c0_29, %c40] : memref<1x8x64xbf16, #tpu.memory_space<vmem>>, vector<1x8x8xbf16>
    %48 = vector.shape_cast %47 : vector<1x8x8xbf16> to vector<8x8xbf16>
    %cst_30 = arith.constant dense<0.000000e+00> : vector<8x8xf32>
    %49 = tpu.matmul %44, %46, %cst_30 {dimension_numbers = #tpu.dot_dimension_numbers<[1], [1], [0], [0], [0, 0, 1, 0], [], []>} : vector<8x8xbf16>, vector<8x8xbf16>, vector<8x8xf32> -> vector<8x8xf32>
    %50 = arith.addf %49, %12 : vector<8x8xf32>
    %cst_31 = arith.constant dense<0xFF800000> : vector<8xf32>
    %51 = vector.multi_reduction <maximumf>, %50, %cst_31 [1] : vector<8x8xf32> to vector<8xf32>
    %52 = vector.shape_cast %51 : vector<8xf32> to vector<8x1xf32>
    %53 = vector.broadcast %52 : vector<8x1xf32> to vector<8x8xf32>
    %54 = arith.subf %50, %53 : vector<8x8xf32>
    %55 = math.exp %54 : vector<8x8xf32>
    %cst_32 = arith.constant dense<0.000000e+00> : vector<8xf32>
    %56 = vector.multi_reduction <add>, %55, %cst_32 [1] : vector<8x8xf32> to vector<8xf32>
    %57 = vector.shape_cast %56 : vector<8xf32> to vector<8x1xf32>
    %58 = tpu.reciprocal %57 : vector<8x1xf32> -> vector<8x1xf32>
    %59 = vector.broadcast %58 : vector<8x1xf32> to vector<8x8xf32>
    %60 = arith.mulf %55, %59 : vector<8x8xf32>
    %61 = arith.truncf %60 : vector<8x8xf32> to vector<8x8xbf16>
    %cst_33 = arith.constant dense<0.000000e+00> : vector<8x8xf32>
    %62 = tpu.matmul %61, %48, %cst_33 {dimension_numbers = #tpu.dot_dimension_numbers<[1], [0], [0], [1], [0, 0, 1, 1], [], []>} : vector<8x8xbf16>, vector<8x8xbf16>, vector<8x8xf32> -> vector<8x8xf32>
    %63 = arith.truncf %62 : vector<8x8xf32> to vector<8x8xbf16>
    %c8_34 = arith.constant 8 : index
    %c0_35 = arith.constant 0 : index
    %64 = vector.load %arg5[%c8_34, %c0_35] : memref<32x32xf32, #tpu.memory_space<vmem>>, vector<8x32xf32>
    %65 = arith.truncf %64 : vector<8x32xf32> to vector<8x32xbf16>
    %cst_36 = arith.constant dense<0.000000e+00> : vector<8x32xf32>
    %66 = tpu.matmul %63, %65, %cst_36 {dimension_numbers = #tpu.dot_dimension_numbers<[1], [0], [0], [1], [0, 0, 1, 1], [], []>} : vector<8x8xbf16>, vector<8x32xbf16>, vector<8x32xf32> -> vector<8x32xf32>
    %67 = arith.addf %42, %66 : vector<8x32xf32>
    %c0_37 = arith.constant 0 : index
    %c0_38 = arith.constant 0 : index
    %c16 = arith.constant 16 : index
    %68 = vector.load %arg2[%c0_37, %c0_38, %c16] : memref<1x8x32xbf16, #tpu.memory_space<vmem>>, vector<1x8x8xbf16>
    %69 = vector.shape_cast %68 : vector<1x8x8xbf16> to vector<8x8xbf16>
    %c0_39 = arith.constant 0 : index
    %c0_40 = arith.constant 0 : index
    %c16_41 = arith.constant 16 : index
    %70 = vector.load %arg3[%c0_39, %c0_40, %c16_41] : memref<1x8x64xbf16, #tpu.memory_space<vmem>>, vector<1x8x8xbf16>
    %71 = vector.shape_cast %70 : vector<1x8x8xbf16> to vector<8x8xbf16>
    %c0_42 = arith.constant 0 : index
    %c0_43 = arith.constant 0 : index
    %c48 = arith.constant 48 : index
    %72 = vector.load %arg3[%c0_42, %c0_43, %c48] : memref<1x8x64xbf16, #tpu.memory_space<vmem>>, vector<1x8x8xbf16>
    %73 = vector.shape_cast %72 : vector<1x8x8xbf16> to vector<8x8xbf16>
    %cst_44 = arith.constant dense<0.000000e+00> : vector<8x8xf32>
    %74 = tpu.matmul %69, %71, %cst_44 {dimension_numbers = #tpu.dot_dimension_numbers<[1], [1], [0], [0], [0, 0, 1, 0], [], []>} : vector<8x8xbf16>, vector<8x8xbf16>, vector<8x8xf32> -> vector<8x8xf32>
    %75 = arith.addf %74, %12 : vector<8x8xf32>
    %cst_45 = arith.constant dense<0xFF800000> : vector<8xf32>
    %76 = vector.multi_reduction <maximumf>, %75, %cst_45 [1] : vector<8x8xf32> to vector<8xf32>
    %77 = vector.shape_cast %76 : vector<8xf32> to vector<8x1xf32>
    %78 = vector.broadcast %77 : vector<8x1xf32> to vector<8x8xf32>
    %79 = arith.subf %75, %78 : vector<8x8xf32>
    %80 = math.exp %79 : vector<8x8xf32>
    %cst_46 = arith.constant dense<0.000000e+00> : vector<8xf32>
    %81 = vector.multi_reduction <add>, %80, %cst_46 [1] : vector<8x8xf32> to vector<8xf32>
    %82 = vector.shape_cast %81 : vector<8xf32> to vector<8x1xf32>
    %83 = tpu.reciprocal %82 : vector<8x1xf32> -> vector<8x1xf32>
    %84 = vector.broadcast %83 : vector<8x1xf32> to vector<8x8xf32>
    %85 = arith.mulf %80, %84 : vector<8x8xf32>
    %86 = arith.truncf %85 : vector<8x8xf32> to vector<8x8xbf16>
    %cst_47 = arith.constant dense<0.000000e+00> : vector<8x8xf32>
    %87 = tpu.matmul %86, %73, %cst_47 {dimension_numbers = #tpu.dot_dimension_numbers<[1], [0], [0], [1], [0, 0, 1, 1], [], []>} : vector<8x8xbf16>, vector<8x8xbf16>, vector<8x8xf32> -> vector<8x8xf32>
    %88 = arith.truncf %87 : vector<8x8xf32> to vector<8x8xbf16>
    %c16_48 = arith.constant 16 : index
    %c0_49 = arith.constant 0 : index
    %89 = vector.load %arg5[%c16_48, %c0_49] : memref<32x32xf32, #tpu.memory_space<vmem>>, vector<8x32xf32>
    %90 = arith.truncf %89 : vector<8x32xf32> to vector<8x32xbf16>
    %cst_50 = arith.constant dense<0.000000e+00> : vector<8x32xf32>
    %91 = tpu.matmul %88, %90, %cst_50 {dimension_numbers = #tpu.dot_dimension_numbers<[1], [0], [0], [1], [0, 0, 1, 1], [], []>} : vector<8x8xbf16>, vector<8x32xbf16>, vector<8x32xf32> -> vector<8x32xf32>
    %92 = arith.addf %67, %91 : vector<8x32xf32>
    %c0_51 = arith.constant 0 : index
    %c0_52 = arith.constant 0 : index
    %c24 = arith.constant 24 : index
    %93 = vector.load %arg2[%c0_51, %c0_52, %c24] : memref<1x8x32xbf16, #tpu.memory_space<vmem>>, vector<1x8x8xbf16>
    %94 = vector.shape_cast %93 : vector<1x8x8xbf16> to vector<8x8xbf16>
    %c0_53 = arith.constant 0 : index
    %c0_54 = arith.constant 0 : index
    %c24_55 = arith.constant 24 : index
    %95 = vector.load %arg3[%c0_53, %c0_54, %c24_55] : memref<1x8x64xbf16, #tpu.memory_space<vmem>>, vector<1x8x8xbf16>
    %96 = vector.shape_cast %95 : vector<1x8x8xbf16> to vector<8x8xbf16>
    %c0_56 = arith.constant 0 : index
    %c0_57 = arith.constant 0 : index
    %c56 = arith.constant 56 : index
    %97 = vector.load %arg3[%c0_56, %c0_57, %c56] : memref<1x8x64xbf16, #tpu.memory_space<vmem>>, vector<1x8x8xbf16>
    %98 = vector.shape_cast %97 : vector<1x8x8xbf16> to vector<8x8xbf16>
    %cst_58 = arith.constant dense<0.000000e+00> : vector<8x8xf32>
    %99 = tpu.matmul %94, %96, %cst_58 {dimension_numbers = #tpu.dot_dimension_numbers<[1], [1], [0], [0], [0, 0, 1, 0], [], []>} : vector<8x8xbf16>, vector<8x8xbf16>, vector<8x8xf32> -> vector<8x8xf32>
    %100 = arith.addf %99, %12 : vector<8x8xf32>
    %cst_59 = arith.constant dense<0xFF800000> : vector<8xf32>
    %101 = vector.multi_reduction <maximumf>, %100, %cst_59 [1] : vector<8x8xf32> to vector<8xf32>
    %102 = vector.shape_cast %101 : vector<8xf32> to vector<8x1xf32>
    %103 = vector.broadcast %102 : vector<8x1xf32> to vector<8x8xf32>
    %104 = arith.subf %100, %103 : vector<8x8xf32>
    %105 = math.exp %104 : vector<8x8xf32>
    %cst_60 = arith.constant dense<0.000000e+00> : vector<8xf32>
    %106 = vector.multi_reduction <add>, %105, %cst_60 [1] : vector<8x8xf32> to vector<8xf32>
    %107 = vector.shape_cast %106 : vector<8xf32> to vector<8x1xf32>
    %108 = tpu.reciprocal %107 : vector<8x1xf32> -> vector<8x1xf32>
    %109 = vector.broadcast %108 : vector<8x1xf32> to vector<8x8xf32>
    %110 = arith.mulf %105, %109 : vector<8x8xf32>
    %111 = arith.truncf %110 : vector<8x8xf32> to vector<8x8xbf16>
    %cst_61 = arith.constant dense<0.000000e+00> : vector<8x8xf32>
    %112 = tpu.matmul %111, %98, %cst_61 {dimension_numbers = #tpu.dot_dimension_numbers<[1], [0], [0], [1], [0, 0, 1, 1], [], []>} : vector<8x8xbf16>, vector<8x8xbf16>, vector<8x8xf32> -> vector<8x8xf32>
    %113 = arith.truncf %112 : vector<8x8xf32> to vector<8x8xbf16>
    %c24_62 = arith.constant 24 : index
    %c0_63 = arith.constant 0 : index
    %114 = vector.load %arg5[%c24_62, %c0_63] : memref<32x32xf32, #tpu.memory_space<vmem>>, vector<8x32xf32>
    %115 = arith.truncf %114 : vector<8x32xf32> to vector<8x32xbf16>
    %cst_64 = arith.constant dense<0.000000e+00> : vector<8x32xf32>
    %116 = tpu.matmul %113, %115, %cst_64 {dimension_numbers = #tpu.dot_dimension_numbers<[1], [0], [0], [1], [0, 0, 1, 1], [], []>} : vector<8x8xbf16>, vector<8x32xbf16>, vector<8x32xf32> -> vector<8x32xf32>
    %117 = arith.addf %92, %116 : vector<8x32xf32>
    %c0_65 = arith.constant 0 : index
    %c0_66 = arith.constant 0 : index
    %c0_67 = arith.constant 0 : index
    %118 = vector.load %arg8[%c0_65, %c0_66, %c0_67] : memref<1x8x32xf32, #tpu.memory_space<vmem>>, vector<1x8x32xf32>
    %119 = vector.shape_cast %118 : vector<1x8x32xf32> to vector<8x32xf32>
    %120 = vector.shape_cast %117 : vector<8x32xf32> to vector<1x8x32xf32>
    tpu.vector_store %arg8[%c0_65, %c0_66, %c0_67], %120 {strides = array<i32>} : memref<1x8x32xf32, #tpu.memory_space<vmem>>, vector<1x8x32xf32>,
    return
  }
  func.func @transform_0(%arg0: i32, %arg1: i32) -> (i32, i32, i32) {
    %c0_i32 = arith.constant 0 : i32
    %c0_i32_0 = arith.constant 0 : i32
    return %arg0, %arg1, %c0_i32 : i32, i32, i32
  }
  func.func @transform_1(%arg0: i32, %arg1: i32) -> (i32, i32, i32) {
    %c0_i32 = arith.constant 0 : i32
    %c0_i32_0 = arith.constant 0 : i32
    %c0_i32_1 = arith.constant 0 : i32
    return %arg0, %c0_i32, %c0_i32_0 : i32, i32, i32
  }
  func.func @transform_2(%arg0: i32, %arg1: i32) -> (i32, i32, i32) {
    %c0_i32 = arith.constant 0 : i32
    %c0_i32_0 = arith.constant 0 : i32
    %c0_i32_1 = arith.constant 0 : i32
    return %arg0, %c0_i32, %c0_i32_0 : i32, i32, i32
  }
  func.func @transform_3(%arg0: i32, %arg1: i32) -> (i32, i32) {
    %c0_i32 = arith.constant 0 : i32
    %c0_i32_0 = arith.constant 0 : i32
    %c0_i32_1 = arith.constant 0 : i32
    return %c0_i32, %c0_i32_0 : i32, i32
  }
  func.func @transform_4(%arg0: i32, %arg1: i32) -> (i32, i32) {
    %c0_i32 = arith.constant 0 : i32
    %c0_i32_0 = arith.constant 0 : i32
    %c0_i32_1 = arith.constant 0 : i32
    return %c0_i32, %c0_i32_0 : i32, i32
  }
  func.func @transform_5(%arg0: i32, %arg1: i32) -> (i32, i32, i32) {
    %c0_i32 = arith.constant 0 : i32
    %c0_i32_0 = arith.constant 0 : i32
    return %arg0, %arg1, %c0_i32 : i32, i32, i32
  }
  func.func @transform_6(%arg0: i32, %arg1: i32) -> (i32, i32, i32) {
    %c0_i32 = arith.constant 0 : i32
    %c0_i32_0 = arith.constant 0 : i32
    return %arg0, %arg1, %c0_i32 : i32, i32, i32
  }
}

module attributes {stable_mosaic.version = 11 : i64} {
  func.func @_ln_linear_kernel(%arg0: i32, %arg1: memref<16x32xf32, #tpu.memory_space<vmem>>, %arg2: memref<1x32xf32, #tpu.memory_space<vmem>>, %arg3: memref<1x32xf32, #tpu.memory_space<vmem>>, %arg4: memref<32x32xbf16, #tpu.memory_space<vmem>>, %arg5: memref<1x32xf32, #tpu.memory_space<vmem>>, %arg6: memref<16x32xbf16, #tpu.memory_space<vmem>>) attributes {dimension_semantics = [#tpu.dimension_semantics<parallel>], iteration_bounds = array<i64: 1>, scalar_prefetch = 0 : i64, scratch_operands = 0 : i64, tpu.core_type = #tpu.core_type<tc>, window_params = [{transform_indices = @transform_0, window_bounds = array<i64: 16, 32>}, {pipeline_mode = #tpu.pipeline_mode<synchronous>, transform_indices = @transform_1, window_bounds = array<i64: 1, 32>}, {pipeline_mode = #tpu.pipeline_mode<synchronous>, transform_indices = @transform_2, window_bounds = array<i64: 1, 32>}, {pipeline_mode = #tpu.pipeline_mode<synchronous>, transform_indices = @transform_3, window_bounds = array<i64: 32, 32>}, {pipeline_mode = #tpu.pipeline_mode<synchronous>, transform_indices = @transform_4, window_bounds = array<i64: 1, 32>}, {transform_indices = @transform_5, window_bounds = array<i64: 16, 32>}]} {
    %c0 = arith.constant 0 : index
    %c0_0 = arith.constant 0 : index
    %0 = vector.load %arg1[%c0, %c0_0] : memref<16x32xf32, #tpu.memory_space<vmem>>, vector<16x32xf32>
    %cst = arith.constant dense<0.000000e+00> : vector<16xf32>
    %1 = vector.multi_reduction <add>, %0, %cst [1] : vector<16x32xf32> to vector<16xf32>
    %2 = vector.shape_cast %1 : vector<16xf32> to vector<16x1xf32>
    %cst_1 = arith.constant 3.200000e+01 : f32
    %3 = vector.broadcast %cst_1 : f32 to vector<16x1xf32>
    %4 = arith.divf %2, %3 : vector<16x1xf32>
    %5 = vector.broadcast %4 : vector<16x1xf32> to vector<16x32xf32>
    %6 = arith.subf %0, %5 : vector<16x32xf32>
    %7 = arith.mulf %6, %6 : vector<16x32xf32>
    %cst_2 = arith.constant dense<0.000000e+00> : vector<16xf32>
    %8 = vector.multi_reduction <add>, %7, %cst_2 [1] : vector<16x32xf32> to vector<16xf32>
    %9 = vector.shape_cast %8 : vector<16xf32> to vector<16x1xf32>
    %cst_3 = arith.constant 3.200000e+01 : f32
    %10 = vector.broadcast %cst_3 : f32 to vector<16x1xf32>
    %11 = arith.divf %9, %10 : vector<16x1xf32>
    %12 = vector.broadcast %4 : vector<16x1xf32> to vector<16x32xf32>
    %13 = arith.subf %0, %12 : vector<16x32xf32>
    %cst_4 = arith.constant 9.99999997E-7 : f32
    %14 = vector.broadcast %cst_4 : f32 to vector<16x1xf32>
    %15 = arith.addf %11, %14 : vector<16x1xf32>
    %16 = math.rsqrt %15 : vector<16x1xf32>
    %17 = vector.broadcast %16 : vector<16x1xf32> to vector<16x32xf32>
    %18 = arith.mulf %13, %17 : vector<16x32xf32>
    %c0_5 = arith.constant 0 : index
    %c0_6 = arith.constant 0 : index
    %19 = vector.load %arg2[%c0_5, %c0_6] : memref<1x32xf32, #tpu.memory_space<vmem>>, vector<1x32xf32>
    %20 = vector.broadcast %19 : vector<1x32xf32> to vector<16x32xf32>
    %21 = arith.mulf %18, %20 : vector<16x32xf32>
    %c0_7 = arith.constant 0 : index
    %c0_8 = arith.constant 0 : index
    %22 = vector.load %arg3[%c0_7, %c0_8] : memref<1x32xf32, #tpu.memory_space<vmem>>, vector<1x32xf32>
    %23 = vector.broadcast %22 : vector<1x32xf32> to vector<16x32xf32>
    %24 = arith.addf %21, %23 : vector<16x32xf32>
    %25 = arith.truncf %24 : vector<16x32xf32> to vector<16x32xbf16>
    %c0_9 = arith.constant 0 : index
    %c0_10 = arith.constant 0 : index
    %26 = vector.load %arg4[%c0_9, %c0_10] : memref<32x32xbf16, #tpu.memory_space<vmem>>, vector<32x32xbf16>
    %cst_11 = arith.constant dense<0.000000e+00> : vector<16x32xf32>
    %27 = tpu.matmul %25, %26, %cst_11 {dimension_numbers = #tpu.dot_dimension_numbers<[1], [0], [0], [1], [0, 0, 1, 1], [], []>} : vector<16x32xbf16>, vector<32x32xbf16>, vector<16x32xf32> -> vector<16x32xf32>
    %c0_12 = arith.constant 0 : index
    %c0_13 = arith.constant 0 : index
    %28 = vector.load %arg5[%c0_12, %c0_13] : memref<1x32xf32, #tpu.memory_space<vmem>>, vector<1x32xf32>
    %29 = vector.broadcast %28 : vector<1x32xf32> to vector<16x32xf32>
    %30 = arith.addf %27, %29 : vector<16x32xf32>
    %31 = arith.truncf %30 : vector<16x32xf32> to vector<16x32xbf16>
    %c0_14 = arith.constant 0 : index
    %c0_15 = arith.constant 0 : index
    %32 = vector.load %arg6[%c0_14, %c0_15] : memref<16x32xbf16, #tpu.memory_space<vmem>>, vector<16x32xbf16>
    tpu.vector_store %arg6[%c0_14, %c0_15], %31 {strides = array<i32>} : memref<16x32xbf16, #tpu.memory_space<vmem>>, vector<16x32xbf16>,
    return
  }
  func.func @transform_0(%arg0: i32) -> (i32, i32) {
    %c0_i32 = arith.constant 0 : i32
    %c0_i32_0 = arith.constant 0 : i32
    return %arg0, %c0_i32 : i32, i32
  }
  func.func @transform_1(%arg0: i32) -> (i32, i32) {
    %c0_i32 = arith.constant 0 : i32
    %c0_i32_0 = arith.constant 0 : i32
    %c0_i32_1 = arith.constant 0 : i32
    return %c0_i32, %c0_i32_0 : i32, i32
  }
  func.func @transform_2(%arg0: i32) -> (i32, i32) {
    %c0_i32 = arith.constant 0 : i32
    %c0_i32_0 = arith.constant 0 : i32
    %c0_i32_1 = arith.constant 0 : i32
    return %c0_i32, %c0_i32_0 : i32, i32
  }
  func.func @transform_3(%arg0: i32) -> (i32, i32) {
    %c0_i32 = arith.constant 0 : i32
    %c0_i32_0 = arith.constant 0 : i32
    %c0_i32_1 = arith.constant 0 : i32
    return %c0_i32, %c0_i32_0 : i32, i32
  }
  func.func @transform_4(%arg0: i32) -> (i32, i32) {
    %c0_i32 = arith.constant 0 : i32
    %c0_i32_0 = arith.constant 0 : i32
    %c0_i32_1 = arith.constant 0 : i32
    return %c0_i32, %c0_i32_0 : i32, i32
  }
  func.func @transform_5(%arg0: i32) -> (i32, i32) {
    %c0_i32 = arith.constant 0 : i32
    %c0_i32_0 = arith.constant 0 : i32
    return %arg0, %c0_i32 : i32, i32
  }
}

module attributes {stable_mosaic.version = 11 : i64} {
  func.func @_linear_kernel(%arg0: i32, %arg1: memref<24x32xf32, #tpu.memory_space<vmem>>, %arg2: memref<32x64xbf16, #tpu.memory_space<vmem>>, %arg3: memref<1x64xf32, #tpu.memory_space<vmem>>, %arg4: memref<24x64xbf16, #tpu.memory_space<vmem>>) attributes {dimension_semantics = [#tpu.dimension_semantics<parallel>], iteration_bounds = array<i64: 1>, scalar_prefetch = 0 : i64, scratch_operands = 0 : i64, tpu.core_type = #tpu.core_type<tc>, window_params = [{transform_indices = @transform_0, window_bounds = array<i64: 24, 32>}, {pipeline_mode = #tpu.pipeline_mode<synchronous>, transform_indices = @transform_1, window_bounds = array<i64: 32, 64>}, {pipeline_mode = #tpu.pipeline_mode<synchronous>, transform_indices = @transform_2, window_bounds = array<i64: 1, 64>}, {transform_indices = @transform_3, window_bounds = array<i64: 24, 64>}]} {
    %c0 = arith.constant 0 : index
    %c0_0 = arith.constant 0 : index
    %0 = vector.load %arg1[%c0, %c0_0] : memref<24x32xf32, #tpu.memory_space<vmem>>, vector<24x32xf32>
    %1 = arith.truncf %0 : vector<24x32xf32> to vector<24x32xbf16>
    %c0_1 = arith.constant 0 : index
    %c0_2 = arith.constant 0 : index
    %2 = vector.load %arg2[%c0_1, %c0_2] : memref<32x64xbf16, #tpu.memory_space<vmem>>, vector<32x64xbf16>
    %cst = arith.constant dense<0.000000e+00> : vector<24x64xf32>
    %3 = tpu.matmul %1, %2, %cst {dimension_numbers = #tpu.dot_dimension_numbers<[1], [0], [0], [1], [0, 0, 1, 1], [], []>} : vector<24x32xbf16>, vector<32x64xbf16>, vector<24x64xf32> -> vector<24x64xf32>
    %c0_3 = arith.constant 0 : index
    %c0_4 = arith.constant 0 : index
    %4 = vector.load %arg3[%c0_3, %c0_4] : memref<1x64xf32, #tpu.memory_space<vmem>>, vector<1x64xf32>
    %5 = vector.broadcast %4 : vector<1x64xf32> to vector<24x64xf32>
    %6 = arith.addf %3, %5 : vector<24x64xf32>
    %7 = arith.truncf %6 : vector<24x64xf32> to vector<24x64xbf16>
    %c0_5 = arith.constant 0 : index
    %c0_6 = arith.constant 0 : index
    %8 = vector.load %arg4[%c0_5, %c0_6] : memref<24x64xbf16, #tpu.memory_space<vmem>>, vector<24x64xbf16>
    tpu.vector_store %arg4[%c0_5, %c0_6], %7 {strides = array<i32>} : memref<24x64xbf16, #tpu.memory_space<vmem>>, vector<24x64xbf16>,
    return
  }
  func.func @transform_0(%arg0: i32) -> (i32, i32) {
    %c0_i32 = arith.constant 0 : i32
    %c0_i32_0 = arith.constant 0 : i32
    return %arg0, %c0_i32 : i32, i32
  }
  func.func @transform_1(%arg0: i32) -> (i32, i32) {
    %c0_i32 = arith.constant 0 : i32
    %c0_i32_0 = arith.constant 0 : i32
    %c0_i32_1 = arith.constant 0 : i32
    return %c0_i32, %c0_i32_0 : i32, i32
  }
  func.func @transform_2(%arg0: i32) -> (i32, i32) {
    %c0_i32 = arith.constant 0 : i32
    %c0_i32_0 = arith.constant 0 : i32
    %c0_i32_1 = arith.constant 0 : i32
    return %c0_i32, %c0_i32_0 : i32, i32
  }
  func.func @transform_3(%arg0: i32) -> (i32, i32) {
    %c0_i32 = arith.constant 0 : i32
    %c0_i32_0 = arith.constant 0 : i32
    return %arg0, %c0_i32 : i32, i32
  }
}

module attributes {stable_mosaic.version = 11 : i64} {
  func.func @_mha_kernel(%arg0: i32, %arg1: i32, %arg2: memref<1x8x32xbf16, #tpu.memory_space<vmem>>, %arg3: memref<1x12x64xbf16, #tpu.memory_space<vmem>>, %arg4: memref<1x1x12xf32, #tpu.memory_space<vmem>>, %arg5: memref<32x32xf32, #tpu.memory_space<vmem>>, %arg6: memref<1x32xf32, #tpu.memory_space<vmem>>, %arg7: memref<1x8x32xf32, #tpu.memory_space<vmem>>, %arg8: memref<1x8x32xf32, #tpu.memory_space<vmem>>) attributes {dimension_semantics = [#tpu.dimension_semantics<parallel>, #tpu.dimension_semantics<parallel>], iteration_bounds = array<i64: 2, 1>, scalar_prefetch = 0 : i64, scratch_operands = 0 : i64, tpu.core_type = #tpu.core_type<tc>, window_params = [{transform_indices = @transform_0, window_bounds = array<i64: 1, 8, 32>}, {transform_indices = @transform_1, window_bounds = array<i64: 1, 12, 64>}, {transform_indices = @transform_2, window_bounds = array<i64: 1, 1, 12>}, {pipeline_mode = #tpu.pipeline_mode<synchronous>, transform_indices = @transform_3, window_bounds = array<i64: 32, 32>}, {pipeline_mode = #tpu.pipeline_mode<synchronous>, transform_indices = @transform_4, window_bounds = array<i64: 1, 32>}, {transform_indices = @transform_5, window_bounds = array<i64: 1, 8, 32>}, {transform_indices = @transform_6, window_bounds = array<i64: 1, 8, 32>}]} {
    %c0 = arith.constant 0 : index
    %c0_0 = arith.constant 0 : index
    %c0_1 = arith.constant 0 : index
    %0 = vector.load %arg4[%c0, %c0_0, %c0_1] : memref<1x1x12xf32, #tpu.memory_space<vmem>>, vector<1x1x12xf32>
    %1 = vector.shape_cast %0 : vector<1x1x12xf32> to vector<1x12xf32>
    %c0_2 = arith.constant 0 : index
    %c0_3 = arith.constant 0 : index
    %c0_4 = arith.constant 0 : index
    %2 = vector.load %arg7[%c0_2, %c0_3, %c0_4] : memref<1x8x32xf32, #tpu.memory_space<vmem>>, vector<1x8x32xf32>
    %3 = vector.shape_cast %2 : vector<1x8x32xf32> to vector<8x32xf32>
    %c0_5 = arith.constant 0 : index
    %c0_6 = arith.constant 0 : index
    %4 = vector.load %arg6[%c0_5, %c0_6] : memref<1x32xf32, #tpu.memory_space<vmem>>, vector<1x32xf32>
    %5 = vector.broadcast %4 : vector<1x32xf32> to vector<8x32xf32>
    %6 = arith.addf %3, %5 : vector<8x32xf32>
    %c0_7 = arith.constant 0 : index
    %c0_8 = arith.constant 0 : index
    %c0_9 = arith.constant 0 : index
    %7 = vector.load %arg2[%c0_7, %c0_8, %c0_9] : memref<1x8x32xbf16, #tpu.memory_space<vmem>>, vector<1x8x8xbf16>
    %8 = vector.shape_cast %7 : vector<1x8x8xbf16> to vector<8x8xbf16>
    %c0_10 = arith.constant 0 : index
    %c0_11 = arith.constant 0 : index
    %c0_12 = arith.constant 0 : index
    %9 = vector.load %arg3[%c0_10, %c0_11, %c0_12] : memref<1x12x64xbf16, #tpu.memory_space<vmem>>, vector<1x12x8xbf16>
    %10 = vector.shape_cast %9 : vector<1x12x8xbf16> to vector<12x8xbf16>
    %c0_13 = arith.constant 0 : index
    %c0_14 = arith.constant 0 : index
    %c32 = arith.constant 32 : index
    %11 = vector.load %arg3[%c0_13, %c0_14, %c32] : memref<1x12x64xbf16, #tpu.memory_space<vmem>>, vector<1x12x8xbf16>
    %12 = vector.shape_cast %11 : vector<1x12x8xbf16> to vector<12x8xbf16>
    %cst = arith.constant dense<0.000000e+00> : vector<8x12xf32>
    %13 = tpu.matmul %8, %10, %cst {dimension_numbers = #tpu.dot_dimension_numbers<[1], [1], [0], [0], [0, 0, 1, 0], [], []>} : vector<8x8xbf16>, vector<12x8xbf16>, vector<8x12xf32> -> vector<8x12xf32>
    %14 = vector.broadcast %1 : vector<1x12xf32> to vector<8x12xf32>
    %15 = arith.addf %13, %14 : vector<8x12xf32>
    %cst_15 = arith.constant dense<0xFF800000> : vector<8xf32>
    %16 = vector.multi_reduction <maximumf>, %15, %cst_15 [1] : vector<8x12xf32> to vector<8xf32>
    %17 = vector.shape_cast %16 : vector<8xf32> to vector<8x1xf32>
    %18 = vector.broadcast %17 : vector<8x1xf32> to vector<8x12xf32>
    %19 = arith.subf %15, %18 : vector<8x12xf32>
    %20 = math.exp %19 : vector<8x12xf32>
    %cst_16 = arith.constant dense<0.000000e+00> : vector<8xf32>
    %21 = vector.multi_reduction <add>, %20, %cst_16 [1] : vector<8x12xf32> to vector<8xf32>
    %22 = vector.shape_cast %21 : vector<8xf32> to vector<8x1xf32>
    %23 = tpu.reciprocal %22 : vector<8x1xf32> -> vector<8x1xf32>
    %24 = vector.broadcast %23 : vector<8x1xf32> to vector<8x12xf32>
    %25 = arith.mulf %20, %24 : vector<8x12xf32>
    %26 = arith.truncf %25 : vector<8x12xf32> to vector<8x12xbf16>
    %cst_17 = arith.constant dense<0.000000e+00> : vector<8x8xf32>
    %27 = tpu.matmul %26, %12, %cst_17 {dimension_numbers = #tpu.dot_dimension_numbers<[1], [0], [0], [1], [0, 0, 1, 1], [], []>} : vector<8x12xbf16>, vector<12x8xbf16>, vector<8x8xf32> -> vector<8x8xf32>
    %28 = arith.truncf %27 : vector<8x8xf32> to vector<8x8xbf16>
    %c0_18 = arith.constant 0 : index
    %c0_19 = arith.constant 0 : index
    %29 = vector.load %arg5[%c0_18, %c0_19] : memref<32x32xf32, #tpu.memory_space<vmem>>, vector<8x32xf32>
    %30 = arith.truncf %29 : vector<8x32xf32> to vector<8x32xbf16>
    %cst_20 = arith.constant dense<0.000000e+00> : vector<8x32xf32>
    %31 = tpu.matmul %28, %30, %cst_20 {dimension_numbers = #tpu.dot_dimension_numbers<[1], [0], [0], [1], [0, 0, 1, 1], [], []>} : vector<8x8xbf16>, vector<8x32xbf16>, vector<8x32xf32> -> vector<8x32xf32>
    %32 = arith.addf %6, %31 : vector<8x32xf32>
    %c0_21 = arith.constant 0 : index
    %c0_22 = arith.constant 0 : index
    %c8 = arith.constant 8 : index
    %33 = vector.load %arg2[%c0_21, %c0_22, %c8] : memref<1x8x32xbf16, #tpu.memory_space<vmem>>, vector<1x8x8xbf16>
    %34 = vector.shape_cast %33 : vector<1x8x8xbf16> to vector<8x8xbf16>
    %c0_23 = arith.constant 0 : index
    %c0_24 = arith.constant 0 : index
    %c8_25 = arith.constant 8 : index
    %35 = vector.load %arg3[%c0_23, %c0_24, %c8_25] : memref<1x12x64xbf16, #tpu.memory_space<vmem>>, vector<1x12x8xbf16>
    %36 = vector.shape_cast %35 : vector<1x12x8xbf16> to vector<12x8xbf16>
    %c0_26 = arith.constant 0 : index
    %c0_27 = arith.constant 0 : index
    %c40 = arith.constant 40 : index
    %37 = vector.load %arg3[%c0_26, %c0_27, %c40] : memref<1x12x64xbf16, #tpu.memory_space<vmem>>, vector<1x12x8xbf16>
    %38 = vector.shape_cast %37 : vector<1x12x8xbf16> to vector<12x8xbf16>
    %cst_28 = arith.constant dense<0.000000e+00> : vector<8x12xf32>
    %39 = tpu.matmul %34, %36, %cst_28 {dimension_numbers = #tpu.dot_dimension_numbers<[1], [1], [0], [0], [0, 0, 1, 0], [], []>} : vector<8x8xbf16>, vector<12x8xbf16>, vector<8x12xf32> -> vector<8x12xf32>
    %40 = vector.broadcast %1 : vector<1x12xf32> to vector<8x12xf32>
    %41 = arith.addf %39, %40 : vector<8x12xf32>
    %cst_29 = arith.constant dense<0xFF800000> : vector<8xf32>
    %42 = vector.multi_reduction <maximumf>, %41, %cst_29 [1] : vector<8x12xf32> to vector<8xf32>
    %43 = vector.shape_cast %42 : vector<8xf32> to vector<8x1xf32>
    %44 = vector.broadcast %43 : vector<8x1xf32> to vector<8x12xf32>
    %45 = arith.subf %41, %44 : vector<8x12xf32>
    %46 = math.exp %45 : vector<8x12xf32>
    %cst_30 = arith.constant dense<0.000000e+00> : vector<8xf32>
    %47 = vector.multi_reduction <add>, %46, %cst_30 [1] : vector<8x12xf32> to vector<8xf32>
    %48 = vector.shape_cast %47 : vector<8xf32> to vector<8x1xf32>
    %49 = tpu.reciprocal %48 : vector<8x1xf32> -> vector<8x1xf32>
    %50 = vector.broadcast %49 : vector<8x1xf32> to vector<8x12xf32>
    %51 = arith.mulf %46, %50 : vector<8x12xf32>
    %52 = arith.truncf %51 : vector<8x12xf32> to vector<8x12xbf16>
    %cst_31 = arith.constant dense<0.000000e+00> : vector<8x8xf32>
    %53 = tpu.matmul %52, %38, %cst_31 {dimension_numbers = #tpu.dot_dimension_numbers<[1], [0], [0], [1], [0, 0, 1, 1], [], []>} : vector<8x12xbf16>, vector<12x8xbf16>, vector<8x8xf32> -> vector<8x8xf32>
    %54 = arith.truncf %53 : vector<8x8xf32> to vector<8x8xbf16>
    %c8_32 = arith.constant 8 : index
    %c0_33 = arith.constant 0 : index
    %55 = vector.load %arg5[%c8_32, %c0_33] : memref<32x32xf32, #tpu.memory_space<vmem>>, vector<8x32xf32>
    %56 = arith.truncf %55 : vector<8x32xf32> to vector<8x32xbf16>
    %cst_34 = arith.constant dense<0.000000e+00> : vector<8x32xf32>
    %57 = tpu.matmul %54, %56, %cst_34 {dimension_numbers = #tpu.dot_dimension_numbers<[1], [0], [0], [1], [0, 0, 1, 1], [], []>} : vector<8x8xbf16>, vector<8x32xbf16>, vector<8x32xf32> -> vector<8x32xf32>
    %58 = arith.addf %32, %57 : vector<8x32xf32>
    %c0_35 = arith.constant 0 : index
    %c0_36 = arith.constant 0 : index
    %c16 = arith.constant 16 : index
    %59 = vector.load %arg2[%c0_35, %c0_36, %c16] : memref<1x8x32xbf16, #tpu.memory_space<vmem>>, vector<1x8x8xbf16>
    %60 = vector.shape_cast %59 : vector<1x8x8xbf16> to vector<8x8xbf16>
    %c0_37 = arith.constant 0 : index
    %c0_38 = arith.constant 0 : index
    %c16_39 = arith.constant 16 : index
    %61 = vector.load %arg3[%c0_37, %c0_38, %c16_39] : memref<1x12x64xbf16, #tpu.memory_space<vmem>>, vector<1x12x8xbf16>
    %62 = vector.shape_cast %61 : vector<1x12x8xbf16> to vector<12x8xbf16>
    %c0_40 = arith.constant 0 : index
    %c0_41 = arith.constant 0 : index
    %c48 = arith.constant 48 : index
    %63 = vector.load %arg3[%c0_40, %c0_41, %c48] : memref<1x12x64xbf16, #tpu.memory_space<vmem>>, vector<1x12x8xbf16>
    %64 = vector.shape_cast %63 : vector<1x12x8xbf16> to vector<12x8xbf16>
    %cst_42 = arith.constant dense<0.000000e+00> : vector<8x12xf32>
    %65 = tpu.matmul %60, %62, %cst_42 {dimension_numbers = #tpu.dot_dimension_numbers<[1], [1], [0], [0], [0, 0, 1, 0], [], []>} : vector<8x8xbf16>, vector<12x8xbf16>, vector<8x12xf32> -> vector<8x12xf32>
    %66 = vector.broadcast %1 : vector<1x12xf32> to vector<8x12xf32>
    %67 = arith.addf %65, %66 : vector<8x12xf32>
    %cst_43 = arith.constant dense<0xFF800000> : vector<8xf32>
    %68 = vector.multi_reduction <maximumf>, %67, %cst_43 [1] : vector<8x12xf32> to vector<8xf32>
    %69 = vector.shape_cast %68 : vector<8xf32> to vector<8x1xf32>
    %70 = vector.broadcast %69 : vector<8x1xf32> to vector<8x12xf32>
    %71 = arith.subf %67, %70 : vector<8x12xf32>
    %72 = math.exp %71 : vector<8x12xf32>
    %cst_44 = arith.constant dense<0.000000e+00> : vector<8xf32>
    %73 = vector.multi_reduction <add>, %72, %cst_44 [1] : vector<8x12xf32> to vector<8xf32>
    %74 = vector.shape_cast %73 : vector<8xf32> to vector<8x1xf32>
    %75 = tpu.reciprocal %74 : vector<8x1xf32> -> vector<8x1xf32>
    %76 = vector.broadcast %75 : vector<8x1xf32> to vector<8x12xf32>
    %77 = arith.mulf %72, %76 : vector<8x12xf32>
    %78 = arith.truncf %77 : vector<8x12xf32> to vector<8x12xbf16>
    %cst_45 = arith.constant dense<0.000000e+00> : vector<8x8xf32>
    %79 = tpu.matmul %78, %64, %cst_45 {dimension_numbers = #tpu.dot_dimension_numbers<[1], [0], [0], [1], [0, 0, 1, 1], [], []>} : vector<8x12xbf16>, vector<12x8xbf16>, vector<8x8xf32> -> vector<8x8xf32>
    %80 = arith.truncf %79 : vector<8x8xf32> to vector<8x8xbf16>
    %c16_46 = arith.constant 16 : index
    %c0_47 = arith.constant 0 : index
    %81 = vector.load %arg5[%c16_46, %c0_47] : memref<32x32xf32, #tpu.memory_space<vmem>>, vector<8x32xf32>
    %82 = arith.truncf %81 : vector<8x32xf32> to vector<8x32xbf16>
    %cst_48 = arith.constant dense<0.000000e+00> : vector<8x32xf32>
    %83 = tpu.matmul %80, %82, %cst_48 {dimension_numbers = #tpu.dot_dimension_numbers<[1], [0], [0], [1], [0, 0, 1, 1], [], []>} : vector<8x8xbf16>, vector<8x32xbf16>, vector<8x32xf32> -> vector<8x32xf32>
    %84 = arith.addf %58, %83 : vector<8x32xf32>
    %c0_49 = arith.constant 0 : index
    %c0_50 = arith.constant 0 : index
    %c24 = arith.constant 24 : index
    %85 = vector.load %arg2[%c0_49, %c0_50, %c24] : memref<1x8x32xbf16, #tpu.memory_space<vmem>>, vector<1x8x8xbf16>
    %86 = vector.shape_cast %85 : vector<1x8x8xbf16> to vector<8x8xbf16>
    %c0_51 = arith.constant 0 : index
    %c0_52 = arith.constant 0 : index
    %c24_53 = arith.constant 24 : index
    %87 = vector.load %arg3[%c0_51, %c0_52, %c24_53] : memref<1x12x64xbf16, #tpu.memory_space<vmem>>, vector<1x12x8xbf16>
    %88 = vector.shape_cast %87 : vector<1x12x8xbf16> to vector<12x8xbf16>
    %c0_54 = arith.constant 0 : index
    %c0_55 = arith.constant 0 : index
    %c56 = arith.constant 56 : index
    %89 = vector.load %arg3[%c0_54, %c0_55, %c56] : memref<1x12x64xbf16, #tpu.memory_space<vmem>>, vector<1x12x8xbf16>
    %90 = vector.shape_cast %89 : vector<1x12x8xbf16> to vector<12x8xbf16>
    %cst_56 = arith.constant dense<0.000000e+00> : vector<8x12xf32>
    %91 = tpu.matmul %86, %88, %cst_56 {dimension_numbers = #tpu.dot_dimension_numbers<[1], [1], [0], [0], [0, 0, 1, 0], [], []>} : vector<8x8xbf16>, vector<12x8xbf16>, vector<8x12xf32> -> vector<8x12xf32>
    %92 = vector.broadcast %1 : vector<1x12xf32> to vector<8x12xf32>
    %93 = arith.addf %91, %92 : vector<8x12xf32>
    %cst_57 = arith.constant dense<0xFF800000> : vector<8xf32>
    %94 = vector.multi_reduction <maximumf>, %93, %cst_57 [1] : vector<8x12xf32> to vector<8xf32>
    %95 = vector.shape_cast %94 : vector<8xf32> to vector<8x1xf32>
    %96 = vector.broadcast %95 : vector<8x1xf32> to vector<8x12xf32>
    %97 = arith.subf %93, %96 : vector<8x12xf32>
    %98 = math.exp %97 : vector<8x12xf32>
    %cst_58 = arith.constant dense<0.000000e+00> : vector<8xf32>
    %99 = vector.multi_reduction <add>, %98, %cst_58 [1] : vector<8x12xf32> to vector<8xf32>
    %100 = vector.shape_cast %99 : vector<8xf32> to vector<8x1xf32>
    %101 = tpu.reciprocal %100 : vector<8x1xf32> -> vector<8x1xf32>
    %102 = vector.broadcast %101 : vector<8x1xf32> to vector<8x12xf32>
    %103 = arith.mulf %98, %102 : vector<8x12xf32>
    %104 = arith.truncf %103 : vector<8x12xf32> to vector<8x12xbf16>
    %cst_59 = arith.constant dense<0.000000e+00> : vector<8x8xf32>
    %105 = tpu.matmul %104, %90, %cst_59 {dimension_numbers = #tpu.dot_dimension_numbers<[1], [0], [0], [1], [0, 0, 1, 1], [], []>} : vector<8x12xbf16>, vector<12x8xbf16>, vector<8x8xf32> -> vector<8x8xf32>
    %106 = arith.truncf %105 : vector<8x8xf32> to vector<8x8xbf16>
    %c24_60 = arith.constant 24 : index
    %c0_61 = arith.constant 0 : index
    %107 = vector.load %arg5[%c24_60, %c0_61] : memref<32x32xf32, #tpu.memory_space<vmem>>, vector<8x32xf32>
    %108 = arith.truncf %107 : vector<8x32xf32> to vector<8x32xbf16>
    %cst_62 = arith.constant dense<0.000000e+00> : vector<8x32xf32>
    %109 = tpu.matmul %106, %108, %cst_62 {dimension_numbers = #tpu.dot_dimension_numbers<[1], [0], [0], [1], [0, 0, 1, 1], [], []>} : vector<8x8xbf16>, vector<8x32xbf16>, vector<8x32xf32> -> vector<8x32xf32>
    %110 = arith.addf %84, %109 : vector<8x32xf32>
    %c0_63 = arith.constant 0 : index
    %c0_64 = arith.constant 0 : index
    %c0_65 = arith.constant 0 : index
    %111 = vector.load %arg8[%c0_63, %c0_64, %c0_65] : memref<1x8x32xf32, #tpu.memory_space<vmem>>, vector<1x8x32xf32>
    %112 = vector.shape_cast %111 : vector<1x8x32xf32> to vector<8x32xf32>
    %113 = vector.shape_cast %110 : vector<8x32xf32> to vector<1x8x32xf32>
    tpu.vector_store %arg8[%c0_63, %c0_64, %c0_65], %113 {strides = array<i32>} : memref<1x8x32xf32, #tpu.memory_space<vmem>>, vector<1x8x32xf32>,
    return
  }
  func.func @transform_0(%arg0: i32, %arg1: i32) -> (i32, i32, i32) {
    %c0_i32 = arith.constant 0 : i32
    %c0_i32_0 = arith.constant 0 : i32
    return %arg0, %arg1, %c0_i32 : i32, i32, i32
  }
  func.func @transform_1(%arg0: i32, %arg1: i32) -> (i32, i32, i32) {
    %c0_i32 = arith.constant 0 : i32
    %c0_i32_0 = arith.constant 0 : i32
    %c0_i32_1 = arith.constant 0 : i32
    return %arg0, %c0_i32, %c0_i32_0 : i32, i32, i32
  }
  func.func @transform_2(%arg0: i32, %arg1: i32) -> (i32, i32, i32) {
    %c0_i32 = arith.constant 0 : i32
    %c0_i32_0 = arith.constant 0 : i32
    %c0_i32_1 = arith.constant 0 : i32
    return %arg0, %c0_i32, %c0_i32_0 : i32, i32, i32
  }
  func.func @transform_3(%arg0: i32, %arg1: i32) -> (i32, i32) {
    %c0_i32 = arith.constant 0 : i32
    %c0_i32_0 = arith.constant 0 : i32
    %c0_i32_1 = arith.constant 0 : i32
    return %c0_i32, %c0_i32_0 : i32, i32
  }
  func.func @transform_4(%arg0: i32, %arg1: i32) -> (i32, i32) {
    %c0_i32 = arith.constant 0 : i32
    %c0_i32_0 = arith.constant 0 : i32
    %c0_i32_1 = arith.constant 0 : i32
    return %c0_i32, %c0_i32_0 : i32, i32
  }
  func.func @transform_5(%arg0: i32, %arg1: i32) -> (i32, i32, i32) {
    %c0_i32 = arith.constant 0 : i32
    %c0_i32_0 = arith.constant 0 : i32
    return %arg0, %arg1, %c0_i32 : i32, i32, i32
  }
  func.func @transform_6(%arg0: i32, %arg1: i32) -> (i32, i32, i32) {
    %c0_i32 = arith.constant 0 : i32
    %c0_i32_0 = arith.constant 0 : i32
    return %arg0, %arg1, %c0_i32 : i32, i32, i32
  }
}

module attributes {stable_mosaic.version = 11 : i64} {
  func.func @_ffn_policy_kernel(%arg0: i32, %arg1: i32, %arg2: memref<2x2xf32, #tpu.memory_space<smem>>, %arg3: memref<1x8x32xf32, #tpu.memory_space<vmem>>, %arg4: memref<1x8x32xf32, #tpu.memory_space<vmem>>, %arg5: memref<1x32xf32, #tpu.memory_space<vmem>>, %arg6: memref<1x32xf32, #tpu.memory_space<vmem>>, %arg7: memref<32x64xbf16, #tpu.memory_space<vmem>>, %arg8: memref<1x64xf32, #tpu.memory_space<vmem>>, %arg9: memref<64x32xbf16, #tpu.memory_space<vmem>>, %arg10: memref<1x32xf32, #tpu.memory_space<vmem>>, %arg11: memref<1x8x32xf32, #tpu.memory_space<vmem>>) attributes {dimension_semantics = [#tpu.dimension_semantics<parallel>, #tpu.dimension_semantics<parallel>], iteration_bounds = array<i64: 2, 1>, scalar_prefetch = 0 : i64, scratch_operands = 0 : i64, tpu.core_type = #tpu.core_type<tc>, window_params = [{transform_indices = @transform_0, window_bounds = array<i64: 2, 2>}, {transform_indices = @transform_1, window_bounds = array<i64: 1, 8, 32>}, {transform_indices = @transform_2, window_bounds = array<i64: 1, 8, 32>}, {pipeline_mode = #tpu.pipeline_mode<synchronous>, transform_indices = @transform_3, window_bounds = array<i64: 1, 32>}, {pipeline_mode = #tpu.pipeline_mode<synchronous>, transform_indices = @transform_4, window_bounds = array<i64: 1, 32>}, {pipeline_mode = #tpu.pipeline_mode<synchronous>, transform_indices = @transform_5, window_bounds = array<i64: 32, 64>}, {pipeline_mode = #tpu.pipeline_mode<synchronous>, transform_indices = @transform_6, window_bounds = array<i64: 1, 64>}, {pipeline_mode = #tpu.pipeline_mode<synchronous>, transform_indices = @transform_7, window_bounds = array<i64: 64, 32>}, {pipeline_mode = #tpu.pipeline_mode<synchronous>, transform_indices = @transform_8, window_bounds = array<i64: 1, 32>}, {transform_indices = @transform_9, window_bounds = array<i64: 1, 8, 32>}]} {
    %0 = arith.index_cast %arg0 : i32 to index
    %c0 = arith.constant 0 : index
    %1 = memref.load %arg2[%0, %c0] : memref<2x2xf32, #tpu.memory_space<smem>>
    %2 = arith.index_cast %arg0 : i32 to index
    %c1 = arith.constant 1 : index
    %3 = memref.load %arg2[%2, %c1] : memref<2x2xf32, #tpu.memory_space<smem>>
    %c0_0 = arith.constant 0 : index
    %c0_1 = arith.constant 0 : index
    %c0_2 = arith.constant 0 : index
    %4 = vector.load %arg3[%c0_0, %c0_1, %c0_2] : memref<1x8x32xf32, #tpu.memory_space<vmem>>, vector<1x8x32xf32>
    %5 = vector.shape_cast %4 : vector<1x8x32xf32> to vector<8x32xf32>
    %cst = arith.constant dense<0.000000e+00> : vector<8xf32>
    %6 = vector.multi_reduction <add>, %5, %cst [1] : vector<8x32xf32> to vector<8xf32>
    %7 = vector.shape_cast %6 : vector<8xf32> to vector<8x1xf32>
    %cst_3 = arith.constant 3.200000e+01 : f32
    %8 = vector.broadcast %cst_3 : f32 to vector<8x1xf32>
    %9 = arith.divf %7, %8 : vector<8x1xf32>
    %10 = vector.broadcast %9 : vector<8x1xf32> to vector<8x32xf32>
    %11 = arith.subf %5, %10 : vector<8x32xf32>
    %12 = arith.mulf %11, %11 : vector<8x32xf32>
    %cst_4 = arith.constant dense<0.000000e+00> : vector<8xf32>
    %13 = vector.multi_reduction <add>, %12, %cst_4 [1] : vector<8x32xf32> to vector<8xf32>
    %14 = vector.shape_cast %13 : vector<8xf32> to vector<8x1xf32>
    %cst_5 = arith.constant 3.200000e+01 : f32
    %15 = vector.broadcast %cst_5 : f32 to vector<8x1xf32>
    %16 = arith.divf %14, %15 : vector<8x1xf32>
    %17 = vector.broadcast %9 : vector<8x1xf32> to vector<8x32xf32>
    %18 = arith.subf %5, %17 : vector<8x32xf32>
    %cst_6 = arith.constant 9.99999997E-7 : f32
    %19 = vector.broadcast %cst_6 : f32 to vector<8x1xf32>
    %20 = arith.addf %16, %19 : vector<8x1xf32>
    %21 = math.rsqrt %20 : vector<8x1xf32>
    %22 = vector.broadcast %21 : vector<8x1xf32> to vector<8x32xf32>
    %23 = arith.mulf %18, %22 : vector<8x32xf32>
    %c0_7 = arith.constant 0 : index
    %c0_8 = arith.constant 0 : index
    %24 = vector.load %arg5[%c0_7, %c0_8] : memref<1x32xf32, #tpu.memory_space<vmem>>, vector<1x32xf32>
    %25 = vector.broadcast %24 : vector<1x32xf32> to vector<8x32xf32>
    %26 = arith.mulf %23, %25 : vector<8x32xf32>
    %c0_9 = arith.constant 0 : index
    %c0_10 = arith.constant 0 : index
    %27 = vector.load %arg6[%c0_9, %c0_10] : memref<1x32xf32, #tpu.memory_space<vmem>>, vector<1x32xf32>
    %28 = vector.broadcast %27 : vector<1x32xf32> to vector<8x32xf32>
    %29 = arith.addf %26, %28 : vector<8x32xf32>
    %30 = arith.truncf %29 : vector<8x32xf32> to vector<8x32xbf16>
    %c0_11 = arith.constant 0 : index
    %c0_12 = arith.constant 0 : index
    %31 = vector.load %arg7[%c0_11, %c0_12] : memref<32x64xbf16, #tpu.memory_space<vmem>>, vector<32x64xbf16>
    %cst_13 = arith.constant dense<0.000000e+00> : vector<8x64xf32>
    %32 = tpu.matmul %30, %31, %cst_13 {dimension_numbers = #tpu.dot_dimension_numbers<[1], [0], [0], [1], [0, 0, 1, 1], [], []>} : vector<8x32xbf16>, vector<32x64xbf16>, vector<8x64xf32> -> vector<8x64xf32>
    %c0_14 = arith.constant 0 : index
    %c0_15 = arith.constant 0 : index
    %33 = vector.load %arg8[%c0_14, %c0_15] : memref<1x64xf32, #tpu.memory_space<vmem>>, vector<1x64xf32>
    %34 = vector.broadcast %33 : vector<1x64xf32> to vector<8x64xf32>
    %35 = arith.addf %32, %34 : vector<8x64xf32>
    %cst_16 = arith.constant 0.000000e+00 : f32
    %36 = vector.broadcast %cst_16 : f32 to vector<8x64xf32>
    %37 = arith.maximumf %35, %36 : vector<8x64xf32>
    %38 = arith.truncf %37 : vector<8x64xf32> to vector<8x64xbf16>
    %c0_17 = arith.constant 0 : index
    %c0_18 = arith.constant 0 : index
    %39 = vector.load %arg9[%c0_17, %c0_18] : memref<64x32xbf16, #tpu.memory_space<vmem>>, vector<64x32xbf16>
    %cst_19 = arith.constant dense<0.000000e+00> : vector<8x32xf32>
    %40 = tpu.matmul %38, %39, %cst_19 {dimension_numbers = #tpu.dot_dimension_numbers<[1], [0], [0], [1], [0, 0, 1, 1], [], []>} : vector<8x64xbf16>, vector<64x32xbf16>, vector<8x32xf32> -> vector<8x32xf32>
    %c0_20 = arith.constant 0 : index
    %c0_21 = arith.constant 0 : index
    %41 = vector.load %arg10[%c0_20, %c0_21] : memref<1x32xf32, #tpu.memory_space<vmem>>, vector<1x32xf32>
    %42 = vector.broadcast %41 : vector<1x32xf32> to vector<8x32xf32>
    %43 = arith.addf %40, %42 : vector<8x32xf32>
    %44 = arith.addf %43, %5 : vector<8x32xf32>
    %c0_22 = arith.constant 0 : index
    %c0_23 = arith.constant 0 : index
    %c0_24 = arith.constant 0 : index
    %45 = vector.load %arg4[%c0_22, %c0_23, %c0_24] : memref<1x8x32xf32, #tpu.memory_space<vmem>>, vector<1x8x32xf32>
    %46 = vector.shape_cast %45 : vector<1x8x32xf32> to vector<8x32xf32>
    %47 = vector.broadcast %3 : f32 to vector<8x32xf32>
    %48 = arith.mulf %47, %46 : vector<8x32xf32>
    %49 = vector.broadcast %1 : f32 to vector<8x32xf32>
    %50 = arith.mulf %49, %44 : vector<8x32xf32>
    %51 = arith.addf %48, %50 : vector<8x32xf32>
    %c0_25 = arith.constant 0 : index
    %c0_26 = arith.constant 0 : index
    %c0_27 = arith.constant 0 : index
    %52 = vector.load %arg11[%c0_25, %c0_26, %c0_27] : memref<1x8x32xf32, #tpu.memory_space<vmem>>, vector<1x8x32xf32>
    %53 = vector.shape_cast %52 : vector<1x8x32xf32> to vector<8x32xf32>
    %54 = vector.shape_cast %51 : vector<8x32xf32> to vector<1x8x32xf32>
    tpu.vector_store %arg11[%c0_25, %c0_26, %c0_27], %54 {strides = array<i32>} : memref<1x8x32xf32, #tpu.memory_space<vmem>>, vector<1x8x32xf32>,
    return
  }
  func.func @transform_0(%arg0: i32, %arg1: i32) -> (i32, i32) {
    %c0_i32 = arith.constant 0 : i32
    %c0_i32_0 = arith.constant 0 : i32
    %c0_i32_1 = arith.constant 0 : i32
    return %c0_i32, %c0_i32_0 : i32, i32
  }
  func.func @transform_1(%arg0: i32, %arg1: i32) -> (i32, i32, i32) {
    %c0_i32 = arith.constant 0 : i32
    %c0_i32_0 = arith.constant 0 : i32
    return %arg0, %arg1, %c0_i32 : i32, i32, i32
  }
  func.func @transform_2(%arg0: i32, %arg1: i32) -> (i32, i32, i32) {
    %c0_i32 = arith.constant 0 : i32
    %c0_i32_0 = arith.constant 0 : i32
    return %arg0, %arg1, %c0_i32 : i32, i32, i32
  }
  func.func @transform_3(%arg0: i32, %arg1: i32) -> (i32, i32) {
    %c0_i32 = arith.constant 0 : i32
    %c0_i32_0 = arith.constant 0 : i32
    %c0_i32_1 = arith.constant 0 : i32
    return %c0_i32, %c0_i32_0 : i32, i32
  }
  func.func @transform_4(%arg0: i32, %arg1: i32) -> (i32, i32) {
    %c0_i32 = arith.constant 0 : i32
    %c0_i32_0 = arith.constant 0 : i32
    %c0_i32_1 = arith.constant 0 : i32
    return %c0_i32, %c0_i32_0 : i32, i32
  }
  func.func @transform_5(%arg0: i32, %arg1: i32) -> (i32, i32) {
    %c0_i32 = arith.constant 0 : i32
    %c0_i32_0 = arith.constant 0 : i32
    %c0_i32_1 = arith.constant 0 : i32
    return %c0_i32, %c0_i32_0 : i32, i32
  }
  func.func @transform_6(%arg0: i32, %arg1: i32) -> (i32, i32) {
    %c0_i32 = arith.constant 0 : i32
    %c0_i32_0 = arith.constant 0 : i32
    %c0_i32_1 = arith.constant 0 : i32
    return %c0_i32, %c0_i32_0 : i32, i32
  }
  func.func @transform_7(%arg0: i32, %arg1: i32) -> (i32, i32) {
    %c0_i32 = arith.constant 0 : i32
    %c0_i32_0 = arith.constant 0 : i32
    %c0_i32_1 = arith.constant 0 : i32
    return %c0_i32, %c0_i32_0 : i32, i32
  }
  func.func @transform_8(%arg0: i32, %arg1: i32) -> (i32, i32) {
    %c0_i32 = arith.constant 0 : i32
    %c0_i32_0 = arith.constant 0 : i32
    %c0_i32_1 = arith.constant 0 : i32
    return %c0_i32, %c0_i32_0 : i32, i32
  }
  func.func @transform_9(%arg0: i32, %arg1: i32) -> (i32, i32, i32) {
    %c0_i32 = arith.constant 0 : i32
    %c0_i32_0 = arith.constant 0 : i32
    return %arg0, %arg1, %c0_i32 : i32, i32, i32
  }
}

module attributes {stable_mosaic.version = 11 : i64} {
  func.func @_ln_kernel(%arg0: i32, %arg1: memref<16x32xf32, #tpu.memory_space<vmem>>, %arg2: memref<1x32xf32, #tpu.memory_space<vmem>>, %arg3: memref<1x32xf32, #tpu.memory_space<vmem>>, %arg4: memref<16x32xf32, #tpu.memory_space<vmem>>) attributes {dimension_semantics = [#tpu.dimension_semantics<parallel>], iteration_bounds = array<i64: 1>, scalar_prefetch = 0 : i64, scratch_operands = 0 : i64, tpu.core_type = #tpu.core_type<tc>, window_params = [{transform_indices = @transform_0, window_bounds = array<i64: 16, 32>}, {pipeline_mode = #tpu.pipeline_mode<synchronous>, transform_indices = @transform_1, window_bounds = array<i64: 1, 32>}, {pipeline_mode = #tpu.pipeline_mode<synchronous>, transform_indices = @transform_2, window_bounds = array<i64: 1, 32>}, {transform_indices = @transform_3, window_bounds = array<i64: 16, 32>}]} {
    %c0 = arith.constant 0 : index
    %c0_0 = arith.constant 0 : index
    %0 = vector.load %arg1[%c0, %c0_0] : memref<16x32xf32, #tpu.memory_space<vmem>>, vector<16x32xf32>
    %cst = arith.constant dense<0.000000e+00> : vector<16xf32>
    %1 = vector.multi_reduction <add>, %0, %cst [1] : vector<16x32xf32> to vector<16xf32>
    %2 = vector.shape_cast %1 : vector<16xf32> to vector<16x1xf32>
    %cst_1 = arith.constant 3.200000e+01 : f32
    %3 = vector.broadcast %cst_1 : f32 to vector<16x1xf32>
    %4 = arith.divf %2, %3 : vector<16x1xf32>
    %5 = vector.broadcast %4 : vector<16x1xf32> to vector<16x32xf32>
    %6 = arith.subf %0, %5 : vector<16x32xf32>
    %7 = arith.mulf %6, %6 : vector<16x32xf32>
    %cst_2 = arith.constant dense<0.000000e+00> : vector<16xf32>
    %8 = vector.multi_reduction <add>, %7, %cst_2 [1] : vector<16x32xf32> to vector<16xf32>
    %9 = vector.shape_cast %8 : vector<16xf32> to vector<16x1xf32>
    %cst_3 = arith.constant 3.200000e+01 : f32
    %10 = vector.broadcast %cst_3 : f32 to vector<16x1xf32>
    %11 = arith.divf %9, %10 : vector<16x1xf32>
    %12 = vector.broadcast %4 : vector<16x1xf32> to vector<16x32xf32>
    %13 = arith.subf %0, %12 : vector<16x32xf32>
    %cst_4 = arith.constant 9.99999997E-7 : f32
    %14 = vector.broadcast %cst_4 : f32 to vector<16x1xf32>
    %15 = arith.addf %11, %14 : vector<16x1xf32>
    %16 = math.rsqrt %15 : vector<16x1xf32>
    %17 = vector.broadcast %16 : vector<16x1xf32> to vector<16x32xf32>
    %18 = arith.mulf %13, %17 : vector<16x32xf32>
    %c0_5 = arith.constant 0 : index
    %c0_6 = arith.constant 0 : index
    %19 = vector.load %arg2[%c0_5, %c0_6] : memref<1x32xf32, #tpu.memory_space<vmem>>, vector<1x32xf32>
    %20 = vector.broadcast %19 : vector<1x32xf32> to vector<16x32xf32>
    %21 = arith.mulf %18, %20 : vector<16x32xf32>
    %c0_7 = arith.constant 0 : index
    %c0_8 = arith.constant 0 : index
    %22 = vector.load %arg3[%c0_7, %c0_8] : memref<1x32xf32, #tpu.memory_space<vmem>>, vector<1x32xf32>
    %23 = vector.broadcast %22 : vector<1x32xf32> to vector<16x32xf32>
    %24 = arith.addf %21, %23 : vector<16x32xf32>
    %c0_9 = arith.constant 0 : index
    %c0_10 = arith.constant 0 : index
    %25 = vector.load %arg4[%c0_9, %c0_10] : memref<16x32xf32, #tpu.memory_space<vmem>>, vector<16x32xf32>
    tpu.vector_store %arg4[%c0_9, %c0_10], %24 {strides = array<i32>} : memref<16x32xf32, #tpu.memory_space<vmem>>, vector<16x32xf32>,
    return
  }
  func.func @transform_0(%arg0: i32) -> (i32, i32) {
    %c0_i32 = arith.constant 0 : i32
    %c0_i32_0 = arith.constant 0 : i32
    return %arg0, %c0_i32 : i32, i32
  }
  func.func @transform_1(%arg0: i32) -> (i32, i32) {
    %c0_i32 = arith.constant 0 : i32
    %c0_i32_0 = arith.constant 0 : i32
    %c0_i32_1 = arith.constant 0 : i32
    return %c0_i32, %c0_i32_0 : i32, i32
  }
  func.func @transform_2(%arg0: i32) -> (i32, i32) {
    %c0_i32 = arith.constant 0 : i32
    %c0_i32_0 = arith.constant 0 : i32
    %c0_i32_1 = arith.constant 0 : i32
    return %c0_i32, %c0_i32_0 : i32, i32
  }
  func.func @transform_3(%arg0: i32) -> (i32, i32) {
    %c0_i32 = arith.constant 0 : i32
    %c0_i32_0 = arith.constant 0 : i32
    return %arg0, %c0_i32 : i32, i32
  }
}

module attributes {stable_mosaic.version = 11 : i64} {
  func.func @_out_proj_kernel(%arg0: i32, %arg1: i32, %arg2: memref<16x32xf32, #tpu.memory_space<vmem>>, %arg3: memref<32x16xbf16, #tpu.memory_space<vmem>>, %arg4: memref<16x16xf32, #tpu.memory_space<vmem>>) attributes {dimension_semantics = [#tpu.dimension_semantics<parallel>, #tpu.dimension_semantics<parallel>], iteration_bounds = array<i64: 1, 1>, scalar_prefetch = 0 : i64, scratch_operands = 0 : i64, tpu.core_type = #tpu.core_type<tc>, window_params = [{transform_indices = @transform_0, window_bounds = array<i64: 16, 32>}, {transform_indices = @transform_1, window_bounds = array<i64: 32, 16>}, {transform_indices = @transform_2, window_bounds = array<i64: 16, 16>}]} {
    %c0 = arith.constant 0 : index
    %c0_0 = arith.constant 0 : index
    %0 = vector.load %arg2[%c0, %c0_0] : memref<16x32xf32, #tpu.memory_space<vmem>>, vector<16x32xf32>
    %1 = arith.truncf %0 : vector<16x32xf32> to vector<16x32xbf16>
    %c0_1 = arith.constant 0 : index
    %c0_2 = arith.constant 0 : index
    %2 = vector.load %arg3[%c0_1, %c0_2] : memref<32x16xbf16, #tpu.memory_space<vmem>>, vector<32x16xbf16>
    %cst = arith.constant dense<0.000000e+00> : vector<16x16xf32>
    %3 = tpu.matmul %1, %2, %cst {dimension_numbers = #tpu.dot_dimension_numbers<[1], [0], [0], [1], [0, 0, 1, 1], [], []>} : vector<16x32xbf16>, vector<32x16xbf16>, vector<16x16xf32> -> vector<16x16xf32>
    %c0_3 = arith.constant 0 : index
    %c0_4 = arith.constant 0 : index
    %4 = vector.load %arg4[%c0_3, %c0_4] : memref<16x16xf32, #tpu.memory_space<vmem>>, vector<16x16xf32>
    tpu.vector_store %arg4[%c0_3, %c0_4], %3 {strides = array<i32>} : memref<16x16xf32, #tpu.memory_space<vmem>>, vector<16x16xf32>,
    return
  }
  func.func @transform_0(%arg0: i32, %arg1: i32) -> (i32, i32) {
    %c0_i32 = arith.constant 0 : i32
    %c0_i32_0 = arith.constant 0 : i32
    return %arg1, %c0_i32 : i32, i32
  }
  func.func @transform_1(%arg0: i32, %arg1: i32) -> (i32, i32) {
    %c0_i32 = arith.constant 0 : i32
    %c0_i32_0 = arith.constant 0 : i32
    return %c0_i32, %arg0 : i32, i32
  }
  func.func @transform_2(%arg0: i32, %arg1: i32) -> (i32, i32) {
    %c0_i32 = arith.constant 0 : i32
    return %arg1, %arg0 : i32, i32
  }
}

</mosaic_0001>

<bundles_post_ra>
// kernel: transformer_decoder_forward.17
= control target key start
LH: loop header
LB: loop body
LE: loop exit
PB: predicated region body
PF: predicated region fallthrough
CT: control target
= control target key end

     0   :  { %vm43_vm0 = vcmask 261120   ;;  %vm111_vm1 = vcmask 519168   ;;  %s191_s1 = inlined_call_operand.vmem [shape: bf16[32,64], index: 1, kind: input, shape index: {}]   ;;  %s192_s0 = inlined_call_operand.vmem [shape: f32[24,32], index: 0, kind: input, shape index: {}]   ;;  %s193_s2 = inlined_call_operand.vmem [shape: f32[1,64], index: 2, kind: input, shape index: {}]   ;;  %s194_s3 = inlined_call_operand.vmem [shape: bf16[24,64], index: 3, kind: output, shape index: {}]  }
   0x1   :  { %v142_v0 = vld [vmem:[%s191_s1] sm:$0xff]   ;;  %v143_v1 = vld [vmem:[%s191_s1 + $0x8] sm:$0xff]   ;;  %v17_v4 = vld [vmem:[%s192_s0 + $0x10] sm:$0xff] }
   0x2   :  { %134 = vmatprep.subr.bf16.mxu0 %v142_v0  ;;  %v15_v2 = vld [vmem:[%s192_s0] sm:$0xff]  ;;  %v16_v3 = vld [vmem:[%s192_s0 + $0x8] sm:$0xff]  ;;  %v19_v6 = vpack.c.bf16 %v17_v4, %v17_v4 }
   0x3   :  { %135 = vmatpush3.bf16.msra.mxu0 %v142_v0  ;;  %v18_v5 = vpack.c.bf16 %v16_v3, %v15_v2  ;;  %v119_v7 = vld [vmem:[%s193_s2] ss:$0 sm:$0xff] }
   0x4   :  { %136 = vmatprep.subr.bf16.mxu0 %v143_v1 }
   0x5   :  { %138 = vmatprep.mubr.msk.bf16.mxu0 %vm43_vm0, %v18_v5 }
   0x7   :  { %137 = vmatpush3.bf16.msra.mxu0 %v143_v1 }
   0xa   :  { %139 = vmatmul.mubr.msk.bf16.vlgmr.msra.gmra.mrb[0].mxu0 %vm43_vm0, %v19_v6 }
  0xdd   :  { %v140_v8 = vpop.f32.mrb[0].mxu0 }
  0xde   :  { %v93_v9 = vadd.f32 %v140_v8, %v119_v7  ;;  %v84_v10 = vpop.f32.mrb[1].mxu0 }
  0xdf   :  { %v85_v11 = vadd.f32 %v119_v7, %v84_v10  ;;  %v141_v12 = vpop.f32.mrb[2].mxu0 }
  0xe0   :  { %v129_v13 = vpack.c.bf16 %v93_v9, %v93_v9  ;;  %v87_v14 = vpop.f32.mrb[3].mxu0 }
  0xe1   :  { %v127_v15 = vpack.c.bf16 %v85_v11, %v85_v11  ;;  %v88_v16 = vadd.f32 %v119_v7, %v87_v14 }
  0xe2   :  { %114 = vst.msk [vmem:[%s194_s3 + $0x8] sm:$0xf] %vm111_vm1, %v129_v13 }
  0xe3   :  { %112 = vst.msk [vmem:[%s194_s3] sm:$0xf] %vm111_vm1, %v127_v15  ;;  %v128_v17 = vpack.c.bf16 %v88_v16, %v88_v16 }
  0xe5   :  { %113 = vst.msk [vmem:[%s194_s3 + $0x4] sm:$0xf] %vm111_vm1, %v128_v17 }

// kernel: transformer_decoder_forward.16
= control target key start
LH: loop header
LB: loop body
LE: loop exit
PB: predicated region body
PF: predicated region fallthrough
CT: control target
= control target key end

     0   :  { %vm23_vm0 = vcmask 261120   ;;  %v181_v15 = vmov 0.0   ;;  %vm182_vm1 = vmmov 0   ;;  %vm145_vm2 = vcmask 257024   ;;  %s245_s0 = inlined_call_operand.vmem [shape: f32[16,32], index: 0, kind: input, shape index: {}]   ;;  %s246_s3 = inlined_call_operand.vmem [shape: bf16[32,32], index: 3, kind: input, shape index: {}]   ;;  %s247_s1 = inlined_call_operand.vmem [shape: f32[1,32], index: 1, kind: input, shape index: {}]   ;;  %s248_s2 = inlined_call_operand.vmem [shape: f32[1,32], index: 2, kind: input, shape index: {}]   ;;  %s249_s4 = inlined_call_operand.vmem [shape: f32[1,32], index: 4, kind: input, shape index: {}]   ;;  %s250_s5 = inlined_call_operand.vmem [shape: bf16[16,32], index: 5, kind: output, shape index: {}]  }
   0x1   :  { %v21_v0 = vld [vmem:[%s245_s0] sm:$0xff]  ;;  %v22_v1 = vld [vmem:[%s245_s0 + $0x8] sm:$0xff]  ;;  %165 = vmatprep.subr.bf16.mxu0 %v181_v15  ;;  %169 = vmatprep.mubr.msk.bf16.mxu0 %vm182_vm1, %v181_v15 }
   0x2   :  { %v24_v2 = vsel %vm23_vm0, %v21_v0, 0.0  ;;  %v27_v3 = vsel %vm23_vm0, %v22_v1, 0.0  ;;  %v175_v14 = vld [vmem:[%s246_s3] sm:$0xff]   ;;  %v176_v16 = vld [vmem:[%s246_s3 + $0x8] sm:$0xff]  }
   0x3   :  { %25 = vadd.xlane.f32.xlu0 %v24_v2  ;;  %166 = vmatpush3.bf16.msra.mxu0 %v175_v14  ;;  %v152_v25 = vld [vmem:[%s247_s1] ss:$0 sm:$0xff] }
   0x4   :  { %167 = vmatprep.subr.bf16.mxu0 %v181_v15  ;;  %v153_v29 = vld [vmem:[%s248_s2] ss:$0 sm:$0xff] }
   0x5   :  { %v154_v34 = vld [vmem:[%s249_s4] ss:$0 sm:$0xff] }
   0x7   :  { %28 = vadd.xlane.f32.xlu0 %v27_v3  ;;  %168 = vmatpush3.bf16.msra.mxu0 %v176_v16 }
  0x90   :  { %v26_v4 = vpop.xlane.xlu0 %25 }
  0x91   :  { %v31_v5 = vmul.f32 0.03125, %v26_v4 }
  0x93   :  { %v33_v6 = vsub.f32 %v21_v0, %v31_v5 }
  0x94   :  { %v29_v7 = vpop.xlane.xlu0 %28 }
  0x95   :  { %v32_v8 = vmul.f32 0.03125, %v29_v7  ;;  %v35_v9 = vmul.f32 %v33_v6, %v33_v6 }
  0x97   :  { %v34_v10 = vsub.f32 %v22_v1, %v32_v8  ;;  %v37_v11 = vsel %vm23_vm0, %v35_v9, 0.0 }
  0x98   :  { %38 = vadd.xlane.f32.xlu1 %v37_v11 }
  0x99   :  { %v36_v12 = vmul.f32 %v34_v10, %v34_v10 }
  0x9b   :  { %v40_v13 = vsel %vm23_vm0, %v36_v12, 0.0 }
  0x9c   :  { %41 = vadd.xlane.f32.xlu1 %v40_v13 }
 0x125   :  { %v39_v17 = vpop.xlane.xlu1 %38 }
 0x126   :  { %v43_v18 = vmul.f32 0.03125, %v39_v17 }
 0x128   :  { %v45_v19 = vadd.f32 1e-06, %v43_v18 }
 0x129   :  { %v42_v20 = vpop.xlane.xlu1 %41 }
 0x12a   :  { %177 = vrsqrt.f32 %v45_v19  ;;  %v44_v21 = vmul.f32 0.03125, %v42_v20 }
 0x12c   :  { %v46_v22 = vadd.f32 1e-06, %v44_v21 }
 0x12e   :  { %179 = vrsqrt.f32 %v46_v22 }
 0x134   :  { %v178_v23 = vpop.eup %177 }
 0x135   :  { %v49_v24 = vmul.f32 %v178_v23, %v33_v6 }
 0x137   :  { %v58_v28 = vmul.f32 %v152_v25, %v49_v24 }
 0x138   :  { %v180_v26 = vpop.eup %179 }
 0x139   :  { %v50_v27 = vmul.f32 %v180_v26, %v34_v10  ;;  %v67_v31 = vadd.f32 %v153_v29, %v58_v28 }
 0x13b   :  { %v59_v30 = vmul.f32 %v152_v25, %v50_v27 }
 0x13d   :  { %v68_v32 = vadd.f32 %v153_v29, %v59_v30 }
 0x13f   :  { %v69_v33 = vpack.c.bf16 %v68_v32, %v67_v31 }
 0x141   :  { %170 = vmatmul.mubr.msk.bf16.vlgmr.msra.gmra.mrb[0].mxu0 %vm23_vm0, %v69_v33 }
 0x214   :  { %v130_v35 = vpop.f32.mrb[0].mxu0 }
 0x215   :  { %v131_v36 = vadd.f32 %v154_v34, %v130_v35  ;;  %v171_v37 = vpop.f32.mrb[1].mxu0 }
 0x216   :  { %v133_v38 = vpop.f32.mrb[2].mxu0 }
 0x217   :  { %v160_v39 = vpack.c.bf16 %v131_v36, %v131_v36  ;;  %v134_v40 = vadd.f32 %v154_v34, %v133_v38  ;;  %v172_v41 = vpop.f32.mrb[3].mxu0 }
 0x219   :  { %146 = vst.msk [vmem:[%s250_s5] sm:$0xf] %vm145_vm2, %v160_v39  ;;  %v161_v42 = vpack.c.bf16 %v134_v40, %v134_v40 }
 0x21b   :  { %147 = vst.msk [vmem:[%s250_s5 + $0x4] sm:$0xf] %vm145_vm2, %v161_v42 }

// kernel: transformer_decoder_forward.14
= control target key start
LH: loop header
LB: loop body
LE: loop exit
PB: predicated region body
PF: predicated region fallthrough
CT: control target
= control target key end

     0   :  { %vm31_vm0 = vcmask 261120   ;;  %v289_v15 = vmov 0.0   ;;  %vm290_vm1 = vmmov 0   ;;  %vm153_vm2 = vcmask 257024   ;;  %s384_s0 = inlined_call_operand.vmem [shape: f32[16,32], index: 0, kind: input, shape index: {}]   ;;  %s385_s3 = inlined_call_operand.vmem [shape: bf16[32,32], index: 3, kind: input, shape index: {}]   ;;  %s386_s5 = inlined_call_operand.vmem [shape: bf16[32,64], index: 5, kind: input, shape index: {}]   ;;  %s387_s1 = inlined_call_operand.vmem [shape: f32[1,32], index: 1, kind: input, shape index: {}]   ;;  %s388_s2 = inlined_call_operand.vmem [shape: f32[1,32], index: 2, kind: input, shape index: {}]   ;;  %s389_s4 = inlined_call_operand.vmem [shape: f32[1,32], index: 4, kind: input, shape index: {}]   ;;  %s390_s6 = inlined_call_operand.vmem [shape: f32[1,64], index: 6, kind: input, shape index: {}]   ;;  %s391_s7 = inlined_call_operand.vmem [shape: bf16[16,32], index: 7, kind: output, shape index: {0}]   ;;  %s392_s8 = inlined_call_operand.vmem [shape: bf16[16,64], index: 8, kind: output, shape index: {1}]  }
   0x1   :  { %v29_v0 = vld [vmem:[%s384_s0] sm:$0xff]  ;;  %v30_v1 = vld [vmem:[%s384_s0 + $0x8] sm:$0xff]  ;;  %263 = vmatprep.subr.bf16.mxu0 %v289_v15  ;;  %271 = vmatprep.subr.bf16.mxu1 %v289_v15  ;;  %vm228_vm3 = vcmask 519168  }
   0x2   :  { %v32_v2 = vsel %vm31_vm0, %v29_v0, 0.0  ;;  %v35_v3 = vsel %vm31_vm0, %v30_v1, 0.0  ;;  %v281_v14 = vld [vmem:[%s385_s3] sm:$0xff]   ;;  %v283_v17 = vld [vmem:[%s385_s3 + $0x8] sm:$0xff]   ;;  %267 = vmatprep.mubr.msk.bf16.mxu0 %vm290_vm1, %v289_v15  ;;  %275 = vmatprep.mubr.msk.bf16.mxu1 %vm290_vm1, %v289_v15 }
   0x3   :  { %33 = vadd.xlane.f32.xlu0 %v32_v2  ;;  %v282_v16 = vld [vmem:[%s386_s5] sm:$0xff]   ;;  %264 = vmatpush3.bf16.msra.mxu0 %v281_v14  ;;  %v284_v18 = vld [vmem:[%s386_s5 + $0x8] sm:$0xff]  }
   0x4   :  { %272 = vmatpush3.bf16.msra.mxu1 %v282_v16  ;;  %265 = vmatprep.subr.bf16.mxu0 %v289_v15  ;;  %v239_v27 = vld [vmem:[%s387_s1] ss:$0 sm:$0xff] }
   0x5   :  { %273 = vmatprep.subr.bf16.mxu1 %v289_v15  ;;  %v240_v31 = vld [vmem:[%s388_s2] ss:$0 sm:$0xff] }
   0x6   :  { %v241_v36 = vld [vmem:[%s389_s4] ss:$0 sm:$0xff] }
   0x7   :  { %36 = vadd.xlane.f32.xlu0 %v35_v3  ;;  %266 = vmatpush3.bf16.msra.mxu0 %v283_v17  ;;  %v247_v37 = vld [vmem:[%s390_s6] ss:$0 sm:$0xff] }
   0x8   :  { %274 = vmatpush3.bf16.msra.mxu1 %v284_v18 }
  0x90   :  { %v34_v4 = vpop.xlane.xlu0 %33 }
  0x91   :  { %v39_v5 = vmul.f32 0.03125, %v34_v4 }
  0x93   :  { %v41_v6 = vsub.f32 %v29_v0, %v39_v5 }
  0x94   :  { %v37_v7 = vpop.xlane.xlu0 %36 }
  0x95   :  { %v40_v8 = vmul.f32 0.03125, %v37_v7  ;;  %v43_v9 = vmul.f32 %v41_v6, %v41_v6 }
  0x97   :  { %v42_v10 = vsub.f32 %v30_v1, %v40_v8  ;;  %v45_v11 = vsel %vm31_vm0, %v43_v9, 0.0 }
  0x98   :  { %46 = vadd.xlane.f32.xlu1 %v45_v11 }
  0x99   :  { %v44_v12 = vmul.f32 %v42_v10, %v42_v10 }
  0x9b   :  { %v48_v13 = vsel %vm31_vm0, %v44_v12, 0.0 }
  0x9c   :  { %49 = vadd.xlane.f32.xlu1 %v48_v13 }
 0x125   :  { %v47_v19 = vpop.xlane.xlu1 %46 }
 0x126   :  { %v51_v20 = vmul.f32 0.03125, %v47_v19 }
 0x128   :  { %v53_v21 = vadd.f32 1e-06, %v51_v20 }
 0x129   :  { %v50_v22 = vpop.xlane.xlu1 %49 }
 0x12a   :  { %285 = vrsqrt.f32 %v53_v21  ;;  %v52_v23 = vmul.f32 0.03125, %v50_v22 }
 0x12c   :  { %v54_v24 = vadd.f32 1e-06, %v52_v23 }
 0x12e   :  { %287 = vrsqrt.f32 %v54_v24 }
 0x134   :  { %v286_v25 = vpop.eup %285 }
 0x135   :  { %v57_v26 = vmul.f32 %v286_v25, %v41_v6 }
 0x137   :  { %v66_v30 = vmul.f32 %v239_v27, %v57_v26 }
 0x138   :  { %v288_v28 = vpop.eup %287 }
 0x139   :  { %v58_v29 = vmul.f32 %v288_v28, %v42_v10  ;;  %v75_v33 = vadd.f32 %v240_v31, %v66_v30 }
 0x13b   :  { %v67_v32 = vmul.f32 %v239_v27, %v58_v29 }
 0x13d   :  { %v76_v34 = vadd.f32 %v240_v31, %v67_v32 }
 0x13f   :  { %v77_v35 = vpack.c.bf16 %v76_v34, %v75_v33 }
 0x141   :  { %268 = vmatmul.mubr.msk.bf16.vlgmr.msra.gmra.mrb[0].mxu0 %vm31_vm0, %v77_v35  ;;  %276 = vmatmul.mubr.msk.bf16.vlgmr.msra.gmra.mrb[0].mxu1 %vm31_vm0, %v77_v35 }
 0x214   :  { %v138_v38 = vpop.f32.mrb[0].mxu0  ;;  %v213_v39 = vpop.f32.mrb[0].mxu1 }
 0x215   :  { %v139_v40 = vadd.f32 %v241_v36, %v138_v38  ;;  %v214_v41 = vadd.f32 %v247_v37, %v213_v39  ;;  %v269_v42 = vpop.f32.mrb[1].mxu0  ;;  %v277_v43 = vpop.f32.mrb[1].mxu1 }
 0x216   :  { %v141_v44 = vpop.f32.mrb[2].mxu0  ;;  %v216_v45 = vpop.f32.mrb[2].mxu1 }
 0x217   :  { %v253_v46 = vpack.c.bf16 %v139_v40, %v139_v40  ;;  %v255_v47 = vpack.c.bf16 %v214_v41, %v214_v41  ;;  %v142_v48 = vadd.f32 %v241_v36, %v141_v44  ;;  %v217_v49 = vadd.f32 %v247_v37, %v216_v45  ;;  %v270_v50 = vpop.f32.mrb[3].mxu0  ;;  %v278_v51 = vpop.f32.mrb[3].mxu1 }
 0x219   :  { %154 = vst.msk [vmem:[%s391_s7] sm:$0xf] %vm153_vm2, %v253_v46  ;;  %v254_v52 = vpack.c.bf16 %v142_v48, %v142_v48  ;;  %v256_v53 = vpack.c.bf16 %v217_v49, %v217_v49 }
 0x21a   :  { %229 = vst.msk [vmem:[%s392_s8] sm:$0xf] %vm228_vm3, %v255_v47 }
 0x21b   :  { %155 = vst.msk [vmem:[%s391_s7 + $0x4] sm:$0xf] %vm153_vm2, %v254_v52 }
 0x21c   :  { %230 = vst.msk [vmem:[%s392_s8 + $0x4] sm:$0xf] %vm228_vm3, %v256_v53 }

// kernel: transformer_decoder_forward.15
= control target key start
LH: loop header
LB: loop body
LE: loop exit
PB: predicated region body
PF: predicated region fallthrough
CT: control target
= control target key end

     0   :  { %s1379_s21 = smov 0   ;;  %s1381_s22 = smov 0   ;;  %s1524_s0 = inlined_call_operand.vmem [shape: bf16[2,8,32], index: 0, kind: input, shape index: {}]   ;;  %s1525_s1 = inlined_call_operand.vmem [shape: bf16[2,8,64], index: 1, kind: input, shape index: {}]   ;;  %s1526_s2 = inlined_call_operand.vmem [shape: f32[2,1,8], index: 2, kind: input, shape index: {}]   ;;  %s1527_s3 = inlined_call_operand.vmem [shape: f32[32,32], index: 3, kind: input, shape index: {}]   ;;  %s1528_s4 = inlined_call_operand.vmem [shape: f32[1,32], index: 4, kind: input, shape index: {}]   ;;  %s1529_s5 = inlined_call_operand.vmem [shape: f32[2,8,32], index: 5, kind: input, shape index: {}]   ;;  %s1530_s6 = inlined_call_operand.vmem [shape: f32[2,8,32], index: 6, kind: output, shape index: {}]  }
   0x1   :  { %s1383_s23 = smov 0  }
   0x2 LB: > { %s28_s24 = sadd.s32 1, %s1328_s22  ;;  %p1126_p0 = scmp.ge.s32.totalorder %s1332_s23, 1  ;;  %s1332_s23 = sphi %s1383_s23, %s16_s23   ;;  %s1328_s22 = sphi %s1381_s22, %s1532_s22   ;;  %s1324_s21 = sphi %s1379_s21, %s1531_s21  }
   0x3   : > { %p30_p1 = scmp.ge.s32.totalorder %s28_s24, 2  ;;  %p261_p2 = scmp.lt.s32.totalorder %s1332_s23, 3 }
   0x5   : > { %s1534_s24 = smov (%p30_p1, %s28_s24), 0  ;;  %p262_p3 = pnand %p1126_p0, %p261_p2 }
   0x6   : > { %p309_p4 = scmp.lt.s32.totalorder (!%p262_p3), %s1324_s21, 1  ;;  %v1334_v0 = vmov (!%p262_p3), 0.0   ;;  %vm1335_vm0 = vmmov (!%p262_p3), 0   ;;  %vm366_vm1 = vcmask (!%p262_p3), 64512   ;;  %v339_v4 = vlaneseq (!%p262_p3)  ;;  %s1337_s11 = smov (!%p262_p3), 96   ;;  %v478_v36 = vld [vmem:[%s1527_s3] sm:$0xff] (!%p262_p3) }
   0x7   : > { %265 = sbr.rel (%p262_p3) target bundleno = 2069 (0x815), region = 44  ;;  %1173 = vmatprep.subr.bf16.mxu0 (!%p262_p3), %v1334_v0  ;;  %1175 = vmatprep.mubr.msk.bf16.mxu0 (!%p262_p3), %vm1335_vm0, %v1334_v0  ;;  %v1336_v8 = vmov (!%p262_p3), -1e+30   ;;  %s1338_s12 = smov (!%p262_p3), 120   ;;  %vm433_vm3 = vcmask (!%p262_p3), 1043456   ;;  %v479_v37 = vpack.c.bf16 (!%p262_p3), %v478_v36, %v478_v36  ;;  %vm1010_vm4 = vcmask (!%p262_p3), 261120  }
   0x8   : > { %1185 = vmatprep.subr.bf16.mxu1 (!%p262_p3), %v1334_v0  ;;  %1187 = vmatprep.mubr.msk.bf16.mxu1 (!%p262_p3), %vm1335_vm0, %v1334_v0  ;;  %v340_v5 = vshrl.u32 (!%p262_p3), %v339_v4, 7  ;;  %v345_v6 = vand.u32 (!%p262_p3), 127, %v339_v4  ;;  %s1339_s13 = smov (!%p262_p3), 112   ;;  %s1340_s16 = smov (!%p262_p3), 80  }
   0x9   : > { %v484_v38 = vsel (!%p262_p3), %vm433_vm3, %v479_v37, 0  ;;  %s1341_s17 = smov (!%p262_p3), 104   ;;  %s1342_s18 = smov (!%p262_p3), 88  }
   0xa   : > { %vm346_vm2 = vcmp.ge.s32.totalorder (!%p262_p3), %v340_v5, %v345_v6  ;;  %1186 = vmatpush3.bf16.msra.mxu1 (!%p262_p3), %v484_v38  ;;  %s1343_s27 = smov (!%p262_p3), 72  }
   0xb   : > { %v347_v9 = vsel (!%p262_p3), %vm346_vm2, 0.0, %v1336_v8  ;;  %1197 = vmatprep.subr.bf16.mxu1 (!%p262_p3), %v1334_v0 }
   0xe   : > { %s1536_s21 = smov (!%p309_p4, %s1324_s21), 1 }
   0xf   : > { %s1127_s25 = sshll.u32 %s1536_s21, 2  ;;  %s322_s10 = scalar_lea.vmem %s1526_s2, %s1536_s21 }
  0x10   : > { %s319_s28 = scalar_lea.vmem %s1525_s1, %s1127_s25  ;;  %s315_s7 = scalar_lea.vmem %s1524_s0, %s1127_s25  ;;  %v1131_v7 = vld [vmem:[%s322_s10] ss:$0 sm:$0xff] }
  0x11   : > { %v365_v1 = vld [vmem:[%s319_s28] sm:$0xf]  ;;  %v1421_v10 = vadd.f32 %v1131_v7, %v347_v9  ;;  %s1129_s30 = sshll.u32 %s1536_s21, 3 }
  0x12   : > { %v371_v2 = vsel %vm366_vm1, %v365_v1, 0  ;;  %v364_v3 = vld [vmem:[%s315_s7] sm:$0xf]  ;;  %v1425_v17 = vcombine.low %v365_v1, %v365_v1  ;;  %s329_s9 = scalar_lea.vmem %s1529_s5, %s1129_s30  ;;  %s336_s14 = scalar_lea.vmem %s1530_s6, %s1129_s30 }
  0x13   : > { %1174 = vmatpush3.bf16.xpose.msra.mxu0 %v371_v2  ;;  %v1137_v18 = vcombine.low %v364_v3, %v364_v3 }
  0x14   : > { %1179 = vmatprep.subr.bf16.mxu0 %v1334_v0  ;;  %428 = vrot.lane.b32.xlu1 %v1425_v17, %s1337_s11 }
  0x18   : > { %532 = vrot.lane.b32.xlu1 %v1425_v17, %s1338_s12 }
  0x1a   : > { %1176 = vmatmul.mubr.msk.bf16.vlgmr.msra.gmra.mrb[0].mxu0 %vm366_vm1, %v364_v3 }
  0x1b   : > { %1181 = vmatprep.mubr.msk.bf16.mxu0 %vm1335_vm0, %v1334_v0 }
  0x1c   : > { %692 = vrot.lane.b32.xlu1 %v1425_v17, %s1339_s13 }
  0x20   : > { %690 = vrot.lane.b32.xlu1 %v1137_v18, %s1339_s13 }
  0x86   : > { %v429_v24 = vpop.permute.xlu1 %428 }
  0x87   : > { %v435_v25 = vsel %vm433_vm3, %v429_v24, 0 }
  0x88   : > { %1180 = vmatpush3.bf16.msra.mxu0 %v435_v25 }
  0x89   : > { %1191 = vmatprep.subr.bf16.mxu0 %v1334_v0 }
  0x8a   : > { %v533_v28 = vpop.permute.xlu1 %532 }
  0x8b   : > { %v538_v30 = vsel %vm366_vm1, %v533_v28, 0 }
  0x8e   : > { %v693_v32 = vpop.permute.xlu1 %692 }
  0x8f   : > { %v698_v34 = vsel %vm366_vm1, %v693_v32, 0 }
  0x92   : > { %v691_v35 = vpop.permute.xlu1 %690 }
  0xed   : > { %v407_v11 = vpop.f32.mrb[0].mxu0 }
  0xee   : > { %v408_v12 = vadd.f32 %v407_v11, %v1421_v10  ;;  %v1177_v13 = vpop.f32.mrb[1].mxu0 }
  0xef   : > { %v410_v14 = vpop.f32.mrb[2].mxu0 }
  0xf0   : > { %v1178_v15 = vpop.f32.mrb[3].mxu0  ;;  %v413_v16 = vsel %vm366_vm1, %v408_v12, -inf }
  0xf1   : > { %414 = vmax.xlane.f32.xlu0 %v413_v16 }
 0x17e   : > { %v415_v19 = vpop.xlane.xlu0 %414 }
 0x17f   : > { %v416_v20 = vsub.f32 %v408_v12, %v415_v19 }
 0x181   : > { %v417_v21 = vmul.f32 1.442695, %v416_v20  ;;  %v641_v20 = vld [vmem:[%s1527_s3 + $0x8] sm:$0xff] }
 0x183   : > { %1294 = vpow2.f32 %v417_v21  ;;  %v642_v21 = vpack.c.bf16 %v641_v20, %v641_v20 }
 0x18d   : > { %v1295_v22 = vpop.eup %1294 }
 0x18e   : > { %v419_v23 = vsel %vm366_vm1, %v1295_v22, 0.0 }
 0x18f   : > { %420 = vadd.xlane.f32.xlu0 %v419_v23 }
 0x1a5   : > { %530 = vrot.lane.b32.xlu0 %v1137_v18, %s1338_s12 }
 0x21c   : > { %v421_v26 = vpop.xlane.xlu0 %420 }
 0x21d   : > { %1296 = vrcp.f32 %v421_v26 }
 0x220   : > { %v531_v33 = vpop.permute.xlu0 %530 }
 0x227   : > { %v1297_v27 = vpop.eup %1296 }
 0x228   : > { %v423_v29 = vmul.f32 %v1297_v27, %v1295_v22  ;;  %v647_v22 = vsel %vm433_vm3, %v642_v21, 0 }
 0x22a   : > { %v424_v31 = vpack.c.bf16 %v423_v29, %v423_v29 }
 0x22c   : > { %1182 = vmatmul.mubr.msk.bf16.vlgmr.msra.gmra.mrb[4].mxu0 %vm366_vm1, %v424_v31 }
 0x22d   : > { %1192 = vmatpush3.bf16.xpose.msra.mxu0 %v538_v30  ;;  %1193 = vmatprep.mubr.msk.bf16.mxu0 %vm1335_vm0, %v1334_v0 }
 0x22e   : > { %1209 = vmatprep.subr.bf16.mxu0 %v1334_v0 }
 0x234   : > { %1194 = vmatmul.mubr.msk.bf16.vlgmr.msra.gmra.mrb[8].mxu0 %vm366_vm1, %v531_v33  ;;  %v801_v33 = vld [vmem:[%s1527_s3 + $0x10] sm:$0xff] }
 0x235   : > { %1210 = vmatpush3.bf16.xpose.msra.mxu0 %v698_v34  ;;  %1211 = vmatprep.mubr.msk.bf16.mxu0 %vm1335_vm0, %v1334_v0  ;;  %v802_v34 = vpack.c.bf16 %v801_v33, %v801_v33 }
 0x236   : > { %1215 = vmatprep.subr.bf16.mxu0 %v1334_v0 }
 0x237   : > { %v807_v38 = vsel %vm433_vm3, %v802_v34, 0 }
 0x23c   : > { %1212 = vmatmul.mubr.msk.bf16.vlgmr.msra.gmra.mrb[12].mxu0 %vm366_vm1, %v691_v35 }
 0x23d   : > { %1217 = vmatprep.mubr.msk.bf16.mxu0 %vm1335_vm0, %v1334_v0 }
 0x2ff   : > { %v471_v39 = vpop.f32.mrb[4].mxu0 }
 0x300   : > { %v477_v40 = vpack.c.bf16 %v471_v39, %v471_v39  ;;  %v1183_v41 = vpop.f32.mrb[5].mxu0 }
 0x301   : > { %v474_v42 = vpop.f32.mrb[6].mxu0 }
 0x302   : > { %v1184_v43 = vpop.f32.mrb[7].mxu0  ;;  %1188 = vmatmul.mubr.msk.bf16.vlgmr.msra.gmra.mrb[0].mxu1 %vm366_vm1, %v477_v40 }
 0x303   : > { %1199 = vmatprep.mubr.msk.bf16.mxu1 %vm1335_vm0, %v1334_v0 }
 0x307   : > { %v574_v44 = vpop.f32.mrb[8].mxu0 }
 0x308   : > { %v1195_v45 = vpop.f32.mrb[9].mxu0  ;;  %v575_v54 = vadd.f32 %v574_v44, %v1421_v10 }
 0x309   : > { %v577_v46 = vpop.f32.mrb[10].mxu0 }
 0x30a   : > { %v1196_v47 = vpop.f32.mrb[11].mxu0  ;;  %v580_v55 = vsel %vm366_vm1, %v575_v54, -inf }
 0x30f   : > { %v734_v48 = vpop.f32.mrb[12].mxu0 }
 0x310   : > { %v735_v49 = vadd.f32 %v734_v48, %v1421_v10  ;;  %v1213_v50 = vpop.f32.mrb[13].mxu0 }
 0x311   : > { %v737_v51 = vpop.f32.mrb[14].mxu0 }
 0x312   : > { %v1214_v52 = vpop.f32.mrb[15].mxu0  ;;  %v740_v53 = vsel %vm366_vm1, %v735_v49, -inf }
 0x313   : > { %741 = vmax.xlane.f32.xlu1 %v740_v53 }
 0x324   : > { %752 = vrot.lane.b32.xlu1 %v1425_v17, %s1340_s16 }
 0x328   : > { %850 = vrot.lane.b32.xlu1 %v1137_v18, %s1341_s17 }
 0x34c   : > { %581 = vmax.xlane.f32.xlu1 %v580_v55 }
 0x35d   : > { %592 = vrot.lane.b32.xlu1 %v1425_v17, %s1342_s18 }
 0x3a0   : > { %v742_v56 = vpop.xlane.xlu1 %741 }
 0x3a1   : > { %v743_v57 = vsub.f32 %v735_v49, %v742_v56  ;;  %v961_v49 = vld [vmem:[%s1527_s3 + $0x18] sm:$0xff] }
 0x3a2   : > { %v962_v50 = vpack.c.bf16 %v961_v49, %v961_v49 }
 0x3a3   : > { %v744_v58 = vmul.f32 1.442695, %v743_v57 }
 0x3a4   : > { %v753_v59 = vpop.permute.xlu1 %752 }
 0x3a5   : > { %1298 = vpow2.f32 %v744_v58  ;;  %v758_v60 = vsel %vm433_vm3, %v753_v59, 0  ;;  %v355_v59 = vld [vmem:[%s329_s9] sm:$0xff] }
 0x3a6   : > { %1216 = vmatpush3.bf16.msra.mxu0 %v758_v60  ;;  %v1132_v60 = vld [vmem:[%s1528_s4] ss:$0 sm:$0xff] }
 0x3a7   : > { %1227 = vmatprep.subr.bf16.mxu0 %v1334_v0 }
 0x3a8   : > { %v851_v63 = vpop.permute.xlu1 %850 }
 0x3af   : > { %v1299_v61 = vpop.eup %1298 }
 0x3b0   : > { %v746_v62 = vsel %vm366_vm1, %v1299_v61, 0.0 }
 0x3b1   : > { %747 = vadd.xlane.f32.xlu0 %v746_v62 }
 0x3c7   : > { %852 = vrot.lane.b32.xlu0 %v1425_v17, %s1341_s17 }
 0x3d9   : > { %v582_v1 = vpop.xlane.xlu1 %581 }
 0x3da   : > { %v583_v2 = vsub.f32 %v575_v54, %v582_v1  ;;  %v967_v54 = vsel %vm433_vm3, %v962_v50, 0 }
 0x3dc   : > { %v584_v3 = vmul.f32 1.442695, %v583_v2 }
 0x3dd   : > { %v593_v6 = vpop.permute.xlu1 %592 }
 0x3de   : > { %1300 = vpow2.f32 %v584_v3  ;;  %v598_v7 = vsel %vm433_vm3, %v593_v6, 0 }
 0x3df   : > { %1198 = vmatpush3.bf16.msra.mxu1 %v598_v7 }
 0x3e0   : > { %1203 = vmatprep.subr.bf16.mxu1 %v1334_v0 }
 0x3e8   : > { %v1301_v4 = vpop.eup %1300 }
 0x3e9   : > { %v586_v5 = vsel %vm366_vm1, %v1301_v4, 0.0 }
 0x3ea   : > { %587 = vadd.xlane.f32.xlu0 %v586_v5 }
 0x43e   : > { %v748_v8 = vpop.xlane.xlu0 %747 }
 0x43f   : > { %1302 = vrcp.f32 %v748_v8 }
 0x442   : > { %v853_v11 = vpop.permute.xlu0 %852 }
 0x443   : > { %v858_v13 = vsel %vm366_vm1, %v853_v11, 0 }
 0x449   : > { %v1303_v9 = vpop.eup %1302 }
 0x44a   : > { %v750_v12 = vmul.f32 %v1303_v9, %v1299_v61  ;;  %v363_v61 = vadd.f32 %v1132_v60, %v355_v59 }
 0x44c   : > { %v751_v14 = vpack.c.bf16 %v750_v12, %v750_v12 }
 0x44e   : > { %1218 = vmatmul.mubr.msk.bf16.vlgmr.msra.gmra.mrb[16].mxu0 %vm366_vm1, %v751_v14 }
 0x44f   : > { %1228 = vmatpush3.bf16.xpose.msra.mxu0 %v858_v13  ;;  %1229 = vmatprep.mubr.msk.bf16.mxu0 %vm1335_vm0, %v1334_v0 }
 0x456   : > { %1230 = vmatmul.mubr.msk.bf16.vlgmr.msra.gmra.mrb[20].mxu0 %vm366_vm1, %v851_v63 }
 0x477   : > { %v588_v15 = vpop.xlane.xlu0 %587 }
 0x478   : > { %1304 = vrcp.f32 %v588_v15 }
 0x482   : > { %v1305_v16 = vpop.eup %1304 }
 0x483   : > { %v590_v18 = vmul.f32 %v1305_v16, %v1301_v4 }
 0x485   : > { %v591_v19 = vpack.c.bf16 %v590_v18, %v590_v18 }
 0x487   : > { %1200 = vmatmul.mubr.msk.bf16.vlgmr.msra.gmra.mrb[4].mxu1 %vm366_vm1, %v591_v19 }
 0x488   : > { %1205 = vmatprep.mubr.msk.bf16.mxu1 %vm1335_vm0, %v1334_v0  ;;  %1204 = vmatpush3.bf16.msra.mxu1 %v647_v22 }
 0x489   : > { %1221 = vmatprep.subr.bf16.mxu1 %v1334_v0 }
 0x521   : > { %v794_v23 = vpop.f32.mrb[16].mxu0 }
 0x522   : > { %v1219_v24 = vpop.f32.mrb[17].mxu0 }
 0x523   : > { %v797_v25 = vpop.f32.mrb[18].mxu0 }
 0x524   : > { %v1220_v26 = vpop.f32.mrb[19].mxu0 }
 0x529   : > { %v894_v27 = vpop.f32.mrb[20].mxu0 }
 0x52a   : > { %v895_v28 = vadd.f32 %v894_v27, %v1421_v10  ;;  %v1231_v29 = vpop.f32.mrb[21].mxu0  ;;  %v800_v10 = vpack.c.bf16 %v794_v23, %v794_v23 }
 0x52b   : > { %v897_v30 = vpop.f32.mrb[22].mxu0 }
 0x52c   : > { %v1232_v31 = vpop.f32.mrb[23].mxu0  ;;  %v900_v32 = vsel %vm366_vm1, %v895_v28, -inf }
 0x52d   : > { %901 = vmax.xlane.f32.xlu0 %v900_v32 }
 0x55a   : > { %v634_v35 = vpop.f32.mrb[4].mxu1 }
 0x55b   : > { %v640_v36 = vpack.c.bf16 %v634_v35, %v634_v35  ;;  %v1201_v37 = vpop.f32.mrb[5].mxu1 }
 0x55c   : > { %v637_v39 = vpop.f32.mrb[6].mxu1 }
 0x55d   : > { %v1202_v40 = vpop.f32.mrb[7].mxu1  ;;  %1206 = vmatmul.mubr.msk.bf16.vlgmr.msra.gmra.mrb[0].mxu1 %vm366_vm1, %v640_v36 }
 0x55e   : > { %1222 = vmatpush3.bf16.msra.mxu1 %v807_v38  ;;  %1223 = vmatprep.mubr.msk.bf16.mxu1 %vm1335_vm0, %v1334_v0 }
 0x55f   : > { %1233 = vmatprep.subr.bf16.mxu1 %v1334_v0 }
 0x569   : > { %1224 = vmatmul.mubr.msk.bf16.vlgmr.msra.gmra.mrb[0].mxu1 %vm366_vm1, %v800_v10 }
 0x56a   : > { %1235 = vmatprep.mubr.msk.bf16.mxu1 %vm1335_vm0, %v1334_v0 }
 0x5ba   : > { %v902_v41 = vpop.xlane.xlu0 %901 }
 0x5bb   : > { %v903_v42 = vsub.f32 %v895_v28, %v902_v41 }
 0x5bd   : > { %v904_v43 = vmul.f32 1.442695, %v903_v42 }
 0x5bf   : > { %1306 = vpow2.f32 %v904_v43 }
 0x5c9   : > { %v1307_v44 = vpop.eup %1306 }
 0x5ca   : > { %v906_v45 = vsel %vm366_vm1, %v1307_v44, 0.0 }
 0x5cb   : > { %907 = vadd.xlane.f32.xlu0 %v906_v45 }
 0x5e1   : > { %912 = vrot.lane.b32.xlu0 %v1425_v17, %s1343_s27 }
 0x658   : > { %v908_v46 = vpop.xlane.xlu0 %907 }
 0x659   : > { %1308 = vrcp.f32 %v908_v46 }
 0x65c   : > { %v913_v47 = vpop.permute.xlu0 %912 }
 0x65d   : > { %v918_v48 = vsel %vm433_vm3, %v913_v47, 0 }
 0x65e   : > { %1234 = vmatpush3.bf16.msra.mxu1 %v918_v48 }
 0x65f   : > { %1239 = vmatprep.subr.bf16.mxu1 %v1334_v0 }
 0x663   : > { %v1309_v51 = vpop.eup %1308 }
 0x664   : > { %v910_v52 = vmul.f32 %v1309_v51, %v1307_v44 }
 0x666   : > { %v911_v53 = vpack.c.bf16 %v910_v52, %v910_v52 }
 0x668   : > { %1236 = vmatmul.mubr.msk.bf16.vlgmr.msra.gmra.mrb[8].mxu1 %vm366_vm1, %v911_v53 }
 0x669   : > { %1240 = vmatpush3.bf16.msra.mxu1 %v967_v54  ;;  %1241 = vmatprep.mubr.msk.bf16.mxu1 %vm1335_vm0, %v1334_v0 }
 0x73b   : > { %v954_v17 = vpop.f32.mrb[8].mxu1 }
 0x73c   : > { %v960_v55 = vpack.c.bf16 %v954_v17, %v954_v17  ;;  %v1237_v56 = vpop.f32.mrb[9].mxu1 }
 0x73d   : > { %v957_v57 = vpop.f32.mrb[10].mxu1 }
 0x73e   : > { %v1238_v58 = vpop.f32.mrb[11].mxu1  ;;  %1242 = vmatmul.mubr.msk.bf16.vlgmr.msra.gmra.mrb[0].mxu1 %vm366_vm1, %v960_v55 }
 0x811   : > { %v1003_v0 = vpop.f32.mrb[0].mxu1 }
 0x812   : > { %v1245_v62 = vadd.f32 %v1003_v0, %v363_v61  ;;  %v1243_v63 = vpop.f32.mrb[1].mxu1 }
 0x813   : > { %v1006_v1 = vpop.f32.mrb[2].mxu1 }
 0x814   : > { %1011 = vst.msk [vmem:[%s336_s14] sm:$0xff] %vm1010_vm4, %v1245_v62  ;;  %v1244_v2 = vpop.f32.mrb[3].mxu1 }
 0x815 PF: > { %s16_s23 = sadd.s32 1, %s1332_s23   ;;  %s1531_s21 = smov %s1328_s22 }
 0x816   : > { %p13_p5 = scmp.ge.s32.totalorder %s16_s23, 4   ;;  %s1532_s22 = smov %s1534_s24 }
 0x818   :  { %15 = sbr.rel (!%p13_p5) target bundleno = 2 (0x2), region = 83 }

// kernel: transformer_decoder_forward.19
= control target key start
LH: loop header
LB: loop body
LE: loop exit
PB: predicated region body
PF: predicated region fallthrough
CT: control target
= control target key end

     0   :  { %14 = vsyncpa [#allocation3], 0  ;;  %s894_s30 = smov 0   ;;  %s896_s10 = smov 0   ;;  %s1001_s0 = inlined_call_operand.vmem [shape: f32[2,2], index: 0, kind: input, shape index: {}]   ;;  %s1002_s1 = inlined_call_operand.vmem [shape: f32[2,8,32], index: 1, kind: input, shape index: {}]   ;;  %s1003_s2 = inlined_call_operand.vmem [shape: f32[2,8,32], index: 2, kind: input, shape index: {}]   ;;  %s1004_s3 = inlined_call_operand.vmem [shape: f32[1,32], index: 3, kind: input, shape index: {}]   ;;  %s1005_s4 = inlined_call_operand.vmem [shape: f32[1,32], index: 4, kind: input, shape index: {}]   ;;  %s1006_s5 = inlined_call_operand.vmem [shape: bf16[32,64], index: 5, kind: input, shape index: {}]   ;;  %s1007_s6 = inlined_call_operand.vmem [shape: f32[1,64], index: 6, kind: input, shape index: {}]   ;;  %s1008_s7 = inlined_call_operand.vmem [shape: bf16[64,32], index: 7, kind: input, shape index: {}]   ;;  %s1009_s8 = inlined_call_operand.vmem [shape: f32[1,32], index: 8, kind: input, shape index: {}]   ;;  %s1010_s9 = inlined_call_operand.vmem [shape: f32[2,8,32], index: 9, kind: output, shape index: {}]  }
   0x1   :  { %s898_s11 = smov 0  }
   0x2 LB: > { %s700_s12 = sadd.s32 4294967295, %s839_s11   ;;  %s32_s13 = sadd.s32 1, %s835_s10  ;;  %s839_s11 = sphi %s898_s11, %s20_s11   ;;  %s835_s10 = sphi %s896_s10, %s1014_s10   ;;  %s831_s30 = sphi %s894_s30, %s1013_s30  }
   0x3   : > { %p34_p0 = scmp.ge.s32.totalorder %s32_s13, 2  ;;  %p702_p1 = scmp.ge.s32.totalorder %s839_s11, 1 }
   0x4   : > { %p268_p2 = scmp.lt.s32.totalorder %s839_s11, 3  ;;  %p919_p4 = scmp.eq.s32.totalorder %s700_s12, 0 }
   0x5   : > { %s1016_s13 = smov (%p34_p0, %s32_s13), 0  ;;  %s281_s18 = sshll.u32 %s1001_s0, 4  ;;  %s282_s18 = int_to_ptr.vmem [resolvable:$true] %s281_s18 }
   0x6   : > { %p915_p3 = pnand %p702_p1, %p268_p2  ;;  %s798_s19 = scalar_lea.vmem %s282_s18, 32 }
   0x7   : > { %p799_p7 = scmp.ne.s32.totalorder %s282_s18, %s798_s19  ;;  %p806_p11 = scmp.lt.s32.totalorder %s282_s18, %s282_s18 }
   0x8   : > { %p757_p5 = pneg %p915_p3  ;;  %p807_p12 = scmp.lt.s32.totalorder %s798_s19, %s798_s19 }
   0xa   : > { %p758_p6 = pnand %p919_p4, %p757_p5  ;;  %p808_p13 = por %p807_p12, %p806_p11 }
   0xc   : > { %p800_p8 = pneg %p758_p6 }
   0xe   : > { %p801_p9 = pnand %p800_p8, %p799_p7 }
  0x10   : > { %p802_p10 = pneg %p801_p9 }
  0x12   : > { %p809_p0 = pnand %p808_p13, %p802_p10 }
  0x14   : > { %812 = shalt.err (!%p809_p0)
}
  0x15   : > { %s841_s20 = smov [#allocation2]   ;;  %332 = sbr.rel (%p915_p3) target bundleno = 792 (0x318), region = 56 }
  0x16   : > { %760 = dma.vmem_to_smem (!%p758_p6), %s282_s18, 32, %s841_s20, [#allocation3]  }
  0x1c   : > { %826 = dma.done.wait (%p919_p4), [#allocation3], 32  }
  0x1d   : > { %828 = vsyncadd (%p919_p4), [#allocation3], 4294967264 }
  0x1e   : > { %338 = sfence }
  0x1f   : > { %p380_p1 = scmp.lt.s32.totalorder %s831_s30, 1  ;;  %vm407_vm0 = vcmask 261120   ;;  %v790_v7 = vld [vmem:[%s1006_s5] sm:$0xff]   ;;  %v842_v8 = vmov 0.0   ;;  %v791_v9 = vld [vmem:[%s1006_s5 + $0x8] sm:$0xff]   ;;  %vm843_vm1 = vmmov 0  }
  0x20   : > { %733 = vmatprep.subr.bf16.mxu0 %v842_v8  ;;  %741 = vmatprep.subr.bf16.mxu1 %v842_v8  ;;  %v792_v10 = vld [vmem:[%s1008_s7] sm:$0xff]   ;;  %v793_v11 = vld [vmem:[%s1008_s7 + $0x8] sm:$0xff]   ;;  %v794_v22 = vld [vmem:[%s1008_s7 + $0x10] sm:$0xff]   ;;  %vm546_vm2 = vcmask 523264   ;;  %s710_s28 = sshll.u32 %s831_s30, 7 }
  0x21   : > { %s381_s21 = scalar_select %p380_p1, %s831_s30, 1  ;;  %734 = vmatpush3.bf16.msra.mxu0 %v790_v7  ;;  %737 = vmatprep.mubr.msk.bf16.mxu0 %vm843_vm1, %v842_v8  ;;  %v711_v16 = vld [vmem:[%s1004_s3] ss:$0 sm:$0xff]  ;;  %v795_v23 = vld [vmem:[%s1008_s7 + $0x18] sm:$0xff]  }
  0x22   : > { %735 = vmatprep.subr.bf16.mxu0 %v842_v8  ;;  %749 = vmatprep.mubr.msk.bf16.mxu1 %vm843_vm1, %v842_v8  ;;  %v712_v18 = vld [vmem:[%s1005_s4] ss:$0 sm:$0xff]  ;;  %s404_s29 = sadd.s32 1, %s710_s28  ;;  %s403_s14 = sld [smem:[#allocation2 + %s710_s28]] }
  0x23   : > { %s938_s22 = sshll.u32 %s381_s21, 3  ;;  %742 = vmatpush3.bf16.msra.mxu1 %v792_v10  ;;  %v713_v24 = vld [vmem:[%s1007_s6] ss:$0 sm:$0xff]  ;;  %s405_s12 = sld [smem:[#allocation2 + %s404_s29]] }
  0x24   : > { %s386_s25 = scalar_lea.vmem %s1002_s1, %s938_s22  ;;  %743 = vmatprep.subr.bf16.mxu1 %v842_v8  ;;  %s393_s17 = scalar_lea.vmem %s1003_s2, %s938_s22  ;;  %v717_v32 = vld [vmem:[%s1009_s8] ss:$0 sm:$0xff] }
  0x25   : > { %v944_v0 = vld [vmem:[%s386_s25] sm:$0xff]  ;;  %736 = vmatpush3.bf16.msra.mxu0 %v791_v9  ;;  %s400_s21 = scalar_lea.vmem %s1010_s9, %s938_s22 }
  0x26   : > { %v408_v1 = vsel %vm407_vm0, %v944_v0, 0.0  ;;  %v591_v33 = vld [vmem:[%s393_s17] sm:$0xff] }
  0x27   : > { %409 = vadd.xlane.f32.xlu0 %v408_v1  ;;  %744 = vmatpush3.bf16.msra.mxu1 %v793_v11 }
  0x28   : > { %745 = vmatprep.subr.bf16.mxu1 %v842_v8  ;;  %v594_v38 = vstv %s403_s14 }
  0x29   : > { %v592_v34 = vstv %s405_s12 }
  0x2a   : > { %v593_v40 = vmul.f32 %v592_v34, %v591_v33 }
  0x2b   : > { %746 = vmatpush3.bf16.msra.mxu1 %v794_v22 }
  0x2c   : > { %747 = vmatprep.subr.bf16.mxu1 %v842_v8 }
  0x2f   : > { %748 = vmatpush3.bf16.msra.mxu1 %v795_v23 }
  0xb4   : > { %v410_v2 = vpop.xlane.xlu0 %409 }
  0xb5   : > { %v412_v3 = vmul.f32 0.03125, %v410_v2 }
  0xb7   : > { %v413_v4 = vsub.f32 %v944_v0, %v412_v3 }
  0xb9   : > { %v414_v5 = vmul.f32 %v413_v4, %v413_v4 }
  0xbb   : > { %v415_v6 = vsel %vm407_vm0, %v414_v5, 0.0 }
  0xbc   : > { %416 = vadd.xlane.f32.xlu0 %v415_v6 }
 0x149   : > { %v417_v12 = vpop.xlane.xlu0 %416 }
 0x14a   : > { %v418_v13 = vmul.f32 0.03125, %v417_v12 }
 0x14c   : > { %v419_v14 = vadd.f32 1e-06, %v418_v13 }
 0x14e   : > { %796 = vrsqrt.f32 %v419_v14 }
 0x158   : > { %v797_v15 = vpop.eup %796 }
 0x159   : > { %v421_v17 = vmul.f32 %v797_v15, %v413_v4 }
 0x15b   : > { %v429_v19 = vmul.f32 %v711_v16, %v421_v17 }
 0x15d   : > { %v437_v20 = vadd.f32 %v712_v18, %v429_v19 }
 0x15f   : > { %v438_v21 = vpack.c.bf16 %v437_v20, %v437_v20 }
 0x161   : > { %738 = vmatmul.mubr.msk.bf16.vlgmr.msra.gmra.mrb[0].mxu0 %vm407_vm0, %v438_v21 }
 0x234   : > { %v499_v25 = vpop.f32.mrb[0].mxu0 }
 0x235   : > { %v500_v26 = vadd.f32 %v713_v24, %v499_v25  ;;  %v739_v27 = vpop.f32.mrb[1].mxu0 }
 0x236   : > { %v502_v28 = vpop.f32.mrb[2].mxu0 }
 0x237   : > { %v505_v29 = vmax.f32 %v500_v26, 0.0  ;;  %v740_v30 = vpop.f32.mrb[3].mxu0 }
 0x239   : > { %v506_v31 = vpack.c.bf16 %v505_v29, %v505_v29 }
 0x23b   : > { %750 = vmatmul.mubr.msk.bf16.vlgmr.msra.gmra.mrb[0].mxu1 %vm546_vm2, %v506_v31 }
 0x30e   : > { %v584_v35 = vpop.f32.mrb[0].mxu1 }
 0x30f   : > { %v585_v36 = vadd.f32 %v717_v32, %v584_v35  ;;  %v751_v37 = vpop.f32.mrb[1].mxu1 }
 0x310   : > { %v587_v39 = vpop.f32.mrb[2].mxu1 }
 0x311   : > { %v590_v41 = vadd.f32 %v585_v36, %v944_v0  ;;  %v752_v42 = vpop.f32.mrb[3].mxu1 }
 0x313   : > { %v595_v43 = vmul.f32 %v594_v38, %v590_v41 }
 0x315   : > { %v596_v44 = vadd.f32 %v595_v43, %v593_v40 }
 0x317   : > { %597 = vst.msk [vmem:[%s400_s21] sm:$0xff] %vm407_vm0, %v596_v44 }
 0x318 PF: > { %s20_s11 = sadd.s32 1, %s839_s11   ;;  %s1013_s30 = smov %s835_s10 }
 0x319   : > { %p17_p2 = scmp.ge.s32.totalorder %s20_s11, 4   ;;  %s1014_s10 = smov %s1016_s13 }
 0x31b   :  { %19 = sbr.rel (!%p17_p2) target bundleno = 2 (0x2), region = 94 }
 0x322   :  { %623 = vsyncpa [#allocation3], 1 }
 0x323   :  { %625 = vsyncpa [#allocation3 + $0x1], 1 }

// kernel: transformer_decoder_forward.27
= control target key start
LH: loop header
LB: loop body
LE: loop exit
PB: predicated region body
PF: predicated region fallthrough
CT: control target
= control target key end

     0   :  { %v141_v1 = vmov 0.0   ;;  %vm142_vm0 = vmmov 0   ;;  %s185_s0 = inlined_call_operand.vmem [shape: f32[16,32], index: 0, kind: input, shape index: {}]   ;;  %s186_s1 = inlined_call_operand.vmem [shape: bf16[32,16], index: 1, kind: input, shape index: {}]   ;;  %s187_s2 = inlined_call_operand.hbm [shape: f32[16,16], index: 2, kind: output, shape index: {}]  }
   0x1   :  { %v115_v0 = vld [vmem:[%s186_s1] sm:$0xff]   ;;  %102 = vmatprep.subr.bf16.mxu0 %v141_v1  ;;  %v116_v2 = vld [vmem:[%s186_s1 + $0x8] sm:$0xff]   ;;  %106 = vmatprep.mubr.msk.bf16.mxu0 %vm142_vm0, %v141_v1 }
   0x2   :  { %103 = vmatpush3.bf16.msra.mxu0 %v115_v0  ;;  %v13_v3 = vld [vmem:[%s185_s0] sm:$0xff]  ;;  %v14_v4 = vld [vmem:[%s185_s0 + $0x8] sm:$0xff] }
   0x3   :  { %7 = vsyncpa [#allocation3], 0  ;;  %104 = vmatprep.subr.bf16.mxu0 %v141_v1  ;;  %v15_v5 = vpack.c.bf16 %v14_v4, %v13_v3  ;;  %vm32_vm1 = vcmask 261120   ;;  %s143_s17 = smov [#allocation2]   ;;  %vm77_vm2 = vcmask 130048  }
   0x4   :  { %s85_s18 = sshll.u32 %s143_s17, 4  ;;  %s86_s18 = int_to_ptr.vmem [resolvable:$true] %s85_s18 }
   0x5   :  { %s117_s1 = scalar_lea.vmem %s86_s18, 256  ;;  %p122_p1 = scmp.lt.s32.totalorder %s86_s18, %s86_s18 }
   0x6   :  { %105 = vmatpush3.bf16.msra.mxu0 %v116_v2  ;;  %p118_p0 = scmp.ne.s32.totalorder %s86_s18, %s117_s1  ;;  %p123_p2 = scmp.lt.s32.totalorder %s117_s1, %s117_s1 }
   0x8   :  { %p124_p3 = por %p123_p2, %p122_p1 }
   0x9   :  { %107 = vmatmul.mubr.msk.bf16.vlgmr.msra.gmra.mrb[0].mxu0 %vm32_vm1, %v15_v5 }
   0xa   :  { %p125_p4 = pnand %p124_p3, %p118_p0 }
  0xdc   :  { %v70_v6 = vpop.f32.mrb[0].mxu0 }
  0xdd   :  { %78 = vst.msk [vmem:[#allocation2] sm:$0xff] %vm77_vm2, %v70_v6  ;;  %v108_v7 = vpop.f32.mrb[1].mxu0 }
  0xde   :  { %v73_v8 = vpop.f32.mrb[2].mxu0 }
  0xdf   :  { %79 = vst.msk [vmem:[#allocation2 + $0x8] sm:$0xff] %vm77_vm2, %v73_v8  ;;  %v109_v9 = vpop.f32.mrb[3].mxu0 }
  0xe0   :  { %128 = shalt.err (!%p125_p4)
}
  0xe1   :  { %s129_s20 = scalar_lea.hbm %s187_s2, 256 }
  0xe2   :  { %p130_p5 = scmp.ne.s32.totalorder %s187_s2, %s129_s20  ;;  %p133_p6 = scmp.lt.u32.totalorder %s129_s20, %s187_s2 }
  0xe4   :  { %p135_p7 = pnand %p133_p6, %p130_p5 }
  0xe6   :  { %138 = shalt.err (!%p135_p7)
}
  0xe7   :  { %s144_s25 = smov 128   ;;  %s145_s26 = smov 8  }
  0xe8   :  { %91 = dma.vmem_to_hbm [thread:$0]  %s86_s18, 256, %s187_s2, [#allocation3], %s144_s25, %s144_s25, %s145_s26  }
  0xe9   :  { %139 = dma.done.wait [#allocation3], 256  }
  0xea   :  { %140 = vsyncadd [#allocation3], 4294967040 }
  0xeb   :  { %95 = vsyncpa [#allocation3], 1 }

// kernel: transformer_decoder_forward.26
= control target key start
LH: loop header
LB: loop body
LE: loop exit
PB: predicated region body
PF: predicated region fallthrough
CT: control target
= control target key end

     0   :  { %vm16_vm0 = vcmask 261120   ;;  %s118_s0 = inlined_call_operand.vmem [shape: f32[16,32], index: 0, kind: input, shape index: {}]   ;;  %s119_s1 = inlined_call_operand.vmem [shape: f32[1,32], index: 1, kind: input, shape index: {}]   ;;  %s120_s2 = inlined_call_operand.vmem [shape: f32[1,32], index: 2, kind: input, shape index: {}]   ;;  %s121_s3 = inlined_call_operand.vmem [shape: f32[16,32], index: 3, kind: output, shape index: {}]  }
   0x1   :  { %v14_v0 = vld [vmem:[%s118_s0] sm:$0xff]  ;;  %v15_v1 = vld [vmem:[%s118_s0 + $0x8] sm:$0xff] }
   0x2   :  { %v17_v2 = vsel %vm16_vm0, %v14_v0, 0.0  ;;  %v20_v3 = vsel %vm16_vm0, %v15_v1, 0.0  ;;  %v68_v21 = vld [vmem:[%s119_s1] ss:$0 sm:$0xff] }
   0x3   :  { %18 = vadd.xlane.f32.xlu0 %v17_v2  ;;  %v69_v23 = vld [vmem:[%s120_s2] ss:$0 sm:$0xff] }
   0x7   :  { %21 = vadd.xlane.f32.xlu0 %v20_v3 }
  0x90   :  { %v19_v4 = vpop.xlane.xlu0 %18 }
  0x91   :  { %v24_v5 = vmul.f32 0.03125, %v19_v4 }
  0x93   :  { %v26_v6 = vsub.f32 %v14_v0, %v24_v5 }
  0x94   :  { %v22_v7 = vpop.xlane.xlu0 %21 }
  0x95   :  { %v25_v8 = vmul.f32 0.03125, %v22_v7  ;;  %v28_v9 = vmul.f32 %v26_v6, %v26_v6 }
  0x97   :  { %v27_v10 = vsub.f32 %v15_v1, %v25_v8  ;;  %v30_v11 = vsel %vm16_vm0, %v28_v9, 0.0 }
  0x98   :  { %31 = vadd.xlane.f32.xlu1 %v30_v11 }
  0x99   :  { %v29_v12 = vmul.f32 %v27_v10, %v27_v10 }
  0x9b   :  { %v33_v13 = vsel %vm16_vm0, %v29_v12, 0.0 }
  0x9c   :  { %34 = vadd.xlane.f32.xlu1 %v33_v13 }
 0x125   :  { %v32_v14 = vpop.xlane.xlu1 %31 }
 0x126   :  { %v36_v15 = vmul.f32 0.03125, %v32_v14 }
 0x128   :  { %v38_v16 = vadd.f32 1e-06, %v36_v15 }
 0x129   :  { %v35_v17 = vpop.xlane.xlu1 %34 }
 0x12a   :  { %70 = vrsqrt.f32 %v38_v16  ;;  %v37_v18 = vmul.f32 0.03125, %v35_v17 }
 0x12c   :  { %v39_v19 = vadd.f32 1e-06, %v37_v18 }
 0x12e   :  { %72 = vrsqrt.f32 %v39_v19 }
 0x134   :  { %v71_v20 = vpop.eup %70 }
 0x135   :  { %v42_v22 = vmul.f32 %v71_v20, %v26_v6 }
 0x137   :  { %v51_v24 = vmul.f32 %v68_v21, %v42_v22 }
 0x138   :  { %v73_v25 = vpop.eup %72 }
 0x139   :  { %v60_v26 = vadd.f32 %v69_v23, %v51_v24  ;;  %v43_v27 = vmul.f32 %v73_v25, %v27_v10 }
 0x13b   :  { %62 = vst.msk [vmem:[%s121_s3] sm:$0xff] %vm16_vm0, %v60_v26  ;;  %v52_v28 = vmul.f32 %v68_v21, %v43_v27 }
 0x13d   :  { %v61_v29 = vadd.f32 %v69_v23, %v52_v28 }
 0x13f   :  { %63 = vst.msk [vmem:[%s121_s3 + $0x8] sm:$0xff] %vm16_vm0, %v61_v29 }

// kernel: transformer_decoder_forward.18
= control target key start
LH: loop header
LB: loop body
LE: loop exit
PB: predicated region body
PF: predicated region fallthrough
CT: control target
= control target key end

     0   :  { %s1377_s21 = smov 0   ;;  %s1379_s22 = smov 0   ;;  %s1523_s0 = inlined_call_operand.vmem [shape: bf16[2,8,32], index: 0, kind: input, shape index: {}]   ;;  %s1524_s1 = inlined_call_operand.vmem [shape: bf16[2,12,64], index: 1, kind: input, shape index: {}]   ;;  %s1525_s2 = inlined_call_operand.vmem [shape: f32[2,1,12], index: 2, kind: input, shape index: {}]   ;;  %s1526_s3 = inlined_call_operand.vmem [shape: f32[32,32], index: 3, kind: input, shape index: {}]   ;;  %s1527_s4 = inlined_call_operand.vmem [shape: f32[1,32], index: 4, kind: input, shape index: {}]   ;;  %s1528_s5 = inlined_call_operand.vmem [shape: f32[2,8,32], index: 5, kind: input, shape index: {}]   ;;  %s1529_s6 = inlined_call_operand.vmem [shape: f32[2,8,32], index: 6, kind: output, shape index: {}]  }
   0x1   :  { %s1381_s23 = smov 0  }
   0x2 LB: > { %s28_s24 = sadd.s32 1, %s1327_s22  ;;  %p1124_p0 = scmp.ge.s32.totalorder %s1331_s23, 1  ;;  %s1331_s23 = sphi %s1381_s23, %s16_s23   ;;  %s1327_s22 = sphi %s1379_s22, %s1531_s22   ;;  %s1323_s21 = sphi %s1377_s21, %s1530_s21  }
   0x3   : > { %p30_p1 = scmp.ge.s32.totalorder %s28_s24, 2  ;;  %p262_p2 = scmp.lt.s32.totalorder %s1331_s23, 3 }
   0x5   : > { %s1533_s24 = smov (%p30_p1, %s28_s24), 0  ;;  %p263_p3 = pnand %p1124_p0, %p262_p2 }
   0x6   : > { %p311_p4 = scmp.lt.s32.totalorder (!%p263_p3), %s1323_s21, 1  ;;  %v1333_v0 = vmov (!%p263_p3), 0.0   ;;  %vm1334_vm0 = vmmov (!%p263_p3), 0   ;;  %vm365_vm1 = vcmask (!%p263_p3), 64512   ;;  %vm412_vm2 = vcmask (!%p263_p3), 97280   ;;  %s1335_s12 = smov (!%p263_p3), 96  }
   0x7   : > { %266 = sbr.rel (%p263_p3) target bundleno = 2069 (0x815), region = 44  ;;  %1173 = vmatprep.subr.bf16.mxu0 (!%p263_p3), %v1333_v0  ;;  %1175 = vmatprep.mubr.msk.bf16.mxu0 (!%p263_p3), %vm1334_vm0, %v1333_v0  ;;  %s1336_s13 = smov (!%p263_p3), 120   ;;  %vm430_vm3 = vcmask (!%p263_p3), 1045504   ;;  %v475_v29 = vld [vmem:[%s1526_s3] sm:$0xff] (!%p263_p3)  ;;  %vm480_vm4 = vcmask (!%p263_p3), 1043456   ;;  %vm1008_vm5 = vcmask (!%p263_p3), 261120  }
   0x8   : > { %1185 = vmatprep.subr.bf16.mxu1 (!%p263_p3), %v1333_v0  ;;  %1187 = vmatprep.mubr.msk.bf16.mxu1 (!%p263_p3), %vm1334_vm0, %v1333_v0  ;;  %s1337_s14 = smov (!%p263_p3), 112   ;;  %v476_v30 = vpack.c.bf16 (!%p263_p3), %v475_v29, %v475_v29  ;;  %s1338_s17 = smov (!%p263_p3), 80  }
   0x9   : > { %s1339_s18 = smov (!%p263_p3), 104   ;;  %s1340_s19 = smov (!%p263_p3), 88  }
   0xa   : > { %v482_v31 = vsel (!%p263_p3), %vm480_vm4, %v476_v30, 0 }
   0xb   : > { %1186 = vmatpush3.bf16.msra.mxu1 (!%p263_p3), %v482_v31 }
   0xc   : > { %1197 = vmatprep.subr.bf16.mxu1 (!%p263_p3), %v1333_v0 }
   0xe   : > { %s1535_s21 = smov (!%p311_p4, %s1323_s21), 1 }
   0xf   : > { %s1401_s25 = sshll.u32 %s1535_s21, 3  ;;  %s1125_s29 = sshll.u32 %s1535_s21, 2 }
  0x10   : > { %s322_s28 = scalar_lea.vmem %s1524_s1, %s1401_s25  ;;  %s317_s8 = scalar_lea.vmem %s1523_s0, %s1125_s29 }
  0x11   : > { %v1407_v1 = vld [vmem:[%s322_s28] sm:$0x3f]   ;;  %s325_s11 = scalar_lea.vmem %s1525_s2, %s1535_s21  ;;  %s1341_s28 = smov 72  }
  0x12   : > { %v370_v2 = vsel %vm365_vm1, %v1407_v1, 0  ;;  %v351_v3 = vld [vmem:[%s317_s8] sm:$0xf]  ;;  %425 = vrot.lane.b32.xlu1 %v1407_v1, %s1335_s12  ;;  %s332_s9 = scalar_lea.vmem %s1528_s5, %s1401_s25 }
  0x13   : > { %1174 = vmatpush3.bf16.xpose.msra.mxu0 %v370_v2  ;;  %v1421_v4 = vld [vmem:[%s325_s11] ss:$0 sm:$0xff]  ;;  %v1136_v11 = vcombine.low %v351_v3, %v351_v3 }
  0x14   : > { %1179 = vmatprep.subr.bf16.mxu0 %v1333_v0 }
  0x16   : > { %530 = vrot.lane.b32.xlu1 %v1407_v1, %s1336_s13 }
  0x1a   : > { %1176 = vmatmul.mubr.msk.bf16.vlgmr.msra.gmra.mrb[0].mxu0 %vm365_vm1, %v351_v3  ;;  %690 = vrot.lane.b32.xlu1 %v1407_v1, %s1337_s14 }
  0x1b   : > { %1181 = vmatprep.mubr.msk.bf16.mxu0 %vm1334_vm0, %v1333_v0 }
  0x1e   : > { %688 = vrot.lane.b32.xlu1 %v1136_v11, %s1337_s14  ;;  %s339_s14 = scalar_lea.vmem %s1529_s6, %s1401_s25 }
  0x84   : > { %v426_v17 = vpop.permute.xlu1 %425 }
  0x85   : > { %v432_v18 = vsel %vm430_vm3, %v426_v17, 0 }
  0x86   : > { %1180 = vmatpush3.bf16.msra.mxu0 %v432_v18 }
  0x87   : > { %1191 = vmatprep.subr.bf16.mxu0 %v1333_v0 }
  0x88   : > { %v531_v21 = vpop.permute.xlu1 %530 }
  0x89   : > { %v536_v23 = vsel %vm365_vm1, %v531_v21, 0 }
  0x8c   : > { %v691_v25 = vpop.permute.xlu1 %690 }
  0x8d   : > { %v696_v27 = vsel %vm365_vm1, %v691_v25, 0 }
  0x90   : > { %v689_v28 = vpop.permute.xlu1 %688 }
  0xed   : > { %v406_v5 = vpop.f32.mrb[0].mxu0 }
  0xee   : > { %v407_v6 = vadd.f32 %v1421_v4, %v406_v5  ;;  %v1177_v7 = vpop.f32.mrb[1].mxu0 }
  0xef   : > { %v409_v8 = vpop.f32.mrb[2].mxu0 }
  0xf0   : > { %v1178_v9 = vpop.f32.mrb[3].mxu0  ;;  %v413_v10 = vsel %vm412_vm2, %v407_v6, -inf }
  0xf1   : > { %414 = vmax.xlane.f32.xlu0 %v413_v10 }
 0x17e   : > { %v415_v12 = vpop.xlane.xlu0 %414 }
 0x17f   : > { %v416_v13 = vsub.f32 %v407_v6, %v415_v12 }
 0x181   : > { %v417_v14 = vmul.f32 1.442695, %v416_v13  ;;  %v639_v13 = vld [vmem:[%s1526_s3 + $0x8] sm:$0xff] }
 0x183   : > { %1293 = vpow2.f32 %v417_v14  ;;  %v640_v14 = vpack.c.bf16 %v639_v13, %v639_v13 }
 0x18d   : > { %v1294_v15 = vpop.eup %1293 }
 0x18e   : > { %v419_v16 = vsel %vm412_vm2, %v1294_v15, 0.0 }
 0x18f   : > { %420 = vadd.xlane.f32.xlu0 %v419_v16 }
 0x1a5   : > { %528 = vrot.lane.b32.xlu0 %v1136_v11, %s1336_s13 }
 0x21c   : > { %v421_v19 = vpop.xlane.xlu0 %420 }
 0x21d   : > { %1295 = vrcp.f32 %v421_v19 }
 0x220   : > { %v529_v26 = vpop.permute.xlu0 %528 }
 0x227   : > { %v1296_v20 = vpop.eup %1295 }
 0x228   : > { %v423_v22 = vmul.f32 %v1296_v20, %v1294_v15  ;;  %v645_v15 = vsel %vm480_vm4, %v640_v14, 0 }
 0x22a   : > { %v424_v24 = vpack.c.bf16 %v423_v22, %v423_v22 }
 0x22c   : > { %1182 = vmatmul.mubr.msk.bf16.vlgmr.msra.gmra.mrb[4].mxu0 %vm412_vm2, %v424_v24 }
 0x22d   : > { %1192 = vmatpush3.bf16.xpose.msra.mxu0 %v536_v23  ;;  %1193 = vmatprep.mubr.msk.bf16.mxu0 %vm1334_vm0, %v1333_v0 }
 0x22e   : > { %1209 = vmatprep.subr.bf16.mxu0 %v1333_v0 }
 0x234   : > { %1194 = vmatmul.mubr.msk.bf16.vlgmr.msra.gmra.mrb[8].mxu0 %vm365_vm1, %v529_v26  ;;  %v799_v26 = vld [vmem:[%s1526_s3 + $0x10] sm:$0xff] }
 0x235   : > { %1210 = vmatpush3.bf16.xpose.msra.mxu0 %v696_v27  ;;  %1211 = vmatprep.mubr.msk.bf16.mxu0 %vm1334_vm0, %v1333_v0  ;;  %v800_v27 = vpack.c.bf16 %v799_v26, %v799_v26 }
 0x236   : > { %1215 = vmatprep.subr.bf16.mxu0 %v1333_v0 }
 0x237   : > { %v805_v31 = vsel %vm480_vm4, %v800_v27, 0 }
 0x23c   : > { %1212 = vmatmul.mubr.msk.bf16.vlgmr.msra.gmra.mrb[12].mxu0 %vm365_vm1, %v689_v28 }
 0x23d   : > { %1217 = vmatprep.mubr.msk.bf16.mxu0 %vm1334_vm0, %v1333_v0 }
 0x2ff   : > { %v468_v32 = vpop.f32.mrb[4].mxu0 }
 0x300   : > { %v474_v33 = vpack.c.bf16 %v468_v32, %v468_v32  ;;  %v1183_v34 = vpop.f32.mrb[5].mxu0 }
 0x301   : > { %v471_v35 = vpop.f32.mrb[6].mxu0 }
 0x302   : > { %v1184_v36 = vpop.f32.mrb[7].mxu0  ;;  %1188 = vmatmul.mubr.msk.bf16.vlgmr.msra.gmra.mrb[0].mxu1 %vm365_vm1, %v474_v33 }
 0x303   : > { %1199 = vmatprep.mubr.msk.bf16.mxu1 %vm1334_vm0, %v1333_v0 }
 0x307   : > { %v572_v37 = vpop.f32.mrb[8].mxu0 }
 0x308   : > { %v1195_v38 = vpop.f32.mrb[9].mxu0  ;;  %v573_v47 = vadd.f32 %v1421_v4, %v572_v37 }
 0x309   : > { %v575_v39 = vpop.f32.mrb[10].mxu0 }
 0x30a   : > { %v1196_v40 = vpop.f32.mrb[11].mxu0  ;;  %v578_v48 = vsel %vm412_vm2, %v573_v47, -inf }
 0x30f   : > { %v732_v41 = vpop.f32.mrb[12].mxu0 }
 0x310   : > { %v733_v42 = vadd.f32 %v1421_v4, %v732_v41  ;;  %v1213_v43 = vpop.f32.mrb[13].mxu0 }
 0x311   : > { %v735_v44 = vpop.f32.mrb[14].mxu0 }
 0x312   : > { %v1214_v45 = vpop.f32.mrb[15].mxu0  ;;  %v738_v46 = vsel %vm412_vm2, %v733_v42, -inf }
 0x313   : > { %739 = vmax.xlane.f32.xlu1 %v738_v46 }
 0x324   : > { %750 = vrot.lane.b32.xlu1 %v1407_v1, %s1338_s17 }
 0x328   : > { %848 = vrot.lane.b32.xlu1 %v1136_v11, %s1339_s18 }
 0x34c   : > { %579 = vmax.xlane.f32.xlu1 %v578_v48 }
 0x35d   : > { %590 = vrot.lane.b32.xlu1 %v1407_v1, %s1340_s19 }
 0x3a0   : > { %v740_v49 = vpop.xlane.xlu1 %739 }
 0x3a1   : > { %v741_v50 = vsub.f32 %v733_v42, %v740_v49  ;;  %v959_v42 = vld [vmem:[%s1526_s3 + $0x18] sm:$0xff] }
 0x3a2   : > { %v960_v43 = vpack.c.bf16 %v959_v42, %v959_v42 }
 0x3a3   : > { %v742_v51 = vmul.f32 1.442695, %v741_v50 }
 0x3a4   : > { %v751_v52 = vpop.permute.xlu1 %750 }
 0x3a5   : > { %1297 = vpow2.f32 %v742_v51  ;;  %v756_v53 = vsel %vm430_vm3, %v751_v52, 0  ;;  %v342_v52 = vld [vmem:[%s332_s9] sm:$0xff] }
 0x3a6   : > { %1216 = vmatpush3.bf16.msra.mxu0 %v756_v53  ;;  %v1130_v53 = vld [vmem:[%s1527_s4] ss:$0 sm:$0xff] }
 0x3a7   : > { %1227 = vmatprep.subr.bf16.mxu0 %v1333_v0 }
 0x3a8   : > { %v849_v56 = vpop.permute.xlu1 %848 }
 0x3af   : > { %v1298_v54 = vpop.eup %1297 }
 0x3b0   : > { %v744_v55 = vsel %vm412_vm2, %v1298_v54, 0.0 }
 0x3b1   : > { %745 = vadd.xlane.f32.xlu0 %v744_v55 }
 0x3c7   : > { %850 = vrot.lane.b32.xlu0 %v1407_v1, %s1339_s18 }
 0x3d9   : > { %v580_v57 = vpop.xlane.xlu1 %579 }
 0x3da   : > { %v581_v58 = vsub.f32 %v573_v47, %v580_v57 }
 0x3dc   : > { %v582_v59 = vmul.f32 1.442695, %v581_v58 }
 0x3dd   : > { %v591_v62 = vpop.permute.xlu1 %590 }
 0x3de   : > { %1299 = vpow2.f32 %v582_v59  ;;  %v596_v63 = vsel %vm430_vm3, %v591_v62, 0 }
 0x3df   : > { %1198 = vmatpush3.bf16.msra.mxu1 %v596_v63 }
 0x3e0   : > { %1203 = vmatprep.subr.bf16.mxu1 %v1333_v0 }
 0x3e8   : > { %v1300_v60 = vpop.eup %1299 }
 0x3e9   : > { %v584_v61 = vsel %vm412_vm2, %v1300_v60, 0.0 }
 0x3ea   : > { %585 = vadd.xlane.f32.xlu0 %v584_v61 }
 0x43e   : > { %v746_v2 = vpop.xlane.xlu0 %745 }
 0x43f   : > { %1301 = vrcp.f32 %v746_v2 }
 0x442   : > { %v851_v5 = vpop.permute.xlu0 %850 }
 0x443   : > { %v856_v7 = vsel %vm365_vm1, %v851_v5, 0 }
 0x449   : > { %v1302_v3 = vpop.eup %1301 }
 0x44a   : > { %v748_v6 = vmul.f32 %v1302_v3, %v1298_v54  ;;  %v350_v54 = vadd.f32 %v1130_v53, %v342_v52 }
 0x44c   : > { %v749_v8 = vpack.c.bf16 %v748_v6, %v748_v6 }
 0x44e   : > { %1218 = vmatmul.mubr.msk.bf16.vlgmr.msra.gmra.mrb[16].mxu0 %vm412_vm2, %v749_v8 }
 0x44f   : > { %1228 = vmatpush3.bf16.xpose.msra.mxu0 %v856_v7  ;;  %1229 = vmatprep.mubr.msk.bf16.mxu0 %vm1334_vm0, %v1333_v0 }
 0x456   : > { %1230 = vmatmul.mubr.msk.bf16.vlgmr.msra.gmra.mrb[20].mxu0 %vm365_vm1, %v849_v56 }
 0x477   : > { %v586_v9 = vpop.xlane.xlu0 %585 }
 0x478   : > { %1303 = vrcp.f32 %v586_v9 }
 0x482   : > { %v1304_v10 = vpop.eup %1303 }
 0x483   : > { %v588_v11 = vmul.f32 %v1304_v10, %v1300_v60 }
 0x485   : > { %v589_v12 = vpack.c.bf16 %v588_v11, %v588_v11 }
 0x487   : > { %1200 = vmatmul.mubr.msk.bf16.vlgmr.msra.gmra.mrb[4].mxu1 %vm412_vm2, %v589_v12 }
 0x488   : > { %1205 = vmatprep.mubr.msk.bf16.mxu1 %vm1334_vm0, %v1333_v0  ;;  %1204 = vmatpush3.bf16.msra.mxu1 %v645_v15 }
 0x489   : > { %1221 = vmatprep.subr.bf16.mxu1 %v1333_v0 }
 0x521   : > { %v792_v16 = vpop.f32.mrb[16].mxu0 }
 0x522   : > { %v1219_v17 = vpop.f32.mrb[17].mxu0 }
 0x523   : > { %v795_v18 = vpop.f32.mrb[18].mxu0 }
 0x524   : > { %v1220_v19 = vpop.f32.mrb[19].mxu0 }
 0x529   : > { %v892_v20 = vpop.f32.mrb[20].mxu0 }
 0x52a   : > { %v893_v21 = vadd.f32 %v1421_v4, %v892_v20  ;;  %v1231_v22 = vpop.f32.mrb[21].mxu0  ;;  %v798_v4 = vpack.c.bf16 %v792_v16, %v792_v16 }
 0x52b   : > { %v895_v23 = vpop.f32.mrb[22].mxu0 }
 0x52c   : > { %v1232_v24 = vpop.f32.mrb[23].mxu0  ;;  %v898_v25 = vsel %vm412_vm2, %v893_v21, -inf }
 0x52d   : > { %899 = vmax.xlane.f32.xlu0 %v898_v25 }
 0x55a   : > { %v632_v28 = vpop.f32.mrb[4].mxu1 }
 0x55b   : > { %v638_v29 = vpack.c.bf16 %v632_v28, %v632_v28  ;;  %v1201_v30 = vpop.f32.mrb[5].mxu1 }
 0x55c   : > { %v635_v32 = vpop.f32.mrb[6].mxu1 }
 0x55d   : > { %v1202_v33 = vpop.f32.mrb[7].mxu1  ;;  %1206 = vmatmul.mubr.msk.bf16.vlgmr.msra.gmra.mrb[0].mxu1 %vm365_vm1, %v638_v29 }
 0x55e   : > { %1222 = vmatpush3.bf16.msra.mxu1 %v805_v31  ;;  %1223 = vmatprep.mubr.msk.bf16.mxu1 %vm1334_vm0, %v1333_v0 }
 0x55f   : > { %1233 = vmatprep.subr.bf16.mxu1 %v1333_v0 }
 0x569   : > { %1224 = vmatmul.mubr.msk.bf16.vlgmr.msra.gmra.mrb[0].mxu1 %vm365_vm1, %v798_v4 }
 0x56a   : > { %1235 = vmatprep.mubr.msk.bf16.mxu1 %vm1334_vm0, %v1333_v0 }
 0x5ba   : > { %v900_v34 = vpop.xlane.xlu0 %899 }
 0x5bb   : > { %v901_v35 = vsub.f32 %v893_v21, %v900_v34 }
 0x5bd   : > { %v902_v36 = vmul.f32 1.442695, %v901_v35 }
 0x5bf   : > { %1305 = vpow2.f32 %v902_v36 }
 0x5c9   : > { %v1306_v37 = vpop.eup %1305 }
 0x5ca   : > { %v904_v38 = vsel %vm412_vm2, %v1306_v37, 0.0 }
 0x5cb   : > { %905 = vadd.xlane.f32.xlu0 %v904_v38 }
 0x5e1   : > { %910 = vrot.lane.b32.xlu0 %v1407_v1, %s1341_s28  ;;  %v965_v1 = vsel %vm480_vm4, %v960_v43, 0 }
 0x658   : > { %v906_v39 = vpop.xlane.xlu0 %905 }
 0x659   : > { %1307 = vrcp.f32 %v906_v39 }
 0x65c   : > { %v911_v40 = vpop.permute.xlu0 %910 }
 0x65d   : > { %v916_v41 = vsel %vm430_vm3, %v911_v40, 0 }
 0x65e   : > { %1234 = vmatpush3.bf16.msra.mxu1 %v916_v41 }
 0x65f   : > { %1239 = vmatprep.subr.bf16.mxu1 %v1333_v0 }
 0x663   : > { %v1308_v44 = vpop.eup %1307 }
 0x664   : > { %v908_v45 = vmul.f32 %v1308_v44, %v1306_v37 }
 0x666   : > { %v909_v46 = vpack.c.bf16 %v908_v45, %v908_v45 }
 0x668   : > { %1236 = vmatmul.mubr.msk.bf16.vlgmr.msra.gmra.mrb[8].mxu1 %vm412_vm2, %v909_v46 }
 0x669   : > { %1240 = vmatpush3.bf16.msra.mxu1 %v965_v1  ;;  %1241 = vmatprep.mubr.msk.bf16.mxu1 %vm1334_vm0, %v1333_v0 }
 0x73b   : > { %v952_v47 = vpop.f32.mrb[8].mxu1 }
 0x73c   : > { %v958_v48 = vpack.c.bf16 %v952_v47, %v952_v47  ;;  %v1237_v49 = vpop.f32.mrb[9].mxu1 }
 0x73d   : > { %v955_v50 = vpop.f32.mrb[10].mxu1 }
 0x73e   : > { %v1238_v51 = vpop.f32.mrb[11].mxu1  ;;  %1242 = vmatmul.mubr.msk.bf16.vlgmr.msra.gmra.mrb[0].mxu1 %vm365_vm1, %v958_v48 }
 0x811   : > { %v1001_v0 = vpop.f32.mrb[0].mxu1 }
 0x812   : > { %v1245_v55 = vadd.f32 %v1001_v0, %v350_v54  ;;  %v1243_v56 = vpop.f32.mrb[1].mxu1 }
 0x813   : > { %v1004_v57 = vpop.f32.mrb[2].mxu1 }
 0x814   : > { %1009 = vst.msk [vmem:[%s339_s14] sm:$0xff] %vm1008_vm5, %v1245_v55  ;;  %v1244_v58 = vpop.f32.mrb[3].mxu1 }
 0x815 PF: > { %s16_s23 = sadd.s32 1, %s1331_s23   ;;  %s1530_s21 = smov %s1327_s22 }
 0x816   : > { %p13_p5 = scmp.ge.s32.totalorder %s16_s23, 4   ;;  %s1531_s22 = smov %s1533_s24 }
 0x818   :  { %15 = sbr.rel (!%p13_p5) target bundleno = 2 (0x2), region = 83 }

</bundles_post_ra>
